<compile_context>
chip_gen: v7x
topology: tpu7x:2x2x1
jax: 0.10.0
libtpu: 0.0.40
codegen_flags: <defaults>
</compile_context>

<pallas_src>
import functools
import math

import jax
import jax.numpy as jnp
from jax import lax
from jax.experimental import pallas as pl
from jax.experimental.pallas import tpu as pltpu


# ----------------------------- fused Pallas kernel ---------------------------------
def _decoder_kernel(x_ref, f_ref, mrow_ref, mcol_ref,
                    in_w_ref, in_b_ref,
                    ff_w_ref, qk_w_ref, v_w_ref, ao_w_ref, c_w_ref, bias_ref,
                    out_w_ref, out_b_ref,
                    out_ref, feat_ref,
                    *, num_layers, alpha, c, cq, cv):
    """Full Decoder forward for one batch element (channel-last (L, C) layout)."""
    cdt = in_w_ref.dtype                          # MXU compute dtype (bf16 or f32)
    L = x_ref.shape[0]

    mrow = mrow_ref[...].astype(jnp.float32)      # (1, L)
    mcol = mcol_ref[...].astype(jnp.float32)      # (L, 1)
    logm = jnp.log(mrow + 1e-6)                   # computed once, reused every layer

    # ---- Decoder.conv_1x1 : (L, Din) @ (Din, C)
    feat = jnp.dot(x_ref[...].astype(cdt), in_w_ref[...],
                   preferred_element_type=jnp.float32) + in_b_ref[...]
    f_enc = f_ref[...].astype(cdt)                # encoder features (value-conv input)

    for l in range(num_layers):                   # static unroll over layers
        d = 2 ** l
        bias = bias_ref[l]                        # (8, Cb) f32; rows: ff|qk|v|ao|c
        ff_b = bias[0:1, :c]
        qk_b = bias[1:2, :2 * cq]
        v_b = bias[2:3, :cv]
        ao_b = bias[3:4, :c]
        c_b = bias[4:5, :c]

        # ---- ConvFeedForward: Conv1d(k=3, dilation=d, padding=d) + ReLU, one matmul
        zpad = jnp.zeros((d, c), jnp.float32)
        x_m = jnp.concatenate([zpad, feat[:L - d, :]], axis=0)   # feat[t - d]
        x_p = jnp.concatenate([feat[d:, :], zpad], axis=0)       # feat[t + d]
        taps = jnp.concatenate([x_m, feat, x_p], axis=1)         # (L, 3C)
        h = jnp.dot(taps.astype(cdt), ff_w_ref[l],
                    preferred_element_type=jnp.float32) + ff_b
        h = jnp.maximum(h, 0.0)

        # ---- InstanceNorm1d over length (no affine, eps=1e-5, biased variance)
        mean = jnp.mean(h, axis=0, keepdims=True)
        ctr = h - mean
        var = jnp.mean(ctr * ctr, axis=0, keepdims=True)
        n = ctr * lax.rsqrt(var + 1e-5)

        # ---- AttLayer (normal_att, decoder): q|k from n (packed), v from encoder feat
        qk = jnp.dot(n.astype(cdt), qk_w_ref[l],
                     preferred_element_type=jnp.float32) + qk_b
        q = qk[:, :cq]                            # 1/sqrt(cq) folded into q weights
        k = qk[:, cq:]
        v = jnp.dot(f_enc, v_w_ref[l],
                    preferred_element_type=jnp.float32) + v_b

        energy = lax.dot_general(q.astype(cdt), k.astype(cdt),
                                 (((1,), (1,)), ((), ())),
                                 preferred_element_type=jnp.float32)   # (L, L)
        att = energy + logm
        att = jnp.exp(att - jnp.max(att, axis=-1, keepdims=True))
        att = att * pl.reciprocal(jnp.sum(att, axis=-1, keepdims=True), approx=True)
        att = att * mrow
        att_out = jnp.dot(att.astype(cdt), v.astype(cdt),
                          preferred_element_type=jnp.float32)          # (L, Cv)
        att_out = jnp.maximum(att_out, 0.0)
        att_out = (jnp.dot(att_out.astype(cdt), ao_w_ref[l],
                           preferred_element_type=jnp.float32) + ao_b) * mcol

        # ---- residual combine + conv_1x1 (+ dropout == identity in eval mode)
        out = alpha * att_out + h
        out = jnp.dot(out.astype(cdt), c_w_ref[l],
                      preferred_element_type=jnp.float32) + c_b
        # TODO(synk): nn.Dropout is identity in eval mode; training dropout not modeled.
        feat = (feat + out) * mcol

    feat_ref[...] = feat.astype(feat_ref.dtype)

    # ---- Decoder.conv_out fused into the same kernel
    logits = jnp.dot(feat.astype(cdt), out_w_ref[...],
                     preferred_element_type=jnp.float32) + out_b_ref[...]
    out_ref[...] = (logits * mcol).astype(out_ref.dtype)


# ----------------------------- weight packing & wrapper ----------------------------
def _pack_decoder_params(params, num_layers, use_bf16):
    """Pack per-layer weights/biases into stacked arrays (fewer, larger DMA inputs)."""
    wdt = jnp.bfloat16 if use_bf16 else jnp.float32
    C = params["in_w"].shape[1]
    Cq = params["layers"][0]["q_w"].shape[1]
    Cv = params["layers"][0]["v_w"].shape[1]
    Cb = max(C, 2 * Cq, Cv)
    qscale = 1.0 / math.sqrt(Cq)

    def pad_b(b):
        return jnp.pad(b, ((0, 0), (0, Cb - b.shape[1])))

    ff_w, qk_w, v_w, ao_w, c_w, biases = [], [], [], [], [], []
    for p in params["layers"]:
        ff_w.append(jnp.concatenate([p["ff_w0"], p["ff_w1"], p["ff_w2"]], axis=0))
        qk_w.append(jnp.concatenate([p["q_w"] * qscale, p["k_w"]], axis=1))
        v_w.append(p["v_w"])
        ao_w.append(p["ao_w"])
        c_w.append(p["c_w"])
        biases.append(jnp.concatenate([
            pad_b(p["ff_b"]),
            pad_b(jnp.concatenate([p["q_b"] * qscale, p["k_b"]], axis=1)),
            pad_b(p["v_b"]),
            pad_b(p["ao_b"]),
            pad_b(p["c_b"]),
            jnp.zeros((3, Cb), jnp.float32),
        ], axis=0))                                        # (8, Cb)

    packed = dict(
        in_w=params["in_w"].astype(wdt),
        in_b=params["in_b"].astype(jnp.float32),
        ff_w=jnp.stack(ff_w).astype(wdt),                  # (nl, 3C, C)
        qk_w=jnp.stack(qk_w).astype(wdt),                  # (nl, C, 2Cq)
        v_w=jnp.stack(v_w).astype(wdt),                    # (nl, C, Cv)
        ao_w=jnp.stack(ao_w).astype(wdt),                  # (nl, Cv, C)
        c_w=jnp.stack(c_w).astype(wdt),                    # (nl, C, C)
        bias=jnp.stack(biases).astype(jnp.float32),        # (nl, 8, Cb)
        out_w=params["out_w"].astype(wdt),
        out_b=params["out_b"].astype(jnp.float32),
    )
    return packed, C, Cq, Cv


def decoder_forward(x_bcl, f_bcl, mask_bcl, params, num_layers, alpha, use_bf16=True):
    """Decoder.forward.  Inputs follow PyTorch (B, C, L); outputs likewise."""
    x = jnp.transpose(x_bcl, (0, 2, 1)).astype(jnp.float32)   # (B, L, input_dim)
    f = jnp.transpose(f_bcl, (0, 2, 1)).astype(jnp.float32)   # (B, L, num_f_maps)
    mrow = mask_bcl[:, 0:1, :].astype(jnp.float32)            # (B, 1, L)
    mcol = jnp.transpose(mrow, (0, 2, 1))                     # (B, L, 1)

    B, L, Din = x.shape
    packed, C, Cq, Cv = _pack_decoder_params(params, num_layers, use_bf16)
    num_classes = packed["out_w"].shape[1]

    def bcast(shape):
        nd = len(shape)
        return pl.BlockSpec(shape, lambda i, _nd=nd: (0,) * _nd)

    def per_batch(shape):
        nd = len(shape)
        return pl.BlockSpec((None,) + shape, lambda i, _nd=nd: (i,) + (0,) * _nd)

    in_specs = [
        per_batch((L, Din)),                      # x
        per_batch((L, C)),                        # encoder features
        per_batch((1, L)),                        # mask row
        per_batch((L, 1)),                        # mask col
        bcast(packed["in_w"].shape), bcast(packed["in_b"].shape),
        bcast(packed["ff_w"].shape), bcast(packed["qk_w"].shape),
        bcast(packed["v_w"].shape), bcast(packed["ao_w"].shape),
        bcast(packed["c_w"].shape), bcast(packed["bias"].shape),
        bcast(packed["out_w"].shape), bcast(packed["out_b"].shape),
    ]
    out_specs = (per_batch((L, num_classes)), per_batch((L, C)))
    out_shape = (jax.ShapeDtypeStruct((B, L, num_classes), jnp.float32),
                 jax.ShapeDtypeStruct((B, L, C), jnp.float32))

    kernel = functools.partial(_decoder_kernel, num_layers=num_layers,
                               alpha=float(alpha), c=C, cq=Cq, cv=Cv)
    out, feat = pl.pallas_call(
        kernel,
        out_shape=out_shape,
        grid=(B,),
        in_specs=in_specs,
        out_specs=out_specs,
        compiler_params=pltpu.CompilerParams(dimension_semantics=("parallel",)),
    )(x, f, mrow, mcol,
      packed["in_w"], packed["in_b"],
      packed["ff_w"], packed["qk_w"], packed["v_w"], packed["ao_w"],
      packed["c_w"], packed["bias"], packed["out_w"], packed["out_b"])
    return jnp.transpose(out, (0, 2, 1)), jnp.transpose(feat, (0, 2, 1))


# ---------------------------- deterministic parameter init -------------------------
def init_params(key, input_dim, C, num_classes, num_layers, r1, r2):
    Cq, Cv = C // r1, C // r2
    keys = [key]

    def nxt():
        keys[0], sub = jax.random.split(keys[0])
        return sub

    def w(shape, scale=0.1):
        return jax.random.normal(nxt(), shape, jnp.float32) * scale

    params = {
        "in_w": w((input_dim, C)), "in_b": w((1, C), 0.02),
        "out_w": w((C, num_classes)), "out_b": w((1, num_classes), 0.02),
        "layers": [],
    }
    for _ in range(num_layers):
        params["layers"].append({
            "ff_w0": w((C, C)), "ff_w1": w((C, C)), "ff_w2": w((C, C)),
            "ff_b": w((1, C), 0.02),
            "q_w": w((C, Cq)), "q_b": w((1, Cq), 0.02),
            "k_w": w((C, Cq)), "k_b": w((1, Cq), 0.02),
            "v_w": w((C, Cv)), "v_b": w((1, Cv), 0.02),
            "ao_w": w((Cv, C)), "ao_b": w((1, C), 0.02),
            "c_w": w((C, C)), "c_b": w((1, C), 0.02),
        })
    return params


# ------------------------------ pure-JAX reference ---------------------------------
def ref_decoder(x_bcl, f_bcl, mask_bcl, params, num_layers, alpha):
    x = jnp.transpose(x_bcl, (0, 2, 1)).astype(jnp.float32)
    f = jnp.transpose(f_bcl, (0, 2, 1)).astype(jnp.float32)
    mrow = mask_bcl[:, 0:1, :].astype(jnp.float32)
    mcol = jnp.transpose(mrow, (0, 2, 1))
    feat = x @ params["in_w"] + params["in_b"]
    for i in range(num_layers):
        p = params["layers"][i]
        d = 2 ** i
        B, L, C = feat.shape
        pad = jnp.zeros((B, d, C), jnp.float32)
        x_m = jnp.concatenate([pad, feat[:, :L - d, :]], axis=1)
        x_p = jnp.concatenate([feat[:, d:, :], pad], axis=1)
        h = x_m @ p["ff_w0"] + feat @ p["ff_w1"] + x_p @ p["ff_w2"] + p["ff_b"]
        h = jnp.maximum(h, 0.0)
        mean = h.mean(axis=1, keepdims=True)
        var = ((h - mean) ** 2).mean(axis=1, keepdims=True)
        n = (h - mean) / jnp.sqrt(var + 1e-5)
        q = n @ p["q_w"] + p["q_b"]
        k = n @ p["k_w"] + p["k_b"]
        v = f @ p["v_w"] + p["v_b"]
        energy = jnp.einsum("blc,bmc->blm", q, k) / math.sqrt(q.shape[-1])
        att = energy + jnp.log(mrow + 1e-6)
        att = jax.nn.softmax(att, axis=-1)
        att = att * mrow
        att_out = jnp.einsum("blm,bmc->blc", att, v)
        att_out = (jnp.maximum(att_out, 0.0) @ p["ao_w"] + p["ao_b"]) * mcol
        out = alpha * att_out + h
        out = out @ p["c_w"] + p["c_b"]
        feat = (feat + out) * mcol
    out = (feat @ params["out_w"] + params["out_b"]) * mcol
    return jnp.transpose(out, (0, 2, 1)), jnp.transpose(feat, (0, 2, 1))


# ----------------------------------- main -------------------------------------------
if __name__ == "__main__":
    B, L = 2, 64
    input_dim, num_f_maps, num_classes = 24, 32, 8
    num_layers, r1, r2 = 3, 2, 2
    alpha = 1.0

    key = jax.random.PRNGKey(0)
    kx, kf, kp = jax.random.split(key, 3)
    x = jax.random.normal(kx, (B, input_dim, L), jnp.float32)
    fenc = jax.random.normal(kf, (B, num_f_maps, L), jnp.float32)
    valid = jnp.array([L, L - 11])
    pos = jnp.arange(L)[None, :]
    mask1 = (pos < valid[:, None]).astype(jnp.float32)                 # (B, L)
    mask = jnp.broadcast_to(mask1[:, None, :], (B, num_classes, L))    # (B, num_classes, L)

    params = init_params(kp, input_dim, num_f_maps, num_classes, num_layers, r1, r2)

    # f32 MXU path: strict semantic check against the pure-JAX reference.
    out32, feat32 = decoder_forward(x, fenc, mask, params, num_layers, alpha,
                                    use_bf16=False)
    out32 = jax.block_until_ready(out32)
    feat32 = jax.block_until_ready(feat32)

    # bf16 MXU path (default fast path for v6e/v7x): looser tolerance.
    out16, feat16 = decoder_forward(x, fenc, mask, params, num_layers, alpha,
                                    use_bf16=True)
    out16 = jax.block_until_ready(out16)
    feat16 = jax.block_until_ready(feat16)

    ref_out, ref_feat = ref_decoder(x, fenc, mask, params, num_layers, alpha)
    assert out32.shape == (B, num_classes, L)
    assert feat32.shape == (B, num_f_maps, L)
    assert bool(jnp.allclose(out32, ref_out, atol=1e-2, rtol=1e-2))
    assert bool(jnp.allclose(feat32, ref_feat, atol=1e-2, rtol=1e-2))
    assert bool(jnp.allclose(out16, ref_out, atol=5e-2, rtol=5e-2))
    assert bool(jnp.allclose(feat16, ref_feat, atol=5e-2, rtol=5e-2))
    print("KERNEL_OK")
</pallas_src>

<mosaic_0001>
module attributes {stable_mosaic.version = 11 : i64} {
  func.func @_decoder_kernel(%arg0: i32, %arg1: memref<1x64x24xf32, #tpu.memory_space<vmem>>, %arg2: memref<1x64x32xf32, #tpu.memory_space<vmem>>, %arg3: memref<1x1x64xf32, #tpu.memory_space<vmem>>, %arg4: memref<1x64x1xf32, #tpu.memory_space<vmem>>, %arg5: memref<24x32xf32, #tpu.memory_space<vmem>>, %arg6: memref<1x32xf32, #tpu.memory_space<vmem>>, %arg7: memref<3x96x32xf32, #tpu.memory_space<vmem>>, %arg8: memref<3x32x32xf32, #tpu.memory_space<vmem>>, %arg9: memref<3x32x16xf32, #tpu.memory_space<vmem>>, %arg10: memref<3x16x32xf32, #tpu.memory_space<vmem>>, %arg11: memref<3x32x32xf32, #tpu.memory_space<vmem>>, %arg12: memref<3x8x32xf32, #tpu.memory_space<vmem>>, %arg13: memref<32x8xf32, #tpu.memory_space<vmem>>, %arg14: memref<1x8xf32, #tpu.memory_space<vmem>>, %arg15: memref<1x64x8xf32, #tpu.memory_space<vmem>>, %arg16: memref<1x64x32xf32, #tpu.memory_space<vmem>>) attributes {dimension_semantics = [#tpu.dimension_semantics<parallel>], iteration_bounds = array<i64: 2>, scalar_prefetch = 0 : i64, scratch_operands = 0 : i64, tpu.core_type = #tpu.core_type<tc>, window_params = [{transform_indices = @transform_0, window_bounds = array<i64: 1, 64, 24>}, {transform_indices = @transform_1, window_bounds = array<i64: 1, 64, 32>}, {transform_indices = @transform_2, window_bounds = array<i64: 1, 1, 64>}, {transform_indices = @transform_3, window_bounds = array<i64: 1, 64, 1>}, {pipeline_mode = #tpu.pipeline_mode<synchronous>, transform_indices = @transform_4, window_bounds = array<i64: 24, 32>}, {pipeline_mode = #tpu.pipeline_mode<synchronous>, transform_indices = @transform_5, window_bounds = array<i64: 1, 32>}, {pipeline_mode = #tpu.pipeline_mode<synchronous>, transform_indices = @transform_6, window_bounds = array<i64: 3, 96, 32>}, {pipeline_mode = #tpu.pipeline_mode<synchronous>, transform_indices = @transform_7, window_bounds = array<i64: 3, 32, 32>}, {pipeline_mode = #tpu.pipeline_mode<synchronous>, transform_indices = @transform_8, window_bounds = array<i64: 3, 32, 16>}, {pipeline_mode = #tpu.pipeline_mode<synchronous>, transform_indices = @transform_9, window_bounds = array<i64: 3, 16, 32>}, {pipeline_mode = #tpu.pipeline_mode<synchronous>, transform_indices = @transform_10, window_bounds = array<i64: 3, 32, 32>}, {pipeline_mode = #tpu.pipeline_mode<synchronous>, transform_indices = @transform_11, window_bounds = array<i64: 3, 8, 32>}, {pipeline_mode = #tpu.pipeline_mode<synchronous>, transform_indices = @transform_12, window_bounds = array<i64: 32, 8>}, {pipeline_mode = #tpu.pipeline_mode<synchronous>, transform_indices = @transform_13, window_bounds = array<i64: 1, 8>}, {transform_indices = @transform_14, window_bounds = array<i64: 1, 64, 8>}, {transform_indices = @transform_15, window_bounds = array<i64: 1, 64, 32>}]} {
    %c0 = arith.constant 0 : index
    %c0_0 = arith.constant 0 : index
    %c0_1 = arith.constant 0 : index
    %0 = vector.load %arg3[%c0, %c0_0, %c0_1] : memref<1x1x64xf32, #tpu.memory_space<vmem>>, vector<1x1x64xf32>
    %1 = vector.shape_cast %0 : vector<1x1x64xf32> to vector<1x64xf32>
    %c0_2 = arith.constant 0 : index
    %c0_3 = arith.constant 0 : index
    %c0_4 = arith.constant 0 : index
    %2 = vector.load %arg4[%c0_2, %c0_3, %c0_4] : memref<1x64x1xf32, #tpu.memory_space<vmem>>, vector<1x64x1xf32>
    %3 = vector.shape_cast %2 : vector<1x64x1xf32> to vector<64x1xf32>
    %cst = arith.constant 9.99999997E-7 : f32
    %4 = vector.broadcast %cst : f32 to vector<1x64xf32>
    %5 = arith.addf %1, %4 : vector<1x64xf32>
    %6 = math.log %5 : vector<1x64xf32>
    %c0_5 = arith.constant 0 : index
    %c0_6 = arith.constant 0 : index
    %c0_7 = arith.constant 0 : index
    %7 = vector.load %arg1[%c0_5, %c0_6, %c0_7] : memref<1x64x24xf32, #tpu.memory_space<vmem>>, vector<1x64x24xf32>
    %8 = vector.shape_cast %7 : vector<1x64x24xf32> to vector<64x24xf32>
    %c0_8 = arith.constant 0 : index
    %c0_9 = arith.constant 0 : index
    %9 = vector.load %arg5[%c0_8, %c0_9] : memref<24x32xf32, #tpu.memory_space<vmem>>, vector<24x32xf32>
    %cst_10 = arith.constant dense<0.000000e+00> : vector<64x32xf32>
    %10 = tpu.matmul %8, %9, %cst_10 {dimension_numbers = #tpu.dot_dimension_numbers<[1], [0], [0], [1], [0, 0, 1, 1], [], []>} : vector<64x24xf32>, vector<24x32xf32>, vector<64x32xf32> -> vector<64x32xf32>
    %c0_11 = arith.constant 0 : index
    %c0_12 = arith.constant 0 : index
    %11 = vector.load %arg6[%c0_11, %c0_12] : memref<1x32xf32, #tpu.memory_space<vmem>>, vector<1x32xf32>
    %12 = vector.broadcast %11 : vector<1x32xf32> to vector<64x32xf32>
    %13 = arith.addf %10, %12 : vector<64x32xf32>
    %c0_13 = arith.constant 0 : index
    %c0_14 = arith.constant 0 : index
    %c0_15 = arith.constant 0 : index
    %14 = vector.load %arg2[%c0_13, %c0_14, %c0_15] : memref<1x64x32xf32, #tpu.memory_space<vmem>>, vector<1x64x32xf32>
    %15 = vector.shape_cast %14 : vector<1x64x32xf32> to vector<64x32xf32>
    %c0_16 = arith.constant 0 : index
    %c0_17 = arith.constant 0 : index
    %c0_18 = arith.constant 0 : index
    %16 = vector.load %arg12[%c0_16, %c0_17, %c0_18] : memref<3x8x32xf32, #tpu.memory_space<vmem>>, vector<1x8x32xf32>
    %17 = vector.shape_cast %16 : vector<1x8x32xf32> to vector<8x32xf32>
    %18 = vector.extract_strided_slice %17 {offsets = [0, 0], sizes = [1, 32], strides = [1, 1]} : vector<8x32xf32> to vector<1x32xf32>
    %19 = vector.extract_strided_slice %17 {offsets = [1, 0], sizes = [1, 32], strides = [1, 1]} : vector<8x32xf32> to vector<1x32xf32>
    %20 = vector.extract_strided_slice %17 {offsets = [2, 0], sizes = [1, 16], strides = [1, 1]} : vector<8x32xf32> to vector<1x16xf32>
    %21 = vector.extract_strided_slice %17 {offsets = [3, 0], sizes = [1, 32], strides = [1, 1]} : vector<8x32xf32> to vector<1x32xf32>
    %22 = vector.extract_strided_slice %17 {offsets = [4, 0], sizes = [1, 32], strides = [1, 1]} : vector<8x32xf32> to vector<1x32xf32>
    %cst_19 = arith.constant 0.000000e+00 : f32
    %23 = vector.broadcast %cst_19 : f32 to vector<1x32xf32>
    %24 = vector.extract_strided_slice %13 {offsets = [0, 0], sizes = [63, 32], strides = [1, 1]} : vector<64x32xf32> to vector<63x32xf32>
    %25 = tpu.concatenate %23, %24 in 0 : vector<1x32xf32>, vector<63x32xf32> -> vector<64x32xf32>
    %26 = vector.extract_strided_slice %13 {offsets = [1, 0], sizes = [63, 32], strides = [1, 1]} : vector<64x32xf32> to vector<63x32xf32>
    %27 = tpu.concatenate %26, %23 in 0 : vector<63x32xf32>, vector<1x32xf32> -> vector<64x32xf32>
    %28 = tpu.concatenate %25, %13, %27 in 1 : vector<64x32xf32>, vector<64x32xf32>, vector<64x32xf32> -> vector<64x96xf32>
    %c0_20 = arith.constant 0 : index
    %c0_21 = arith.constant 0 : index
    %c0_22 = arith.constant 0 : index
    %29 = vector.load %arg7[%c0_20, %c0_21, %c0_22] : memref<3x96x32xf32, #tpu.memory_space<vmem>>, vector<1x96x32xf32>
    %30 = vector.shape_cast %29 : vector<1x96x32xf32> to vector<96x32xf32>
    %cst_23 = arith.constant dense<0.000000e+00> : vector<64x32xf32>
    %31 = tpu.matmul %28, %30, %cst_23 {dimension_numbers = #tpu.dot_dimension_numbers<[1], [0], [0], [1], [0, 0, 1, 1], [], []>} : vector<64x96xf32>, vector<96x32xf32>, vector<64x32xf32> -> vector<64x32xf32>
    %32 = vector.broadcast %18 : vector<1x32xf32> to vector<64x32xf32>
    %33 = arith.addf %31, %32 : vector<64x32xf32>
    %cst_24 = arith.constant 0.000000e+00 : f32
    %34 = vector.broadcast %cst_24 : f32 to vector<64x32xf32>
    %35 = arith.maximumf %33, %34 : vector<64x32xf32>
    %cst_25 = arith.constant dense<0.000000e+00> : vector<32xf32>
    %36 = vector.multi_reduction <add>, %35, %cst_25 [0] : vector<64x32xf32> to vector<32xf32>
    %37 = vector.shape_cast %36 : vector<32xf32> to vector<1x32xf32>
    %cst_26 = arith.constant 6.400000e+01 : f32
    %38 = vector.broadcast %cst_26 : f32 to vector<1x32xf32>
    %39 = arith.divf %37, %38 : vector<1x32xf32>
    %40 = vector.broadcast %39 : vector<1x32xf32> to vector<64x32xf32>
    %41 = arith.subf %35, %40 : vector<64x32xf32>
    %42 = arith.mulf %41, %41 : vector<64x32xf32>
    %cst_27 = arith.constant dense<0.000000e+00> : vector<32xf32>
    %43 = vector.multi_reduction <add>, %42, %cst_27 [0] : vector<64x32xf32> to vector<32xf32>
    %44 = vector.shape_cast %43 : vector<32xf32> to vector<1x32xf32>
    %cst_28 = arith.constant 6.400000e+01 : f32
    %45 = vector.broadcast %cst_28 : f32 to vector<1x32xf32>
    %46 = arith.divf %44, %45 : vector<1x32xf32>
    %cst_29 = arith.constant 9.99999974E-6 : f32
    %47 = vector.broadcast %cst_29 : f32 to vector<1x32xf32>
    %48 = arith.addf %46, %47 : vector<1x32xf32>
    %49 = math.rsqrt %48 : vector<1x32xf32>
    %50 = vector.broadcast %49 : vector<1x32xf32> to vector<64x32xf32>
    %51 = arith.mulf %41, %50 : vector<64x32xf32>
    %c0_30 = arith.constant 0 : index
    %c0_31 = arith.constant 0 : index
    %c0_32 = arith.constant 0 : index
    %52 = vector.load %arg8[%c0_30, %c0_31, %c0_32] : memref<3x32x32xf32, #tpu.memory_space<vmem>>, vector<1x32x32xf32>
    %53 = vector.shape_cast %52 : vector<1x32x32xf32> to vector<32x32xf32>
    %cst_33 = arith.constant dense<0.000000e+00> : vector<64x32xf32>
    %54 = tpu.matmul %51, %53, %cst_33 {dimension_numbers = #tpu.dot_dimension_numbers<[1], [0], [0], [1], [0, 0, 1, 1], [], []>} : vector<64x32xf32>, vector<32x32xf32>, vector<64x32xf32> -> vector<64x32xf32>
    %55 = vector.broadcast %19 : vector<1x32xf32> to vector<64x32xf32>
    %56 = arith.addf %54, %55 : vector<64x32xf32>
    %57 = vector.extract_strided_slice %56 {offsets = [0, 0], sizes = [64, 16], strides = [1, 1]} : vector<64x32xf32> to vector<64x16xf32>
    %58 = vector.extract_strided_slice %56 {offsets = [0, 16], sizes = [64, 16], strides = [1, 1]} : vector<64x32xf32> to vector<64x16xf32>
    %c0_34 = arith.constant 0 : index
    %c0_35 = arith.constant 0 : index
    %c0_36 = arith.constant 0 : index
    %59 = vector.load %arg9[%c0_34, %c0_35, %c0_36] : memref<3x32x16xf32, #tpu.memory_space<vmem>>, vector<1x32x16xf32>
    %60 = vector.shape_cast %59 : vector<1x32x16xf32> to vector<32x16xf32>
    %cst_37 = arith.constant dense<0.000000e+00> : vector<64x16xf32>
    %61 = tpu.matmul %15, %60, %cst_37 {dimension_numbers = #tpu.dot_dimension_numbers<[1], [0], [0], [1], [0, 0, 1, 1], [], []>} : vector<64x32xf32>, vector<32x16xf32>, vector<64x16xf32> -> vector<64x16xf32>
    %62 = vector.broadcast %20 : vector<1x16xf32> to vector<64x16xf32>
    %63 = arith.addf %61, %62 : vector<64x16xf32>
    %cst_38 = arith.constant dense<0.000000e+00> : vector<64x64xf32>
    %64 = tpu.matmul %57, %58, %cst_38 {dimension_numbers = #tpu.dot_dimension_numbers<[1], [1], [0], [0], [0, 0, 1, 0], [], []>} : vector<64x16xf32>, vector<64x16xf32>, vector<64x64xf32> -> vector<64x64xf32>
    %65 = vector.broadcast %6 : vector<1x64xf32> to vector<64x64xf32>
    %66 = arith.addf %64, %65 : vector<64x64xf32>
    %cst_39 = arith.constant dense<0xFF800000> : vector<64xf32>
    %67 = vector.multi_reduction <maximumf>, %66, %cst_39 [1] : vector<64x64xf32> to vector<64xf32>
    %68 = vector.shape_cast %67 : vector<64xf32> to vector<64x1xf32>
    %69 = vector.broadcast %68 : vector<64x1xf32> to vector<64x64xf32>
    %70 = arith.subf %66, %69 : vector<64x64xf32>
    %71 = math.exp %70 : vector<64x64xf32>
    %cst_40 = arith.constant dense<0.000000e+00> : vector<64xf32>
    %72 = vector.multi_reduction <add>, %71, %cst_40 [1] : vector<64x64xf32> to vector<64xf32>
    %73 = vector.shape_cast %72 : vector<64xf32> to vector<64x1xf32>
    %74 = tpu.reciprocal %73 {approx = true} : vector<64x1xf32> -> vector<64x1xf32>
    %75 = vector.broadcast %74 : vector<64x1xf32> to vector<64x64xf32>
    %76 = arith.mulf %71, %75 : vector<64x64xf32>
    %77 = vector.broadcast %1 : vector<1x64xf32> to vector<64x64xf32>
    %78 = arith.mulf %76, %77 : vector<64x64xf32>
    %cst_41 = arith.constant dense<0.000000e+00> : vector<64x16xf32>
    %79 = tpu.matmul %78, %63, %cst_41 {dimension_numbers = #tpu.dot_dimension_numbers<[1], [0], [0], [1], [0, 0, 1, 1], [], []>} : vector<64x64xf32>, vector<64x16xf32>, vector<64x16xf32> -> vector<64x16xf32>
    %cst_42 = arith.constant 0.000000e+00 : f32
    %80 = vector.broadcast %cst_42 : f32 to vector<64x16xf32>
    %81 = arith.maximumf %79, %80 : vector<64x16xf32>
    %c0_43 = arith.constant 0 : index
    %c0_44 = arith.constant 0 : index
    %c0_45 = arith.constant 0 : index
    %82 = vector.load %arg10[%c0_43, %c0_44, %c0_45] : memref<3x16x32xf32, #tpu.memory_space<vmem>>, vector<1x16x32xf32>
    %83 = vector.shape_cast %82 : vector<1x16x32xf32> to vector<16x32xf32>
    %cst_46 = arith.constant dense<0.000000e+00> : vector<64x32xf32>
    %84 = tpu.matmul %81, %83, %cst_46 {dimension_numbers = #tpu.dot_dimension_numbers<[1], [0], [0], [1], [0, 0, 1, 1], [], []>} : vector<64x16xf32>, vector<16x32xf32>, vector<64x32xf32> -> vector<64x32xf32>
    %85 = vector.broadcast %21 : vector<1x32xf32> to vector<64x32xf32>
    %86 = arith.addf %84, %85 : vector<64x32xf32>
    %87 = vector.broadcast %3 : vector<64x1xf32> to vector<64x32xf32>
    %88 = arith.mulf %86, %87 : vector<64x32xf32>
    %cst_47 = arith.constant 1.000000e+00 : f32
    %89 = vector.broadcast %cst_47 : f32 to vector<64x32xf32>
    %90 = arith.mulf %89, %88 : vector<64x32xf32>
    %91 = arith.addf %90, %35 : vector<64x32xf32>
    %c0_48 = arith.constant 0 : index
    %c0_49 = arith.constant 0 : index
    %c0_50 = arith.constant 0 : index
    %92 = vector.load %arg11[%c0_48, %c0_49, %c0_50] : memref<3x32x32xf32, #tpu.memory_space<vmem>>, vector<1x32x32xf32>
    %93 = vector.shape_cast %92 : vector<1x32x32xf32> to vector<32x32xf32>
    %cst_51 = arith.constant dense<0.000000e+00> : vector<64x32xf32>
    %94 = tpu.matmul %91, %93, %cst_51 {dimension_numbers = #tpu.dot_dimension_numbers<[1], [0], [0], [1], [0, 0, 1, 1], [], []>} : vector<64x32xf32>, vector<32x32xf32>, vector<64x32xf32> -> vector<64x32xf32>
    %95 = vector.broadcast %22 : vector<1x32xf32> to vector<64x32xf32>
    %96 = arith.addf %94, %95 : vector<64x32xf32>
    %97 = arith.addf %13, %96 : vector<64x32xf32>
    %98 = vector.broadcast %3 : vector<64x1xf32> to vector<64x32xf32>
    %99 = arith.mulf %97, %98 : vector<64x32xf32>
    %c1 = arith.constant 1 : index
    %c0_52 = arith.constant 0 : index
    %c0_53 = arith.constant 0 : index
    %100 = vector.load %arg12[%c1, %c0_52, %c0_53] : memref<3x8x32xf32, #tpu.memory_space<vmem>>, vector<1x8x32xf32>
    %101 = vector.shape_cast %100 : vector<1x8x32xf32> to vector<8x32xf32>
    %102 = vector.extract_strided_slice %101 {offsets = [0, 0], sizes = [1, 32], strides = [1, 1]} : vector<8x32xf32> to vector<1x32xf32>
    %103 = vector.extract_strided_slice %101 {offsets = [1, 0], sizes = [1, 32], strides = [1, 1]} : vector<8x32xf32> to vector<1x32xf32>
    %104 = vector.extract_strided_slice %101 {offsets = [2, 0], sizes = [1, 16], strides = [1, 1]} : vector<8x32xf32> to vector<1x16xf32>
    %105 = vector.extract_strided_slice %101 {offsets = [3, 0], sizes = [1, 32], strides = [1, 1]} : vector<8x32xf32> to vector<1x32xf32>
    %106 = vector.extract_strided_slice %101 {offsets = [4, 0], sizes = [1, 32], strides = [1, 1]} : vector<8x32xf32> to vector<1x32xf32>
    %cst_54 = arith.constant 0.000000e+00 : f32
    %107 = vector.broadcast %cst_54 : f32 to vector<2x32xf32>
    %108 = vector.extract_strided_slice %99 {offsets = [0, 0], sizes = [62, 32], strides = [1, 1]} : vector<64x32xf32> to vector<62x32xf32>
    %109 = tpu.concatenate %107, %108 in 0 : vector<2x32xf32>, vector<62x32xf32> -> vector<64x32xf32>
    %110 = vector.extract_strided_slice %99 {offsets = [2, 0], sizes = [62, 32], strides = [1, 1]} : vector<64x32xf32> to vector<62x32xf32>
    %111 = tpu.concatenate %110, %107 in 0 : vector<62x32xf32>, vector<2x32xf32> -> vector<64x32xf32>
    %112 = tpu.concatenate %109, %99, %111 in 1 : vector<64x32xf32>, vector<64x32xf32>, vector<64x32xf32> -> vector<64x96xf32>
    %c1_55 = arith.constant 1 : index
    %c0_56 = arith.constant 0 : index
    %c0_57 = arith.constant 0 : index
    %113 = vector.load %arg7[%c1_55, %c0_56, %c0_57] : memref<3x96x32xf32, #tpu.memory_space<vmem>>, vector<1x96x32xf32>
    %114 = vector.shape_cast %113 : vector<1x96x32xf32> to vector<96x32xf32>
    %cst_58 = arith.constant dense<0.000000e+00> : vector<64x32xf32>
    %115 = tpu.matmul %112, %114, %cst_58 {dimension_numbers = #tpu.dot_dimension_numbers<[1], [0], [0], [1], [0, 0, 1, 1], [], []>} : vector<64x96xf32>, vector<96x32xf32>, vector<64x32xf32> -> vector<64x32xf32>
    %116 = vector.broadcast %102 : vector<1x32xf32> to vector<64x32xf32>
    %117 = arith.addf %115, %116 : vector<64x32xf32>
    %cst_59 = arith.constant 0.000000e+00 : f32
    %118 = vector.broadcast %cst_59 : f32 to vector<64x32xf32>
    %119 = arith.maximumf %117, %118 : vector<64x32xf32>
    %cst_60 = arith.constant dense<0.000000e+00> : vector<32xf32>
    %120 = vector.multi_reduction <add>, %119, %cst_60 [0] : vector<64x32xf32> to vector<32xf32>
    %121 = vector.shape_cast %120 : vector<32xf32> to vector<1x32xf32>
    %cst_61 = arith.constant 6.400000e+01 : f32
    %122 = vector.broadcast %cst_61 : f32 to vector<1x32xf32>
    %123 = arith.divf %121, %122 : vector<1x32xf32>
    %124 = vector.broadcast %123 : vector<1x32xf32> to vector<64x32xf32>
    %125 = arith.subf %119, %124 : vector<64x32xf32>
    %126 = arith.mulf %125, %125 : vector<64x32xf32>
    %cst_62 = arith.constant dense<0.000000e+00> : vector<32xf32>
    %127 = vector.multi_reduction <add>, %126, %cst_62 [0] : vector<64x32xf32> to vector<32xf32>
    %128 = vector.shape_cast %127 : vector<32xf32> to vector<1x32xf32>
    %cst_63 = arith.constant 6.400000e+01 : f32
    %129 = vector.broadcast %cst_63 : f32 to vector<1x32xf32>
    %130 = arith.divf %128, %129 : vector<1x32xf32>
    %cst_64 = arith.constant 9.99999974E-6 : f32
    %131 = vector.broadcast %cst_64 : f32 to vector<1x32xf32>
    %132 = arith.addf %130, %131 : vector<1x32xf32>
    %133 = math.rsqrt %132 : vector<1x32xf32>
    %134 = vector.broadcast %133 : vector<1x32xf32> to vector<64x32xf32>
    %135 = arith.mulf %125, %134 : vector<64x32xf32>
    %c1_65 = arith.constant 1 : index
    %c0_66 = arith.constant 0 : index
    %c0_67 = arith.constant 0 : index
    %136 = vector.load %arg8[%c1_65, %c0_66, %c0_67] : memref<3x32x32xf32, #tpu.memory_space<vmem>>, vector<1x32x32xf32>
    %137 = vector.shape_cast %136 : vector<1x32x32xf32> to vector<32x32xf32>
    %cst_68 = arith.constant dense<0.000000e+00> : vector<64x32xf32>
    %138 = tpu.matmul %135, %137, %cst_68 {dimension_numbers = #tpu.dot_dimension_numbers<[1], [0], [0], [1], [0, 0, 1, 1], [], []>} : vector<64x32xf32>, vector<32x32xf32>, vector<64x32xf32> -> vector<64x32xf32>
    %139 = vector.broadcast %103 : vector<1x32xf32> to vector<64x32xf32>
    %140 = arith.addf %138, %139 : vector<64x32xf32>
    %141 = vector.extract_strided_slice %140 {offsets = [0, 0], sizes = [64, 16], strides = [1, 1]} : vector<64x32xf32> to vector<64x16xf32>
    %142 = vector.extract_strided_slice %140 {offsets = [0, 16], sizes = [64, 16], strides = [1, 1]} : vector<64x32xf32> to vector<64x16xf32>
    %c1_69 = arith.constant 1 : index
    %c0_70 = arith.constant 0 : index
    %c0_71 = arith.constant 0 : index
    %143 = vector.load %arg9[%c1_69, %c0_70, %c0_71] : memref<3x32x16xf32, #tpu.memory_space<vmem>>, vector<1x32x16xf32>
    %144 = vector.shape_cast %143 : vector<1x32x16xf32> to vector<32x16xf32>
    %cst_72 = arith.constant dense<0.000000e+00> : vector<64x16xf32>
    %145 = tpu.matmul %15, %144, %cst_72 {dimension_numbers = #tpu.dot_dimension_numbers<[1], [0], [0], [1], [0, 0, 1, 1], [], []>} : vector<64x32xf32>, vector<32x16xf32>, vector<64x16xf32> -> vector<64x16xf32>
    %146 = vector.broadcast %104 : vector<1x16xf32> to vector<64x16xf32>
    %147 = arith.addf %145, %146 : vector<64x16xf32>
    %cst_73 = arith.constant dense<0.000000e+00> : vector<64x64xf32>
    %148 = tpu.matmul %141, %142, %cst_73 {dimension_numbers = #tpu.dot_dimension_numbers<[1], [1], [0], [0], [0, 0, 1, 0], [], []>} : vector<64x16xf32>, vector<64x16xf32>, vector<64x64xf32> -> vector<64x64xf32>
    %149 = vector.broadcast %6 : vector<1x64xf32> to vector<64x64xf32>
    %150 = arith.addf %148, %149 : vector<64x64xf32>
    %cst_74 = arith.constant dense<0xFF800000> : vector<64xf32>
    %151 = vector.multi_reduction <maximumf>, %150, %cst_74 [1] : vector<64x64xf32> to vector<64xf32>
    %152 = vector.shape_cast %151 : vector<64xf32> to vector<64x1xf32>
    %153 = vector.broadcast %152 : vector<64x1xf32> to vector<64x64xf32>
    %154 = arith.subf %150, %153 : vector<64x64xf32>
    %155 = math.exp %154 : vector<64x64xf32>
    %cst_75 = arith.constant dense<0.000000e+00> : vector<64xf32>
    %156 = vector.multi_reduction <add>, %155, %cst_75 [1] : vector<64x64xf32> to vector<64xf32>
    %157 = vector.shape_cast %156 : vector<64xf32> to vector<64x1xf32>
    %158 = tpu.reciprocal %157 {approx = true} : vector<64x1xf32> -> vector<64x1xf32>
    %159 = vector.broadcast %158 : vector<64x1xf32> to vector<64x64xf32>
    %160 = arith.mulf %155, %159 : vector<64x64xf32>
    %161 = vector.broadcast %1 : vector<1x64xf32> to vector<64x64xf32>
    %162 = arith.mulf %160, %161 : vector<64x64xf32>
    %cst_76 = arith.constant dense<0.000000e+00> : vector<64x16xf32>
    %163 = tpu.matmul %162, %147, %cst_76 {dimension_numbers = #tpu.dot_dimension_numbers<[1], [0], [0], [1], [0, 0, 1, 1], [], []>} : vector<64x64xf32>, vector<64x16xf32>, vector<64x16xf32> -> vector<64x16xf32>
    %cst_77 = arith.constant 0.000000e+00 : f32
    %164 = vector.broadcast %cst_77 : f32 to vector<64x16xf32>
    %165 = arith.maximumf %163, %164 : vector<64x16xf32>
    %c1_78 = arith.constant 1 : index
    %c0_79 = arith.constant 0 : index
    %c0_80 = arith.constant 0 : index
    %166 = vector.load %arg10[%c1_78, %c0_79, %c0_80] : memref<3x16x32xf32, #tpu.memory_space<vmem>>, vector<1x16x32xf32>
    %167 = vector.shape_cast %166 : vector<1x16x32xf32> to vector<16x32xf32>
    %cst_81 = arith.constant dense<0.000000e+00> : vector<64x32xf32>
    %168 = tpu.matmul %165, %167, %cst_81 {dimension_numbers = #tpu.dot_dimension_numbers<[1], [0], [0], [1], [0, 0, 1, 1], [], []>} : vector<64x16xf32>, vector<16x32xf32>, vector<64x32xf32> -> vector<64x32xf32>
    %169 = vector.broadcast %105 : vector<1x32xf32> to vector<64x32xf32>
    %170 = arith.addf %168, %169 : vector<64x32xf32>
    %171 = vector.broadcast %3 : vector<64x1xf32> to vector<64x32xf32>
    %172 = arith.mulf %170, %171 : vector<64x32xf32>
    %cst_82 = arith.constant 1.000000e+00 : f32
    %173 = vector.broadcast %cst_82 : f32 to vector<64x32xf32>
    %174 = arith.mulf %173, %172 : vector<64x32xf32>
    %175 = arith.addf %174, %119 : vector<64x32xf32>
    %c1_83 = arith.constant 1 : index
    %c0_84 = arith.constant 0 : index
    %c0_85 = arith.constant 0 : index
    %176 = vector.load %arg11[%c1_83, %c0_84, %c0_85] : memref<3x32x32xf32, #tpu.memory_space<vmem>>, vector<1x32x32xf32>
    %177 = vector.shape_cast %176 : vector<1x32x32xf32> to vector<32x32xf32>
    %cst_86 = arith.constant dense<0.000000e+00> : vector<64x32xf32>
    %178 = tpu.matmul %175, %177, %cst_86 {dimension_numbers = #tpu.dot_dimension_numbers<[1], [0], [0], [1], [0, 0, 1, 1], [], []>} : vector<64x32xf32>, vector<32x32xf32>, vector<64x32xf32> -> vector<64x32xf32>
    %179 = vector.broadcast %106 : vector<1x32xf32> to vector<64x32xf32>
    %180 = arith.addf %178, %179 : vector<64x32xf32>
    %181 = arith.addf %99, %180 : vector<64x32xf32>
    %182 = vector.broadcast %3 : vector<64x1xf32> to vector<64x32xf32>
    %183 = arith.mulf %181, %182 : vector<64x32xf32>
    %c2 = arith.constant 2 : index
    %c0_87 = arith.constant 0 : index
    %c0_88 = arith.constant 0 : index
    %184 = vector.load %arg12[%c2, %c0_87, %c0_88] : memref<3x8x32xf32, #tpu.memory_space<vmem>>, vector<1x8x32xf32>
    %185 = vector.shape_cast %184 : vector<1x8x32xf32> to vector<8x32xf32>
    %186 = vector.extract_strided_slice %185 {offsets = [0, 0], sizes = [1, 32], strides = [1, 1]} : vector<8x32xf32> to vector<1x32xf32>
    %187 = vector.extract_strided_slice %185 {offsets = [1, 0], sizes = [1, 32], strides = [1, 1]} : vector<8x32xf32> to vector<1x32xf32>
    %188 = vector.extract_strided_slice %185 {offsets = [2, 0], sizes = [1, 16], strides = [1, 1]} : vector<8x32xf32> to vector<1x16xf32>
    %189 = vector.extract_strided_slice %185 {offsets = [3, 0], sizes = [1, 32], strides = [1, 1]} : vector<8x32xf32> to vector<1x32xf32>
    %190 = vector.extract_strided_slice %185 {offsets = [4, 0], sizes = [1, 32], strides = [1, 1]} : vector<8x32xf32> to vector<1x32xf32>
    %cst_89 = arith.constant 0.000000e+00 : f32
    %191 = vector.broadcast %cst_89 : f32 to vector<4x32xf32>
    %192 = vector.extract_strided_slice %183 {offsets = [0, 0], sizes = [60, 32], strides = [1, 1]} : vector<64x32xf32> to vector<60x32xf32>
    %193 = tpu.concatenate %191, %192 in 0 : vector<4x32xf32>, vector<60x32xf32> -> vector<64x32xf32>
    %194 = vector.extract_strided_slice %183 {offsets = [4, 0], sizes = [60, 32], strides = [1, 1]} : vector<64x32xf32> to vector<60x32xf32>
    %195 = tpu.concatenate %194, %191 in 0 : vector<60x32xf32>, vector<4x32xf32> -> vector<64x32xf32>
    %196 = tpu.concatenate %193, %183, %195 in 1 : vector<64x32xf32>, vector<64x32xf32>, vector<64x32xf32> -> vector<64x96xf32>
    %c2_90 = arith.constant 2 : index
    %c0_91 = arith.constant 0 : index
    %c0_92 = arith.constant 0 : index
    %197 = vector.load %arg7[%c2_90, %c0_91, %c0_92] : memref<3x96x32xf32, #tpu.memory_space<vmem>>, vector<1x96x32xf32>
    %198 = vector.shape_cast %197 : vector<1x96x32xf32> to vector<96x32xf32>
    %cst_93 = arith.constant dense<0.000000e+00> : vector<64x32xf32>
    %199 = tpu.matmul %196, %198, %cst_93 {dimension_numbers = #tpu.dot_dimension_numbers<[1], [0], [0], [1], [0, 0, 1, 1], [], []>} : vector<64x96xf32>, vector<96x32xf32>, vector<64x32xf32> -> vector<64x32xf32>
    %200 = vector.broadcast %186 : vector<1x32xf32> to vector<64x32xf32>
    %201 = arith.addf %199, %200 : vector<64x32xf32>
    %cst_94 = arith.constant 0.000000e+00 : f32
    %202 = vector.broadcast %cst_94 : f32 to vector<64x32xf32>
    %203 = arith.maximumf %201, %202 : vector<64x32xf32>
    %cst_95 = arith.constant dense<0.000000e+00> : vector<32xf32>
    %204 = vector.multi_reduction <add>, %203, %cst_95 [0] : vector<64x32xf32> to vector<32xf32>
    %205 = vector.shape_cast %204 : vector<32xf32> to vector<1x32xf32>
    %cst_96 = arith.constant 6.400000e+01 : f32
    %206 = vector.broadcast %cst_96 : f32 to vector<1x32xf32>
    %207 = arith.divf %205, %206 : vector<1x32xf32>
    %208 = vector.broadcast %207 : vector<1x32xf32> to vector<64x32xf32>
    %209 = arith.subf %203, %208 : vector<64x32xf32>
    %210 = arith.mulf %209, %209 : vector<64x32xf32>
    %cst_97 = arith.constant dense<0.000000e+00> : vector<32xf32>
    %211 = vector.multi_reduction <add>, %210, %cst_97 [0] : vector<64x32xf32> to vector<32xf32>
    %212 = vector.shape_cast %211 : vector<32xf32> to vector<1x32xf32>
    %cst_98 = arith.constant 6.400000e+01 : f32
    %213 = vector.broadcast %cst_98 : f32 to vector<1x32xf32>
    %214 = arith.divf %212, %213 : vector<1x32xf32>
    %cst_99 = arith.constant 9.99999974E-6 : f32
    %215 = vector.broadcast %cst_99 : f32 to vector<1x32xf32>
    %216 = arith.addf %214, %215 : vector<1x32xf32>
    %217 = math.rsqrt %216 : vector<1x32xf32>
    %218 = vector.broadcast %217 : vector<1x32xf32> to vector<64x32xf32>
    %219 = arith.mulf %209, %218 : vector<64x32xf32>
    %c2_100 = arith.constant 2 : index
    %c0_101 = arith.constant 0 : index
    %c0_102 = arith.constant 0 : index
    %220 = vector.load %arg8[%c2_100, %c0_101, %c0_102] : memref<3x32x32xf32, #tpu.memory_space<vmem>>, vector<1x32x32xf32>
    %221 = vector.shape_cast %220 : vector<1x32x32xf32> to vector<32x32xf32>
    %cst_103 = arith.constant dense<0.000000e+00> : vector<64x32xf32>
    %222 = tpu.matmul %219, %221, %cst_103 {dimension_numbers = #tpu.dot_dimension_numbers<[1], [0], [0], [1], [0, 0, 1, 1], [], []>} : vector<64x32xf32>, vector<32x32xf32>, vector<64x32xf32> -> vector<64x32xf32>
    %223 = vector.broadcast %187 : vector<1x32xf32> to vector<64x32xf32>
    %224 = arith.addf %222, %223 : vector<64x32xf32>
    %225 = vector.extract_strided_slice %224 {offsets = [0, 0], sizes = [64, 16], strides = [1, 1]} : vector<64x32xf32> to vector<64x16xf32>
    %226 = vector.extract_strided_slice %224 {offsets = [0, 16], sizes = [64, 16], strides = [1, 1]} : vector<64x32xf32> to vector<64x16xf32>
    %c2_104 = arith.constant 2 : index
    %c0_105 = arith.constant 0 : index
    %c0_106 = arith.constant 0 : index
    %227 = vector.load %arg9[%c2_104, %c0_105, %c0_106] : memref<3x32x16xf32, #tpu.memory_space<vmem>>, vector<1x32x16xf32>
    %228 = vector.shape_cast %227 : vector<1x32x16xf32> to vector<32x16xf32>
    %cst_107 = arith.constant dense<0.000000e+00> : vector<64x16xf32>
    %229 = tpu.matmul %15, %228, %cst_107 {dimension_numbers = #tpu.dot_dimension_numbers<[1], [0], [0], [1], [0, 0, 1, 1], [], []>} : vector<64x32xf32>, vector<32x16xf32>, vector<64x16xf32> -> vector<64x16xf32>
    %230 = vector.broadcast %188 : vector<1x16xf32> to vector<64x16xf32>
    %231 = arith.addf %229, %230 : vector<64x16xf32>
    %cst_108 = arith.constant dense<0.000000e+00> : vector<64x64xf32>
    %232 = tpu.matmul %225, %226, %cst_108 {dimension_numbers = #tpu.dot_dimension_numbers<[1], [1], [0], [0], [0, 0, 1, 0], [], []>} : vector<64x16xf32>, vector<64x16xf32>, vector<64x64xf32> -> vector<64x64xf32>
    %233 = vector.broadcast %6 : vector<1x64xf32> to vector<64x64xf32>
    %234 = arith.addf %232, %233 : vector<64x64xf32>
    %cst_109 = arith.constant dense<0xFF800000> : vector<64xf32>
    %235 = vector.multi_reduction <maximumf>, %234, %cst_109 [1] : vector<64x64xf32> to vector<64xf32>
    %236 = vector.shape_cast %235 : vector<64xf32> to vector<64x1xf32>
    %237 = vector.broadcast %236 : vector<64x1xf32> to vector<64x64xf32>
    %238 = arith.subf %234, %237 : vector<64x64xf32>
    %239 = math.exp %238 : vector<64x64xf32>
    %cst_110 = arith.constant dense<0.000000e+00> : vector<64xf32>
    %240 = vector.multi_reduction <add>, %239, %cst_110 [1] : vector<64x64xf32> to vector<64xf32>
    %241 = vector.shape_cast %240 : vector<64xf32> to vector<64x1xf32>
    %242 = tpu.reciprocal %241 {approx = true} : vector<64x1xf32> -> vector<64x1xf32>
    %243 = vector.broadcast %242 : vector<64x1xf32> to vector<64x64xf32>
    %244 = arith.mulf %239, %243 : vector<64x64xf32>
    %245 = vector.broadcast %1 : vector<1x64xf32> to vector<64x64xf32>
    %246 = arith.mulf %244, %245 : vector<64x64xf32>
    %cst_111 = arith.constant dense<0.000000e+00> : vector<64x16xf32>
    %247 = tpu.matmul %246, %231, %cst_111 {dimension_numbers = #tpu.dot_dimension_numbers<[1], [0], [0], [1], [0, 0, 1, 1], [], []>} : vector<64x64xf32>, vector<64x16xf32>, vector<64x16xf32> -> vector<64x16xf32>
    %cst_112 = arith.constant 0.000000e+00 : f32
    %248 = vector.broadcast %cst_112 : f32 to vector<64x16xf32>
    %249 = arith.maximumf %247, %248 : vector<64x16xf32>
    %c2_113 = arith.constant 2 : index
    %c0_114 = arith.constant 0 : index
    %c0_115 = arith.constant 0 : index
    %250 = vector.load %arg10[%c2_113, %c0_114, %c0_115] : memref<3x16x32xf32, #tpu.memory_space<vmem>>, vector<1x16x32xf32>
    %251 = vector.shape_cast %250 : vector<1x16x32xf32> to vector<16x32xf32>
    %cst_116 = arith.constant dense<0.000000e+00> : vector<64x32xf32>
    %252 = tpu.matmul %249, %251, %cst_116 {dimension_numbers = #tpu.dot_dimension_numbers<[1], [0], [0], [1], [0, 0, 1, 1], [], []>} : vector<64x16xf32>, vector<16x32xf32>, vector<64x32xf32> -> vector<64x32xf32>
    %253 = vector.broadcast %189 : vector<1x32xf32> to vector<64x32xf32>
    %254 = arith.addf %252, %253 : vector<64x32xf32>
    %255 = vector.broadcast %3 : vector<64x1xf32> to vector<64x32xf32>
    %256 = arith.mulf %254, %255 : vector<64x32xf32>
    %cst_117 = arith.constant 1.000000e+00 : f32
    %257 = vector.broadcast %cst_117 : f32 to vector<64x32xf32>
    %258 = arith.mulf %257, %256 : vector<64x32xf32>
    %259 = arith.addf %258, %203 : vector<64x32xf32>
    %c2_118 = arith.constant 2 : index
    %c0_119 = arith.constant 0 : index
    %c0_120 = arith.constant 0 : index
    %260 = vector.load %arg11[%c2_118, %c0_119, %c0_120] : memref<3x32x32xf32, #tpu.memory_space<vmem>>, vector<1x32x32xf32>
    %261 = vector.shape_cast %260 : vector<1x32x32xf32> to vector<32x32xf32>
    %cst_121 = arith.constant dense<0.000000e+00> : vector<64x32xf32>
    %262 = tpu.matmul %259, %261, %cst_121 {dimension_numbers = #tpu.dot_dimension_numbers<[1], [0], [0], [1], [0, 0, 1, 1], [], []>} : vector<64x32xf32>, vector<32x32xf32>, vector<64x32xf32> -> vector<64x32xf32>
    %263 = vector.broadcast %190 : vector<1x32xf32> to vector<64x32xf32>
    %264 = arith.addf %262, %263 : vector<64x32xf32>
    %265 = arith.addf %183, %264 : vector<64x32xf32>
    %266 = vector.broadcast %3 : vector<64x1xf32> to vector<64x32xf32>
    %267 = arith.mulf %265, %266 : vector<64x32xf32>
    %c0_122 = arith.constant 0 : index
    %c0_123 = arith.constant 0 : index
    %c0_124 = arith.constant 0 : index
    %268 = vector.load %arg16[%c0_122, %c0_123, %c0_124] : memref<1x64x32xf32, #tpu.memory_space<vmem>>, vector<1x64x32xf32>
    %269 = vector.shape_cast %268 : vector<1x64x32xf32> to vector<64x32xf32>
    %270 = vector.shape_cast %267 : vector<64x32xf32> to vector<1x64x32xf32>
    tpu.vector_store %arg16[%c0_122, %c0_123, %c0_124], %270 {strides = array<i32>} : memref<1x64x32xf32, #tpu.memory_space<vmem>>, vector<1x64x32xf32>,
    %c0_125 = arith.constant 0 : index
    %c0_126 = arith.constant 0 : index
    %271 = vector.load %arg13[%c0_125, %c0_126] : memref<32x8xf32, #tpu.memory_space<vmem>>, vector<32x8xf32>
    %cst_127 = arith.constant dense<0.000000e+00> : vector<64x8xf32>
    %272 = tpu.matmul %267, %271, %cst_127 {dimension_numbers = #tpu.dot_dimension_numbers<[1], [0], [0], [1], [0, 0, 1, 1], [], []>} : vector<64x32xf32>, vector<32x8xf32>, vector<64x8xf32> -> vector<64x8xf32>
    %c0_128 = arith.constant 0 : index
    %c0_129 = arith.constant 0 : index
    %273 = vector.load %arg14[%c0_128, %c0_129] : memref<1x8xf32, #tpu.memory_space<vmem>>, vector<1x8xf32>
    %274 = vector.broadcast %273 : vector<1x8xf32> to vector<64x8xf32>
    %275 = arith.addf %272, %274 : vector<64x8xf32>
    %276 = vector.broadcast %3 : vector<64x1xf32> to vector<64x8xf32>
    %277 = arith.mulf %275, %276 : vector<64x8xf32>
    %c0_130 = arith.constant 0 : index
    %c0_131 = arith.constant 0 : index
    %c0_132 = arith.constant 0 : index
    %278 = vector.load %arg15[%c0_130, %c0_131, %c0_132] : memref<1x64x8xf32, #tpu.memory_space<vmem>>, vector<1x64x8xf32>
    %279 = vector.shape_cast %278 : vector<1x64x8xf32> to vector<64x8xf32>
    %280 = vector.shape_cast %277 : vector<64x8xf32> to vector<1x64x8xf32>
    tpu.vector_store %arg15[%c0_130, %c0_131, %c0_132], %280 {strides = array<i32>} : memref<1x64x8xf32, #tpu.memory_space<vmem>>, vector<1x64x8xf32>,
    return
  }
  func.func @transform_0(%arg0: i32) -> (i32, i32, i32) {
    %c0_i32 = arith.constant 0 : i32
    %c0_i32_0 = arith.constant 0 : i32
    %c0_i32_1 = arith.constant 0 : i32
    return %arg0, %c0_i32, %c0_i32_0 : i32, i32, i32
  }
  func.func @transform_1(%arg0: i32) -> (i32, i32, i32) {
    %c0_i32 = arith.constant 0 : i32
    %c0_i32_0 = arith.constant 0 : i32
    %c0_i32_1 = arith.constant 0 : i32
    return %arg0, %c0_i32, %c0_i32_0 : i32, i32, i32
  }
  func.func @transform_2(%arg0: i32) -> (i32, i32, i32) {
    %c0_i32 = arith.constant 0 : i32
    %c0_i32_0 = arith.constant 0 : i32
    %c0_i32_1 = arith.constant 0 : i32
    return %arg0, %c0_i32, %c0_i32_0 : i32, i32, i32
  }
  func.func @transform_3(%arg0: i32) -> (i32, i32, i32) {
    %c0_i32 = arith.constant 0 : i32
    %c0_i32_0 = arith.constant 0 : i32
    %c0_i32_1 = arith.constant 0 : i32
    return %arg0, %c0_i32, %c0_i32_0 : i32, i32, i32
  }
  func.func @transform_4(%arg0: i32) -> (i32, i32) {
    %c0_i32 = arith.constant 0 : i32
    %c0_i32_0 = arith.constant 0 : i32
    %c0_i32_1 = arith.constant 0 : i32
    return %c0_i32, %c0_i32_0 : i32, i32
  }
  func.func @transform_5(%arg0: i32) -> (i32, i32) {
    %c0_i32 = arith.constant 0 : i32
    %c0_i32_0 = arith.constant 0 : i32
    %c0_i32_1 = arith.constant 0 : i32
    return %c0_i32, %c0_i32_0 : i32, i32
  }
  func.func @transform_6(%arg0: i32) -> (i32, i32, i32) {
    %c0_i32 = arith.constant 0 : i32
    %c0_i32_0 = arith.constant 0 : i32
    %c0_i32_1 = arith.constant 0 : i32
    %c0_i32_2 = arith.constant 0 : i32
    return %c0_i32, %c0_i32_0, %c0_i32_1 : i32, i32, i32
  }
  func.func @transform_7(%arg0: i32) -> (i32, i32, i32) {
    %c0_i32 = arith.constant 0 : i32
    %c0_i32_0 = arith.constant 0 : i32
    %c0_i32_1 = arith.constant 0 : i32
    %c0_i32_2 = arith.constant 0 : i32
    return %c0_i32, %c0_i32_0, %c0_i32_1 : i32, i32, i32
  }
  func.func @transform_8(%arg0: i32) -> (i32, i32, i32) {
    %c0_i32 = arith.constant 0 : i32
    %c0_i32_0 = arith.constant 0 : i32
    %c0_i32_1 = arith.constant 0 : i32
    %c0_i32_2 = arith.constant 0 : i32
    return %c0_i32, %c0_i32_0, %c0_i32_1 : i32, i32, i32
  }
  func.func @transform_9(%arg0: i32) -> (i32, i32, i32) {
    %c0_i32 = arith.constant 0 : i32
    %c0_i32_0 = arith.constant 0 : i32
    %c0_i32_1 = arith.constant 0 : i32
    %c0_i32_2 = arith.constant 0 : i32
    return %c0_i32, %c0_i32_0, %c0_i32_1 : i32, i32, i32
  }
  func.func @transform_10(%arg0: i32) -> (i32, i32, i32) {
    %c0_i32 = arith.constant 0 : i32
    %c0_i32_0 = arith.constant 0 : i32
    %c0_i32_1 = arith.constant 0 : i32
    %c0_i32_2 = arith.constant 0 : i32
    return %c0_i32, %c0_i32_0, %c0_i32_1 : i32, i32, i32
  }
  func.func @transform_11(%arg0: i32) -> (i32, i32, i32) {
    %c0_i32 = arith.constant 0 : i32
    %c0_i32_0 = arith.constant 0 : i32
    %c0_i32_1 = arith.constant 0 : i32
    %c0_i32_2 = arith.constant 0 : i32
    return %c0_i32, %c0_i32_0, %c0_i32_1 : i32, i32, i32
  }
  func.func @transform_12(%arg0: i32) -> (i32, i32) {
    %c0_i32 = arith.constant 0 : i32
    %c0_i32_0 = arith.constant 0 : i32
    %c0_i32_1 = arith.constant 0 : i32
    return %c0_i32, %c0_i32_0 : i32, i32
  }
  func.func @transform_13(%arg0: i32) -> (i32, i32) {
    %c0_i32 = arith.constant 0 : i32
    %c0_i32_0 = arith.constant 0 : i32
    %c0_i32_1 = arith.constant 0 : i32
    return %c0_i32, %c0_i32_0 : i32, i32
  }
  func.func @transform_14(%arg0: i32) -> (i32, i32, i32) {
    %c0_i32 = arith.constant 0 : i32
    %c0_i32_0 = arith.constant 0 : i32
    %c0_i32_1 = arith.constant 0 : i32
    return %arg0, %c0_i32, %c0_i32_0 : i32, i32, i32
  }
  func.func @transform_15(%arg0: i32) -> (i32, i32, i32) {
    %c0_i32 = arith.constant 0 : i32
    %c0_i32_0 = arith.constant 0 : i32
    %c0_i32_1 = arith.constant 0 : i32
    return %arg0, %c0_i32, %c0_i32_0 : i32, i32, i32
  }
}

</mosaic_0001>

<bundles_post_ra>
// kernel: tpu_custom_call.1
= control target key start
LH: loop header
LB: loop body
LE: loop exit
PB: predicated region body
PF: predicated region fallthrough
CT: control target
= control target key end

     0   :  { %s6676_s18 = smov 0   ;;  %s8078_s0 = inlined_call_operand.vmem [shape: f32[2,64,24], index: 0, kind: input, shape index: {}]   ;;  %s8079_s1 = inlined_call_operand.vmem [shape: f32[2,64,32], index: 1, kind: input, shape index: {}]   ;;  %s8080_s2 = inlined_call_operand.vmem [shape: f32[2,1,64], index: 2, kind: input, shape index: {}]   ;;  %s8081_s3 = inlined_call_operand.vmem [shape: f32[2,64,1], index: 3, kind: input, shape index: {}]   ;;  %s8082_s4 = inlined_call_operand.vmem [shape: f32[24,32], index: 4, kind: input, shape index: {}]   ;;  %s8083_s5 = inlined_call_operand.vmem [shape: f32[1,32], index: 5, kind: input, shape index: {}]   ;;  %s8084_s6 = inlined_call_operand.vmem [shape: f32[3,96,32], index: 6, kind: input, shape index: {}]   ;;  %s8085_s7 = inlined_call_operand.vmem [shape: f32[3,32,32], index: 7, kind: input, shape index: {}]   ;;  %s8086_s8 = inlined_call_operand.vmem [shape: f32[3,32,16], index: 8, kind: input, shape index: {}]   ;;  %s8087_s9 = inlined_call_operand.vmem [shape: f32[3,16,32], index: 9, kind: input, shape index: {}]   ;;  %s8088_s10 = inlined_call_operand.vmem [shape: f32[3,32,32], index: 10, kind: input, shape index: {}]   ;;  %s8089_s11 = inlined_call_operand.vmem [shape: f32[3,8,32], index: 11, kind: input, shape index: {}]   ;;  %s8090_s12 = inlined_call_operand.vmem [shape: f32[32,8], index: 12, kind: input, shape index: {}]   ;;  %s8091_s13 = inlined_call_operand.vmem [shape: f32[1,8], index: 13, kind: input, shape index: {}]   ;;  %s8092_s14 = inlined_call_operand.vmem [shape: f32[2,64,8], index: 14, kind: output, shape index: {0}]   ;;  %s8093_s15 = inlined_call_operand.vmem [shape: f32[2,64,32], index: 15, kind: output, shape index: {1}]  }
   0x1 LB: > { %s4957_s19 = sadd.s32 4294967295, %s6590_s18   ;;  %p4961_p0 = scmp.ge.s32.totalorder %s6590_s18, 1  ;;  %s6590_s18 = sphi %s6676_s18, %s26_s18  }
   0x2   : > { %p468_p1 = scmp.lt.s32.totalorder %s6590_s18, 3 }
   0x4   : > { %p469_p2 = pnand %p4961_p0, %p468_p1 }
   0x5   : > { %v582_v0 = vld [vmem:[%s8082_s4] sm:$0xff] (!%p469_p2)  ;;  %v583_v1 = vld [vmem:[%s8082_s4 + $0x8] sm:$0xff] (!%p469_p2)  ;;  %p534_p3 = scmp.lt.s32.totalorder (!%p469_p2), %s4957_s19, 1  ;;  %v584_v3 = vld [vmem:[%s8082_s4 + $0x10] sm:$0xff] (!%p469_p2)  ;;  %vm592_vm0 = vcmask (!%p469_p2), 195584   ;;  %s6592_s17 = smov (!%p469_p2), 32  }
   0x6   : > { %472 = sbr.rel (%p469_p2) target bundleno = 6430 (0x191e), region = 76  ;;  %v6102_v2 = vpack.c.bf16 (!%p469_p2), %v583_v1, %v582_v0  ;;  %v849_v12 = vld [vmem:[%s8084_s6] sm:$0xff] (!%p469_p2)  ;;  %v850_v13 = vld [vmem:[%s8084_s6 + $0x8] sm:$0xff] (!%p469_p2)  ;;  %v851_v14 = vld [vmem:[%s8084_s6 + $0x10] sm:$0xff] (!%p469_p2)  ;;  %vm764_vm1 = vcmask (!%p469_p2), 1046528   ;;  %s8096_s20 = smov (!%p469_p2), 64  }
   0x7   : > { %v6106_v15 = vpack.c.bf16 (!%p469_p2), %v850_v13, %v849_v12  ;;  %v852_v16 = vld [vmem:[%s8084_s6 + $0x18] sm:$0xff] (!%p469_p2)  ;;  %v853_v18 = vld [vmem:[%s8084_s6 + $0x20] sm:$0xff] (!%p469_p2)  ;;  %v854_v19 = vld [vmem:[%s8084_s6 + $0x28] sm:$0xff] (!%p469_p2)  ;;  %vm739_vm2 = vcmask (!%p469_p2), 1040384   ;;  %vm840_vm3 = vcmask (!%p469_p2), 523264   ;;  %vm831_vm4 = vcmask (!%p469_p2), 261120  }
   0x8   : > { %6103 = vmatprep.subr.bf16.mxu1 (!%p469_p2), %v6102_v2  ;;  %v6110_v17 = vpack.c.bf16 (!%p469_p2), %v852_v16, %v851_v14  ;;  %v6114_v20 = vpack.c.bf16 (!%p469_p2), %v854_v19, %v853_v18  ;;  %v855_v21 = vld [vmem:[%s8084_s6 + $0x30] sm:$0xff] (!%p469_p2)  ;;  %v856_v22 = vld [vmem:[%s8084_s6 + $0x38] sm:$0xff] (!%p469_p2)  ;;  %v857_v24 = vld [vmem:[%s8084_s6 + $0x40] sm:$0xff] (!%p469_p2)  ;;  %vm865_vm5 = vcmask (!%p469_p2), 785408   ;;  %vm1378_vm6 = vcmask (!%p469_p2), 130048   ;;  %s8094_s21 = smov (!%p469_p2), 112  }
   0x9   : > { %6105 = vmatpush3.bf16.msra.mxu1 (!%p469_p2), %v6102_v2  ;;  %v6118_v23 = vpack.c.bf16 (!%p469_p2), %v856_v22, %v855_v21  ;;  %v858_v25 = vld [vmem:[%s8084_s6 + $0x48] sm:$0xff] (!%p469_p2)  ;;  %v859_v27 = vld [vmem:[%s8084_s6 + $0x50] sm:$0xff] (!%p469_p2)  ;;  %v860_v28 = vld [vmem:[%s8084_s6 + $0x58] sm:$0xff] (!%p469_p2)  ;;  %vm2134_vm8 = vcmask (!%p469_p2), 1045504   ;;  %vm2109_vm9 = vcmask (!%p469_p2), 1041408   ;;  %vm3403_vm10 = vcmask (!%p469_p2), 1043456  }
   0xa   : > { %5564 = vmatprep.subr.mxu1 (!%p469_p2), %v584_v3  ;;  %v6122_v26 = vpack.c.bf16 (!%p469_p2), %v858_v25, %v857_v24  ;;  %v6126_v29 = vpack.c.bf16 (!%p469_p2), %v860_v28, %v859_v27  ;;  %v4972_v30 = vld [vmem:[%s8083_s5] ss:$0 sm:$0xff] (!%p469_p2)  ;;  %vm6937_vm7 = vmpackc.low (!%p469_p2), %vm1378_vm6, %vm1378_vm6  ;;  %s8101_s25 = smov (!%p469_p2), 64   ;;  %vm4827_vm11 = vcmask (!%p469_p2), 64512  }
   0xd   : > { %s8103_s19 = smov (!%p534_p3, %s4957_s19), 1  ;;  %5565 = vmatpush3.msra.mxu1 %v584_v3 }
   0xe   : > { %s6696_s26 = sshll.u32 %s8103_s19, 6  ;;  %6107 = vmatprep.subr.bf16.mxu1 %v6106_v15  ;;  %s546_s27 = scalar_lea.vmem %s8080_s2, %s8103_s19 }
   0xf   : > { %s538_s29 = scalar_lea.vmem %s8078_s0, %s6696_s26  ;;  %s6977_s16 = scalar_lea.vmem %s8079_s1, %s6696_s26 }
  0x10   : > { %v574_v4 = vld [vmem:[%s538_s29] sm:$0xff]  ;;  %v575_v5 = vld [vmem:[%s538_s29 + $0x8] sm:$0xff]  ;;  %v576_v6 = vld [vmem:[%s538_s29 + $0x10] sm:$0xff]  ;;  %s551_s24 = scalar_lea.vmem %s8081_s3, %s6696_s26  ;;  %s556_s30 = scalar_lea.vmem %s8092_s14, %s6696_s26 }
  0x11   : > { %5566 = vmatprep.mubr.msk.f32.mxu1 %vm592_vm0, %v574_v4  ;;  %v577_v7 = vld [vmem:[%s538_s29 + $0x18] sm:$0xff]  ;;  %v578_v8 = vld [vmem:[%s538_s29 + $0x20] sm:$0xff]  ;;  %v579_v9 = vld [vmem:[%s538_s29 + $0x28] sm:$0xff] }
  0x12   : > { %5567 = vmatmul.mubr.msk.f32.vlgmr.msra.gmra.mrb[0].mxu1 %vm592_vm0, %v575_v5  ;;  %v580_v10 = vld [vmem:[%s538_s29 + $0x30] sm:$0xff]  ;;  %v581_v11 = vld [vmem:[%s538_s29 + $0x38] sm:$0xff] }
  0x13   : > { %5569 = vmatprep.mubr.msk.f32.mxu1 %vm592_vm0, %v576_v6  ;;  %6109 = vmatpush3.bf16.msra.mxu1 %v6106_v15 }
  0x14   : > { %6111 = vmatprep.subr.bf16.mxu1 %v6110_v17 }
  0x16   : > { %5570 = vmatmul.mubr.msk.f32.gmra.mrb[2].mxu1 %vm592_vm0, %v577_v7 }
  0x17   : > { %5572 = vmatprep.mubr.msk.f32.mxu1 %vm592_vm0, %v578_v8  ;;  %6113 = vmatpush3.bf16.msra.mxu1 %v6110_v17 }
  0x18   : > { %6115 = vmatprep.subr.bf16.mxu1 %v6114_v20 }
  0x1a   : > { %5573 = vmatmul.mubr.msk.f32.gmra.mrb[4].mxu1 %vm592_vm0, %v579_v9 }
  0x1b   : > { %5575 = vmatprep.mubr.msk.f32.mxu1 %vm592_vm0, %v580_v10  ;;  %6117 = vmatpush3.bf16.msra.mxu1 %v6114_v20 }
  0x1c   : > { %6119 = vmatprep.subr.bf16.mxu1 %v6118_v23 }
  0x1e   : > { %5576 = vmatmul.mubr.msk.f32.gmra.mrb[6].mxu1 %vm592_vm0, %v581_v11 }
  0x1f   : > { %6121 = vmatpush3.bf16.msra.mxu1 %v6118_v23 }
  0x20   : > { %6123 = vmatprep.subr.bf16.mxu1 %v6122_v26 }
  0x23   : > { %6125 = vmatpush3.bf16.msra.mxu1 %v6122_v26 }
  0x24   : > { %6127 = vmatprep.subr.bf16.mxu1 %v6126_v29 }
  0x27   : > { %6129 = vmatpush3.bf16.msra.mxu1 %v6126_v29 }
  0xe5   : > { %v5568_v31 = vpop.f32.mrb[0].mxu1 }
  0xe6   : > { %v6749_v32 = vadd.f32 %v5568_v31, %v4972_v30  ;;  %v683_v33 = vpop.f32.mrb[1].mxu1 }
  0xe7   : > { %v6751_v34 = vadd.f32 %v4972_v30, %v683_v33 }
  0xe8   : > { %784 = vrot.lane.b32.xlu0 %v6749_v32, %s6592_s17  ;;  %v766_v35 = vrot.slane %v6749_v32, 1  ;;  %v741_v6 = vrot.slane %v6749_v32, 7 }
  0xe9   : > { %v5571_v36 = vpop.f32.mrb[2].mxu1  ;;  %v765_v37 = vrot.slane %v6751_v34, 1  ;;  %v740_v0 = vrot.slane %v6751_v34, 7 }
  0xea   : > { %v6757_v38 = vadd.f32 %v5571_v36, %v4972_v30  ;;  %v693_v39 = vpop.f32.mrb[3].mxu1 }
  0xeb   : > { %v6759_v40 = vadd.f32 %v4972_v30, %v693_v39  ;;  %v767_v41 = vsel %vm764_vm1, %v765_v37, %v766_v35  ;;  %v763_v2 = vsel %vm739_vm2, 0.0, %v740_v0  ;;  %v742_v10 = vsel %vm739_vm2, %v740_v0, %v741_v6  ;;  %v6865_v0 = vld [vmem:[%s8089_s11] sm:$0xff] }
  0xec   : > { %782 = vrot.lane.b32.xlu0 %v6751_v34, %s6592_s17  ;;  %807 = vrot.lane.b32.xlu1 %v767_v41, %s8096_s20  ;;  %v770_v43 = vrot.slane %v6757_v38, 1  ;;  %v745_v18 = vrot.slane %v6757_v38, 7 }
  0xed   : > { %v5574_v42 = vpop.f32.mrb[4].mxu1  ;;  %v768_v45 = vrot.slane %v6759_v40, 1  ;;  %v743_v7 = vrot.slane %v6759_v40, 7 }
  0xee   : > { %v703_v44 = vpop.f32.mrb[5].mxu1  ;;  %v6771_v46 = vadd.f32 %v5574_v42, %v4972_v30 }
  0xef   : > { %v771_v48 = vsel %vm764_vm1, %v768_v45, %v770_v43  ;;  %v6774_v50 = vadd.f32 %v4972_v30, %v703_v44  ;;  %v769_v51 = vsel %vm764_vm1, %v766_v35, %v768_v45  ;;  %v744_v11 = vsel %vm739_vm2, %v741_v6, %v743_v7 }
  0xf0   : > { %786 = vrot.lane.b32.xlu0 %v6759_v40, %s6592_s17  ;;  %788 = vrot.lane.b32.xlu1 %v6757_v38, %s6592_s17  ;;  %v774_v52 = vrot.slane %v6771_v46, 1  ;;  %v746_v22 = vsel %vm739_vm2, %v743_v7, %v745_v18 }
  0xf1   : > { %v5577_v47 = vpop.f32.mrb[6].mxu1  ;;  %v772_v53 = vrot.slane %v6774_v50, 1  ;;  %v747_v19 = vrot.slane %v6774_v50, 7 }
  0xf2   : > { %v713_v49 = vpop.f32.mrb[7].mxu1  ;;  %v6785_v54 = vadd.f32 %v5577_v47, %v4972_v30 }
  0xf3   : > { %v775_v55 = vsel %vm764_vm1, %v772_v53, %v774_v52  ;;  %v6788_v56 = vadd.f32 %v4972_v30, %v713_v49  ;;  %v773_v57 = vsel %vm764_vm1, %v770_v43, %v772_v53  ;;  %v748_v23 = vsel %vm739_vm2, %v745_v18, %v747_v19  ;;  %v1074_v53 = vld [vmem:[%s8085_s7] sm:$0xff] }
  0xf4   : > { %811 = vrot.lane.b32.xlu0 %v771_v48, %s8096_s20  ;;  %809 = vrot.lane.b32.xlu1 %v769_v51, %s8096_s20  ;;  %v778_v58 = vrot.slane %v6785_v54, 1  ;;  %v749_v30 = vrot.slane %v6771_v46, 7  ;;  %v753_v39 = vrot.slane %v6785_v54, 7 }
  0xf5   : > { %v776_v59 = vrot.slane %v6788_v56, 1  ;;  %v751_v31 = vrot.slane %v6788_v56, 7 }
  0xf6   : > { %v781_v62 = vsel %vm764_vm1, %v778_v58, 0.0  ;;  %v750_v36 = vsel %vm739_vm2, %v747_v19, %v749_v30 }
  0xf7   : > { %v779_v60 = vsel %vm764_vm1, %v776_v59, %v778_v58  ;;  %v777_v61 = vsel %vm764_vm1, %v774_v52, %v776_v59  ;;  %v752_v37 = vsel %vm739_vm2, %v749_v30, %v751_v31  ;;  %v754_v48 = vsel %vm739_vm2, %v751_v31, %v753_v39  ;;  %v1077_v59 = vld [vmem:[%s8085_s7 + $0x18] sm:$0xff] }
  0xf8   : > { %790 = vrot.lane.b32.xlu0 %v6774_v50, %s6592_s17  ;;  %792 = vrot.lane.b32.xlu1 %v6771_v46, %s6592_s17 }
  0xfc   : > { %815 = vrot.lane.b32.xlu0 %v775_v55, %s8096_s20  ;;  %813 = vrot.lane.b32.xlu1 %v773_v57, %s8096_s20  ;;  %v1075_v55 = vld [vmem:[%s8085_s7 + $0x8] sm:$0xff]  ;;  %v1076_v57 = vld [vmem:[%s8085_s7 + $0x10] sm:$0xff] }
  0xfd   : > { %v6130_v58 = vpack.c.bf16 %v1075_v55, %v1074_v53 }
  0xff   : > { %6131 = vmatprep.subr.bf16.mxu0 %v6130_v58 }
 0x100   : > { %794 = vrot.lane.b32.xlu0 %v6788_v56, %s6592_s17  ;;  %796 = vrot.lane.b32.xlu1 %v6785_v54, %s6592_s17 }
 0x101   : > { %6133 = vmatpush3.bf16.msra.mxu0 %v6130_v58 }
 0x104   : > { %819 = vrot.lane.b32.xlu0 %v779_v60, %s8096_s20  ;;  %817 = vrot.lane.b32.xlu1 %v777_v61, %s8096_s20  ;;  %v6134_v60 = vpack.c.bf16 %v1077_v59, %v1076_v57  ;;  %v861_v61 = vlaneseq }
 0x106   : > { %6135 = vmatprep.subr.bf16.mxu0 %v6134_v60 }
 0x107   : > { %6137 = vmatpush3.bf16.msra.mxu0 %v6134_v60 }
 0x108   : > { %821 = vrot.lane.b32.xlu1 %v781_v62, %s8096_s20  ;;  %v6857_v62 = vshrl.u32 %v861_v61, 7 }
 0x15a   : > { %v785_v63 = vpop.permute.xlu0 %784 }
 0x15b   : > { %v833_v12 = vsel %vm831_vm4, %v742_v10, %v785_v63  ;;  %v6860_v63 = vsub.s32 0, %v6857_v62 }
 0x15e   : > { %v783_v1 = vpop.permute.xlu0 %782  ;;  %v808_v3 = vpop.permute.xlu1 %807 }
 0x15f   : > { %v832_v4 = vsel %vm831_vm4, %v763_v2, %v783_v1  ;;  %v864_v1 = vrot.slane %v6865_v0, %v6860_v63 }
 0x160   : > { %v841_v5 = vsel %vm840_vm3, %v832_v4, %v808_v3 }
 0x161   : > { %5602 = vmatprep.mubr.msk.f32.mxu1 %vm865_vm5, %v841_v5 }
 0x162   : > { %v787_v8 = vpop.permute.xlu0 %786  ;;  %v789_v9 = vpop.permute.xlu1 %788 }
 0x163   : > { %v834_v13 = vsel %vm831_vm4, %v744_v11, %v787_v8  ;;  %v835_v24 = vsel %vm831_vm4, %v746_v22, %v789_v9 }
 0x166   : > { %v812_v14 = vpop.permute.xlu0 %811  ;;  %v810_v15 = vpop.permute.xlu1 %809 }
 0x167   : > { %v843_v16 = vsel %vm840_vm3, %v834_v13, %v812_v14  ;;  %v842_v17 = vsel %vm840_vm3, %v833_v12, %v810_v15 }
 0x168   : > { %5603 = vmatmul.mubr.msk.f32.vlgmr.msra.gmra.mrb[8].mxu1 %vm865_vm5, %v842_v17 }
 0x169   : > { %5605 = vmatprep.mubr.msk.f32.mxu1 %vm865_vm5, %v843_v16 }
 0x16a   : > { %v791_v20 = vpop.permute.xlu0 %790  ;;  %v793_v21 = vpop.permute.xlu1 %792 }
 0x16b   : > { %v836_v25 = vsel %vm831_vm4, %v748_v23, %v791_v20  ;;  %v837_v41 = vsel %vm831_vm4, %v750_v36, %v793_v21 }
 0x16e   : > { %v816_v26 = vpop.permute.xlu0 %815  ;;  %v814_v27 = vpop.permute.xlu1 %813 }
 0x16f   : > { %v845_v28 = vsel %vm840_vm3, %v836_v25, %v816_v26  ;;  %v844_v29 = vsel %vm840_vm3, %v835_v24, %v814_v27 }
 0x170   : > { %5606 = vmatmul.mubr.msk.f32.gmra.mrb[10].mxu1 %vm865_vm5, %v844_v29 }
 0x171   : > { %5608 = vmatprep.mubr.msk.f32.mxu1 %vm865_vm5, %v845_v28 }
 0x172   : > { %v795_v33 = vpop.permute.xlu0 %794  ;;  %v797_v35 = vpop.permute.xlu1 %796 }
 0x173   : > { %v838_v42 = vsel %vm831_vm4, %v752_v37, %v795_v33  ;;  %v839_v49 = vsel %vm831_vm4, %v754_v48, %v797_v35 }
 0x176   : > { %v820_v43 = vpop.permute.xlu0 %819  ;;  %v818_v44 = vpop.permute.xlu1 %817 }
 0x177   : > { %v847_v45 = vsel %vm840_vm3, %v838_v42, %v820_v43  ;;  %v846_v47 = vsel %vm840_vm3, %v837_v41, %v818_v44 }
 0x178   : > { %5609 = vmatmul.mubr.msk.f32.gmra.mrb[12].mxu1 %vm865_vm5, %v846_v47 }
 0x179   : > { %5611 = vmatprep.mubr.msk.f32.mxu1 %vm865_vm5, %v847_v45 }
 0x17a   : > { %v822_v51 = vpop.permute.xlu1 %821 }
 0x17b   : > { %v848_v52 = vsel %vm840_vm3, %v839_v49, %v822_v51 }
 0x17c   : > { %5612 = vmatmul.mubr.msk.f32.gmra.mrb[14].mxu1 %vm865_vm5, %v848_v52 }
 0x23b   : > { %v5604_v2 = vpop.f32.mrb[8].mxu1 }
 0x23c   : > { %v956_v3 = vpop.f32.mrb[9].mxu1  ;;  %v962_v4 = vadd.f32 %v5604_v2, %v864_v1 }
 0x23d   : > { %v957_v5 = vadd.f32 %v956_v3, %v864_v1 }
 0x23e   : > { %v6869_v6 = vmax.f32 %v962_v4, 0.0 }
 0x23f   : > { %v6871_v7 = vmax.f32 %v957_v5, 0.0 }
 0x240   : > { %v1004_v11 = vsel %vm831_vm4, %v6869_v6, 0.0 }
 0x241   : > { %v1003_v12 = vsel %vm831_vm4, %v6871_v7, 0.0 }
 0x242   : > { %v1005_v16 = vadd.f32 %v1004_v11, %v1003_v12 }
 0x243   : > { %v5607_v8 = vpop.f32.mrb[10].mxu1 }
 0x244   : > { %v966_v9 = vpop.f32.mrb[11].mxu1  ;;  %v972_v13 = vadd.f32 %v5607_v8, %v864_v1 }
 0x245   : > { %v967_v10 = vadd.f32 %v966_v9, %v864_v1 }
 0x246   : > { %v6881_v17 = vmax.f32 %v972_v13, 0.0 }
 0x247   : > { %v6877_v14 = vmax.f32 %v967_v10, 0.0 }
 0x248   : > { %v1008_v23 = vsel %vm831_vm4, %v6881_v17, 0.0 }
 0x249   : > { %v1006_v15 = vsel %vm831_vm4, %v6877_v14, 0.0 }
 0x24a   : > { %v1007_v19 = vadd.f32 %v1006_v15, %v1005_v16 }
 0x24b   : > { %v5610_v18 = vpop.f32.mrb[12].mxu1 }
 0x24c   : > { %v982_v20 = vadd.f32 %v5610_v18, %v864_v1  ;;  %v976_v21 = vpop.f32.mrb[13].mxu1  ;;  %v1009_v27 = vadd.f32 %v1008_v23, %v1007_v19 }
 0x24d   : > { %v977_v22 = vadd.f32 %v976_v21, %v864_v1 }
 0x24e   : > { %v6885_v24 = vmax.f32 %v982_v20, 0.0 }
 0x24f   : > { %v6887_v25 = vmax.f32 %v977_v22, 0.0  ;;  %v5613_v26 = vpop.f32.mrb[14].mxu1 }
 0x250   : > { %v992_v28 = vadd.f32 %v5613_v26, %v864_v1  ;;  %v986_v29 = vpop.f32.mrb[15].mxu1  ;;  %v1012_v35 = vsel %vm831_vm4, %v6885_v24, 0.0 }
 0x251   : > { %v1010_v30 = vsel %vm831_vm4, %v6887_v25, 0.0  ;;  %v987_v31 = vadd.f32 %v986_v29, %v864_v1 }
 0x252   : > { %v1011_v33 = vadd.f32 %v1010_v30, %v1009_v27  ;;  %v6893_v36 = vmax.f32 %v992_v28, 0.0 }
 0x253   : > { %v6895_v37 = vmax.f32 %v987_v31, 0.0 }
 0x254   : > { %v1013_v39 = vadd.f32 %v1012_v35, %v1011_v33  ;;  %v1016_v43 = vsel %vm831_vm4, %v6893_v36, 0.0 }
 0x255   : > { %v1014_v41 = vsel %vm831_vm4, %v6895_v37, 0.0 }
 0x256   : > { %v1015_v42 = vadd.f32 %v1014_v41, %v1013_v39 }
 0x258   : > { %v1017_v44 = vadd.f32 %v1016_v43, %v1015_v42 }
 0x25a   : > { %v1018_v45 = vrot.slane %v1017_v44, 4 }
 0x25c   : > { %v1019_v47 = vadd.f32 %v1018_v45, %v1017_v44 }
 0x25e   : > { %v1020_v48 = vrot.slane %v1019_v47, 2 }
 0x260   : > { %v1021_v49 = vadd.f32 %v1020_v48, %v1019_v47 }
 0x262   : > { %v1022_v51 = vrot.slane %v1021_v49, 1 }
 0x264   : > { %v1023_v52 = vadd.f32 %v1022_v51, %v1021_v49 }
 0x266   : > { %v1025_v53 = vmul.f32 0.015625, %v1023_v52 }
 0x268   : > { %v1026_v55 = vsub.f32 %v6871_v7, %v1025_v53  ;;  %v1027_v57 = vsub.f32 %v6869_v6, %v1025_v53  ;;  %v1028_v58 = vsub.f32 %v6877_v14, %v1025_v53  ;;  %v1029_v59 = vsub.f32 %v6881_v17, %v1025_v53 }
 0x269   : > { %v1030_v60 = vsub.f32 %v6887_v25, %v1025_v53  ;;  %v1031_v3 = vsub.f32 %v6885_v24, %v1025_v53  ;;  %v1032_v10 = vsub.f32 %v6895_v37, %v1025_v53  ;;  %v1033_v15 = vsub.f32 %v6893_v36, %v1025_v53 }
 0x26a   : > { %v1034_v61 = vmul.f32 %v1026_v55, %v1026_v55  ;;  %v1035_v1 = vmul.f32 %v1027_v57, %v1027_v57  ;;  %v1036_v2 = vmul.f32 %v1028_v58, %v1028_v58  ;;  %v1037_v4 = vmul.f32 %v1029_v59, %v1029_v59 }
 0x26b   : > { %v1038_v11 = vmul.f32 %v1030_v60, %v1030_v60  ;;  %v1039_v16 = vmul.f32 %v1031_v3, %v1031_v3  ;;  %v1040_v20 = vmul.f32 %v1032_v10, %v1032_v10  ;;  %v1041_v23 = vmul.f32 %v1033_v15, %v1033_v15 }
 0x26c   : > { %v1042_v5 = vsel %vm831_vm4, %v1034_v61, 0.0  ;;  %v1043_v8 = vsel %vm831_vm4, %v1035_v1, 0.0  ;;  %v1045_v12 = vsel %vm831_vm4, %v1036_v2, 0.0  ;;  %v1047_v18 = vsel %vm831_vm4, %v1037_v4, 0.0 }
 0x26d   : > { %v1044_v9 = vadd.f32 %v1043_v8, %v1042_v5  ;;  %v1049_v21 = vsel %vm831_vm4, %v1038_v11, 0.0  ;;  %v1051_v26 = vsel %vm831_vm4, %v1039_v16, 0.0  ;;  %v1053_v28 = vsel %vm831_vm4, %v1040_v20, 0.0 }
 0x26e   : > { %v1055_v30 = vsel %vm831_vm4, %v1041_v23, 0.0 }
 0x26f   : > { %v1046_v13 = vadd.f32 %v1045_v12, %v1044_v9 }
 0x271   : > { %v1048_v19 = vadd.f32 %v1047_v18, %v1046_v13 }
 0x273   : > { %v1050_v22 = vadd.f32 %v1049_v21, %v1048_v19 }
 0x275   : > { %v1052_v27 = vadd.f32 %v1051_v26, %v1050_v22 }
 0x277   : > { %v1054_v29 = vadd.f32 %v1053_v28, %v1052_v27 }
 0x279   : > { %v1056_v31 = vadd.f32 %v1055_v30, %v1054_v29  ;;  %v5169_v29 = vld [vmem:[%s8086_s8 + $0x40] sm:$0xff] }
 0x27b   : > { %v1057_v33 = vrot.slane %v1056_v31, 4 }
 0x27d   : > { %v1058_v35 = vadd.f32 %v1057_v33, %v1056_v31 }
 0x27f   : > { %v1059_v39 = vrot.slane %v1058_v35, 2 }
 0x281   : > { %v1060_v41 = vadd.f32 %v1059_v39, %v1058_v35 }
 0x283   : > { %v1061_v42 = vrot.slane %v1060_v41, 1 }
 0x285   : > { %v1062_v43 = vadd.f32 %v1061_v42, %v1060_v41 }
 0x287   : > { %v1063_v44 = vmul.f32 0.015625, %v1062_v43 }
 0x289   : > { %v1064_v45 = vadd.f32 1e-05, %v1063_v44 }
 0x28b   : > { %6464 = vrsqrt.f32 %v1064_v45 }
 0x295   : > { %v6465_v47 = vpop.eup %6464 }
 0x296   : > { %v1066_v48 = vmul.f32 %v6465_v47, %v1026_v55  ;;  %v1067_v49 = vmul.f32 %v6465_v47, %v1027_v57  ;;  %v1068_v51 = vmul.f32 %v6465_v47, %v1028_v58  ;;  %v1069_v52 = vmul.f32 %v6465_v47, %v1029_v59 }
 0x297   : > { %v1070_v53 = vmul.f32 %v6465_v47, %v1030_v60  ;;  %v1071_v61 = vmul.f32 %v6465_v47, %v1031_v3  ;;  %v1072_v1 = vmul.f32 %v6465_v47, %v1032_v10  ;;  %v1073_v55 = vmul.f32 %v6465_v47, %v1033_v15 }
 0x298   : > { %5622 = vmatprep.mubr.msk.f32.mxu0 %vm831_vm4, %v1066_v48  ;;  %v6926_v57 = vsub.s32 1, %v6857_v62 }
 0x299   : > { %5623 = vmatmul.mubr.msk.f32.vlgmr.msra.gmra.mrb[0].mxu0 %vm831_vm4, %v1067_v49 }
 0x29a   : > { %5625 = vmatprep.mubr.msk.f32.mxu0 %vm831_vm4, %v1068_v51  ;;  %v1081_v58 = vrot.slane %v6865_v0, %v6926_v57  ;;  %v1211_v51 = vld [vmem:[%s8086_s8] sm:$0xff] }
 0x29d   : > { %5626 = vmatmul.mubr.msk.f32.gmra.mrb[2].mxu0 %vm831_vm4, %v1069_v52  ;;  %v1212_v52 = vld [vmem:[%s8086_s8 + $0x8] sm:$0xff] }
 0x29e   : > { %5628 = vmatprep.mubr.msk.f32.mxu0 %vm831_vm4, %v1070_v53  ;;  %v1213_v53 = vld [vmem:[%s8086_s8 + $0x10] sm:$0xff] }
 0x2a1   : > { %5629 = vmatmul.mubr.msk.f32.gmra.mrb[4].mxu0 %vm831_vm4, %v1071_v61  ;;  %v6138_v61 = vpack.c.bf16 %v1212_v52, %v1211_v51  ;;  %v7025_v51 = vsub.s32 2, %v6857_v62 }
 0x2a2   : > { %5631 = vmatprep.mubr.msk.f32.mxu0 %vm831_vm4, %v1072_v1  ;;  %v1214_v1 = vld [vmem:[%s8086_s8 + $0x18] sm:$0xff] }
 0x2a3   : > { %6139 = vmatprep.subr.bf16.mxu0 %v6138_v61  ;;  %v7029_v52 = vrot.slane %v6865_v0, %v7025_v51 }
 0x2a4   : > { %6141 = vmatpush3.bf16.msra.mxu0 %v6138_v61 }
 0x2a5   : > { %5632 = vmatmul.mubr.msk.f32.gmra.mrb[6].mxu0 %vm831_vm4, %v1073_v55  ;;  %v722_v55 = vld [vmem:[%s6977_s16] sm:$0xff] }
 0x2a6   : > { %5642 = vmatprep.mubr.msk.f32.mxu0 %vm831_vm4, %v722_v55 }
 0x36c   : > { %v5624_v59 = vpop.f32.mrb[0].mxu0 }
 0x36d   : > { %v1178_v60 = vadd.f32 %v5624_v59, %v1081_v58  ;;  %v1172_v2 = vpop.f32.mrb[1].mxu0  ;;  %v723_v59 = vld [vmem:[%s6977_s16 + $0x8] sm:$0xff] }
 0x36e   : > { %v1173_v4 = vadd.f32 %v1172_v2, %v1081_v58  ;;  %v725_v2 = vld [vmem:[%s6977_s16 + $0x18] sm:$0xff] }
 0x370   : > { %v6402_v3 = vpack.i.bf16 %v1178_v60, %v1173_v4  ;;  %v5627_v5 = vpop.f32.mrb[2].mxu0  ;;  %5670 = vmatprep.mubr.msk.f32.mxu1 %vm1378_vm6, %v1173_v4  ;;  %v726_v4 = vld [vmem:[%s6977_s16 + $0x20] sm:$0xff] }
 0x371   : > { %v1188_v8 = vadd.f32 %v5627_v5, %v1081_v58  ;;  %v1182_v9 = vpop.f32.mrb[3].mxu0  ;;  %v728_v5 = vld [vmem:[%s6977_s16 + $0x30] sm:$0xff] }
 0x372   : > { %v1183_v10 = vadd.f32 %v1182_v9, %v1081_v58  ;;  %6403 = vrot.lane.b32.xlu0 %v6402_v3, %s8094_s21  ;;  %v727_v3 = vld [vmem:[%s6977_s16 + $0x28] sm:$0xff]  ;;  %v7002_v9 = vld [vmem:[%s546_s27] sm:$0x1] }
 0x374   : > { %v6407_v11 = vpack.i.bf16 %v1188_v8, %v1183_v10  ;;  %v5630_v12 = vpop.f32.mrb[4].mxu0 }
 0x375   : > { %v1198_v13 = vadd.f32 %v5630_v12, %v1081_v58  ;;  %v1192_v15 = vpop.f32.mrb[5].mxu0 }
 0x376   : > { %v1193_v16 = vadd.f32 %v1192_v15, %v1081_v58  ;;  %6408 = vrot.lane.b32.xlu1 %v6407_v11, %s8094_s21 }
 0x378   : > { %v6412_v18 = vpack.i.bf16 %v1198_v13, %v1193_v16  ;;  %v5633_v19 = vpop.f32.mrb[6].mxu0 }
 0x379   : > { %v1208_v20 = vadd.f32 %v5633_v19, %v1081_v58  ;;  %v1202_v21 = vpop.f32.mrb[7].mxu0 }
 0x37a   : > { %v1203_v22 = vadd.f32 %v1202_v21, %v1081_v58  ;;  %6413 = vrot.lane.b32.xlu0 %v6412_v18, %s8094_s21  ;;  %v6142_v58 = vpack.c.bf16 %v1214_v1, %v1213_v53 }
 0x37c   : > { %v6417_v23 = vpack.i.bf16 %v1208_v20, %v1203_v22  ;;  %6143 = vmatprep.subr.bf16.mxu0 %v6142_v58 }
 0x37d   : > { %6145 = vmatpush3.bf16.msra.mxu0 %v6142_v58 }
 0x37e   : > { %6418 = vrot.lane.b32.xlu1 %v6417_v23, %s8094_s21  ;;  %s8100_s21 = smov 112  }
 0x380   : > { %5643 = vmatmul.mubr.msk.f32.vlgmr.msra.gmra.mrb[8].mxu0 %vm831_vm4, %v723_v59 }
 0x3e4   : > { %v6404_v26 = vpop.permute.xlu0 %6403 }
 0x3e5   : > { %v6406_v27 = vunpack.i.h.bf16 %v6404_v26  ;;  %v6405_v28 = vunpack.i.l.bf16 %v6404_v26 }
 0x3e7   : > { %v6146_v30 = vpack.c.bf16 %v6406_v27, %v6405_v28 }
 0x3e8   : > { %v6409_v31 = vpop.permute.xlu1 %6408 }
 0x3e9   : > { %v6411_v33 = vunpack.i.h.bf16 %v6409_v31  ;;  %v6410_v35 = vunpack.i.l.bf16 %v6409_v31  ;;  %6148 = vmatprep.subr.msk.bf16.mxu1 %vm6937_vm7, %v6146_v30 }
 0x3ea   : > { %6151 = vmatpush3.bf16.xpose.msk.msra.mxu1 %vm6937_vm7, %v6146_v30 }
 0x3eb   : > { %v6152_v39 = vpack.c.bf16 %v6411_v33, %v6410_v35 }
 0x3ec   : > { %v6414_v41 = vpop.permute.xlu0 %6413 }
 0x3ed   : > { %v6416_v42 = vunpack.i.h.bf16 %v6414_v41  ;;  %v6415_v43 = vunpack.i.l.bf16 %v6414_v41  ;;  %6154 = vmatprep.subr.msk.bf16.mxu1 %vm6937_vm7, %v6152_v39 }
 0x3ef   : > { %v6158_v44 = vpack.c.bf16 %v6416_v42, %v6415_v43 }
 0x3f0   : > { %v6419_v45 = vpop.permute.xlu1 %6418 }
 0x3f1   : > { %v6421_v47 = vunpack.i.h.bf16 %v6419_v45  ;;  %v6420_v48 = vunpack.i.l.bf16 %v6419_v45 }
 0x3f2   : > { %6157 = vmatpush3.bf16.xpose.msk.msra.mxu1 %vm6937_vm7, %v6152_v39 }
 0x3f3   : > { %6160 = vmatprep.subr.msk.bf16.mxu1 %vm6937_vm7, %v6158_v44  ;;  %v6164_v49 = vpack.c.bf16 %v6421_v47, %v6420_v48 }
 0x3fa   : > { %6163 = vmatpush3.bf16.xpose.msk.msra.mxu1 %vm6937_vm7, %v6158_v44 }
 0x3fb   : > { %6166 = vmatprep.subr.msk.bf16.mxu1 %vm6937_vm7, %v6164_v49 }
 0x402   : > { %6169 = vmatpush3.bf16.xpose.msk.msra.mxu1 %vm6937_vm7, %v6164_v49 }
 0x409   : > { %5671 = vmatmul.mubr.msk.f32.vlgmr.msra.gmra.mrb[16].mxu1 %vm1378_vm6, %v1178_v60  ;;  %v724_v60 = vld [vmem:[%s6977_s16 + $0x10] sm:$0xff] }
 0x40a   : > { %5673 = vmatprep.mubr.msk.f32.mxu1 %vm1378_vm6, %v1183_v10  ;;  %5645 = vmatprep.mubr.msk.f32.mxu0 %vm831_vm4, %v724_v60  ;;  %v571_v10 = vadd.f32 1e-06, %v7002_v9 }
 0x40b   : > { %5646 = vmatmul.mubr.msk.f32.gmra.mrb[10].mxu0 %vm831_vm4, %v725_v2 }
 0x40c   : > { %5648 = vmatprep.mubr.msk.f32.mxu0 %vm831_vm4, %v726_v4  ;;  %6466 = vlog2.f32 %v571_v10 }
 0x40d   : > { %5674 = vmatmul.mubr.msk.f32.gmra.mrb[18].mxu1 %vm1378_vm6, %v1188_v8  ;;  %v729_v8 = vld [vmem:[%s6977_s16 + $0x38] sm:$0xff] }
 0x40e   : > { %5676 = vmatprep.mubr.msk.f32.mxu1 %vm1378_vm6, %v1193_v16 }
 0x40f   : > { %5649 = vmatmul.mubr.msk.f32.gmra.mrb[12].mxu0 %vm831_vm4, %v727_v3 }
 0x410   : > { %5651 = vmatprep.mubr.msk.f32.mxu0 %vm831_vm4, %v728_v5 }
 0x411   : > { %5677 = vmatmul.mubr.msk.f32.gmra.mrb[20].mxu1 %vm1378_vm6, %v1198_v13 }
 0x412   : > { %5679 = vmatprep.mubr.msk.f32.mxu1 %vm1378_vm6, %v1203_v22 }
 0x413   : > { %5652 = vmatmul.mubr.msk.f32.gmra.mrb[14].mxu0 %vm831_vm4, %v729_v8 }
 0x415   : > { %5680 = vmatmul.mubr.msk.f32.gmra.mrb[22].mxu1 %vm1378_vm6, %v1208_v20 }
 0x416   : > { %v6467_v11 = vpop.eup %6466 }
 0x417   : > { %v573_v12 = vmul.f32 0.6931472, %v6467_v11 }
 0x419   : > { %v7006_v13 = vrot.slane %v573_v12, %v6860_v63 }
 0x453   : > { %v5644_v53 = vpop.f32.mrb[8].mxu0 }
 0x454   : > { %v1315_v61 = vadd.f32 %v5644_v53, %v7029_v52  ;;  %v1309_v1 = vpop.f32.mrb[9].mxu0 }
 0x455   : > { %v1310_v55 = vadd.f32 %v1309_v1, %v7029_v52 }
 0x457   : > { %v6170_v58 = vpack.c.bf16 %v1315_v61, %v1310_v55 }
 0x459   : > { %6171 = vmatprep.subr.bf16.mxu0 %v6170_v58 }
 0x45a   : > { %6173 = vmatpush3.bf16.msra.mxu0 %v6170_v58 }
 0x4dc   : > { %v5672_v15 = vpop.f32.mrb[16].mxu1 }
 0x4dd   : > { %v1483_v16 = vadd.f32 %v5672_v15, %v7006_v13  ;;  %v1477_v18 = vpop.f32.mrb[17].mxu1 }
 0x4de   : > { %v1478_v19 = vadd.f32 %v1477_v18, %v7006_v13  ;;  %v5647_v59 = vpop.f32.mrb[10].mxu0 }
 0x4df   : > { %v1519_v20 = vsel %vm840_vm3, %v1483_v16, -inf  ;;  %v1325_v60 = vadd.f32 %v5647_v59, %v7029_v52  ;;  %v1319_v2 = vpop.f32.mrb[11].mxu0 }
 0x4e0   : > { %1520 = vmax.xlane.f32.xlu1 %v1519_v20  ;;  %v5675_v21 = vpop.f32.mrb[18].mxu1  ;;  %v1516_v22 = vsel %vm840_vm3, %v1478_v19, -inf  ;;  %v1320_v4 = vadd.f32 %v1319_v2, %v7029_v52 }
 0x4e1   : > { %v1487_v23 = vpop.f32.mrb[19].mxu1  ;;  %1517 = vmax.xlane.f32.xlu0 %v1516_v22  ;;  %v1493_v27 = vadd.f32 %v5675_v21, %v7006_v13 }
 0x4e2   : > { %v1488_v26 = vadd.f32 %v1487_v23, %v7006_v13  ;;  %v6174_v3 = vpack.c.bf16 %v1325_v60, %v1320_v4 }
 0x4e3   : > { %v1525_v42 = vsel %vm840_vm3, %v1493_v27, -inf }
 0x4e4   : > { %v5678_v28 = vpop.f32.mrb[20].mxu1  ;;  %v1522_v30 = vsel %vm840_vm3, %v1488_v26, -inf  ;;  %6175 = vmatprep.subr.bf16.mxu0 %v6174_v3 }
 0x4e5   : > { %v1497_v31 = vpop.f32.mrb[21].mxu1  ;;  %1523 = vmax.xlane.f32.xlu0 %v1522_v30  ;;  %v1503_v35 = vadd.f32 %v5678_v28, %v7006_v13  ;;  %6177 = vmatpush3.bf16.msra.mxu0 %v6174_v3 }
 0x4e6   : > { %v1498_v33 = vadd.f32 %v1497_v31, %v7006_v13 }
 0x4e7   : > { %v1531_v48 = vsel %vm840_vm3, %v1503_v35, -inf }
 0x4e8   : > { %v5681_v39 = vpop.f32.mrb[22].mxu1  ;;  %v1528_v41 = vsel %vm840_vm3, %v1498_v33, -inf }
 0x4e9   : > { %v1507_v43 = vpop.f32.mrb[23].mxu1  ;;  %1529 = vmax.xlane.f32.xlu1 %v1528_v41  ;;  %1526 = vmax.xlane.f32.xlu0 %v1525_v42  ;;  %v1513_v45 = vadd.f32 %v5681_v39, %v7006_v13 }
 0x4ea   : > { %v1508_v44 = vadd.f32 %v1507_v43, %v7006_v13 }
 0x4eb   : > { %v1537_v49 = vsel %vm840_vm3, %v1513_v45, -inf }
 0x4ec   : > { %v1534_v47 = vsel %vm840_vm3, %v1508_v44, -inf }
 0x4ed   : > { %1535 = vmax.xlane.f32.xlu1 %v1534_v47  ;;  %1532 = vmax.xlane.f32.xlu0 %v1531_v48 }
 0x4f1   : > { %1538 = vmax.xlane.f32.xlu0 %v1537_v49 }
 0x56d   : > { %v1521_v5 = vpop.xlane.xlu1 %1520 }
 0x56e   : > { %v1541_v8 = vsub.f32 %v1483_v16, %v1521_v5  ;;  %v1518_v10 = vpop.xlane.xlu0 %1517 }
 0x56f   : > { %v1540_v11 = vsub.f32 %v1478_v19, %v1518_v10 }
 0x570   : > { %v1550_v12 = vmul.f32 1.442695, %v1541_v8  ;;  %v5650_v8 = vpop.f32.mrb[12].mxu0 }
 0x571   : > { %v1548_v15 = vmul.f32 1.442695, %v1540_v11  ;;  %v1329_v10 = vpop.f32.mrb[13].mxu0  ;;  %v1335_v11 = vadd.f32 %v5650_v8, %v7029_v52 }
 0x572   : > { %6468 = vpow2.f32 %v1550_v12  ;;  %v1524_v18 = vpop.xlane.xlu0 %1523  ;;  %v1330_v12 = vadd.f32 %v1329_v10, %v7029_v52 }
 0x573   : > { %6470 = vpow2.f32 %v1548_v15  ;;  %v1542_v20 = vsub.f32 %v1488_v26, %v1524_v18  ;;  %v5653_v18 = vpop.f32.mrb[14].mxu0 }
 0x574   : > { %v6178_v15 = vpack.c.bf16 %v1335_v11, %v1330_v12 }
 0x575   : > { %v1552_v21 = vmul.f32 1.442695, %v1542_v20  ;;  %v1339_v20 = vpop.f32.mrb[15].mxu0 }
 0x576   : > { %v1530_v22 = vpop.xlane.xlu1 %1529  ;;  %v1527_v23 = vpop.xlane.xlu0 %1526  ;;  %6179 = vmatprep.subr.bf16.mxu0 %v6178_v15 }
 0x577   : > { %6472 = vpow2.f32 %v1552_v21  ;;  %v1544_v28 = vsub.f32 %v1498_v33, %v1530_v22  ;;  %v1543_v30 = vsub.f32 %v1493_v27, %v1527_v23  ;;  %v1345_v21 = vadd.f32 %v5653_v18, %v7029_v52  ;;  %6181 = vmatpush3.bf16.msra.mxu0 %v6178_v15 }
 0x578   : > { %v1340_v22 = vadd.f32 %v1339_v20, %v7029_v52 }
 0x579   : > { %v1556_v31 = vmul.f32 1.442695, %v1544_v28  ;;  %v1554_v39 = vmul.f32 1.442695, %v1543_v30  ;;  %v1755_v28 = vld [vmem:[%s8087_s9] sm:$0xff]  ;;  %v1756_v30 = vld [vmem:[%s8087_s9 + $0x8] sm:$0xff] }
 0x57a   : > { %v1536_v41 = vpop.xlane.xlu1 %1535  ;;  %v1533_v42 = vpop.xlane.xlu0 %1532  ;;  %v6182_v23 = vpack.c.bf16 %v1345_v21, %v1340_v22  ;;  %v565_v22 = vld [vmem:[%s551_s24 + $0x10] sm:$0xff] }
 0x57b   : > { %6474 = vpow2.f32 %v1556_v31  ;;  %v1546_v16 = vsub.f32 %v1508_v44, %v1536_v41  ;;  %v1545_v43 = vsub.f32 %v1503_v35, %v1533_v42  ;;  %v6186_v31 = vpack.c.bf16 %v1756_v30, %v1755_v28  ;;  %v567_v28 = vld [vmem:[%s551_s24 + $0x20] sm:$0xff] }
 0x57c   : > { %v7035_v19 = vpop.eup %6468  ;;  %6476 = vpow2.f32 %v1554_v39  ;;  %6183 = vmatprep.subr.bf16.mxu0 %v6182_v23  ;;  %v1946_v30 = vld [vmem:[%s8088_s10] sm:$0xff] }
 0x57d   : > { %v7037_v47 = vpop.eup %6470  ;;  %v1560_v48 = vmul.f32 1.442695, %v1546_v16  ;;  %v1558_v26 = vmul.f32 1.442695, %v1545_v43  ;;  %v1567_v49 = vsel %vm840_vm3, %v7035_v19, 0.0  ;;  %6185 = vmatpush3.bf16.msra.mxu0 %v6182_v23  ;;  %v564_v23 = vld [vmem:[%s551_s24 + $0x8] sm:$0xff] }
 0x57e   : > { %1568 = vadd.xlane.f32.xlu0 %v1567_v49  ;;  %v1539_v33 = vpop.xlane.xlu0 %1538  ;;  %v1564_v27 = vsel %vm840_vm3, %v7037_v47, 0.0  ;;  %6187 = vmatprep.subr.bf16.mxu0 %v6186_v31 }
 0x57f   : > { %6478 = vpow2.f32 %v1560_v48  ;;  %v1547_v53 = vsub.f32 %v1513_v45, %v1539_v33  ;;  %1565 = vadd.xlane.f32.xlu1 %v1564_v27  ;;  %v7076_v48 = vrot.slane %v7002_v9, %v6860_v63 }
 0x580   : > { %6480 = vpow2.f32 %v1558_v26 }
 0x581   : > { %v6473_v35 = vpop.eup %6472  ;;  %v1562_v44 = vmul.f32 1.442695, %v1547_v53 }
 0x582   : > { %v1570_v61 = vsel %vm840_vm3, %v6473_v35, 0.0 }
 0x583   : > { %6482 = vpow2.f32 %v1562_v44  ;;  %1571 = vadd.xlane.f32.xlu1 %v1570_v61 }
 0x585   : > { %v7044_v1 = vpop.eup %6474 }
 0x586   : > { %v7046_v55 = vpop.eup %6476  ;;  %v1576_v58 = vsel %vm840_vm3, %v7044_v1, 0.0 }
 0x587   : > { %1577 = vadd.xlane.f32.xlu1 %v1576_v58  ;;  %v1573_v59 = vsel %vm840_vm3, %v7046_v55, 0.0 }
 0x588   : > { %1574 = vadd.xlane.f32.xlu0 %v1573_v59 }
 0x589   : > { %v7052_v45 = vpop.eup %6478 }
 0x58a   : > { %v7054_v60 = vpop.eup %6480  ;;  %v1582_v2 = vsel %vm840_vm3, %v7052_v45, 0.0 }
 0x58b   : > { %1583 = vadd.xlane.f32.xlu1 %v1582_v2  ;;  %v1579_v4 = vsel %vm840_vm3, %v7054_v60, 0.0 }
 0x58c   : > { %1580 = vadd.xlane.f32.xlu0 %v1579_v4 }
 0x58d   : > { %v7060_v3 = vpop.eup %6482 }
 0x58e   : > { %v1585_v5 = vsel %vm840_vm3, %v7060_v3, 0.0 }
 0x590   : > { %1586 = vadd.xlane.f32.xlu0 %v1585_v5 }
 0x60b   : > { %v1569_v39 = vpop.xlane.xlu0 %1568 }
 0x60c   : > { %6484 = vrcp.f32 %v1569_v39  ;;  %v1566_v41 = vpop.xlane.xlu1 %1565 }
 0x60d   : > { %6486 = vrcp.f32 %v1566_v41  ;;  %v568_v41 = vld [vmem:[%s551_s24 + $0x28] sm:$0xff] }
 0x610   : > { %v1572_v52 = vpop.xlane.xlu1 %1571 }
 0x611   : > { %6488 = vrcp.f32 %v1572_v52  ;;  %v569_v52 = vld [vmem:[%s551_s24 + $0x30] sm:$0xff] }
 0x614   : > { %v1578_v42 = vpop.xlane.xlu1 %1577 }
 0x615   : > { %6490 = vrcp.f32 %v1578_v42  ;;  %v1575_v16 = vpop.xlane.xlu0 %1574  ;;  %v570_v42 = vld [vmem:[%s551_s24 + $0x38] sm:$0xff] }
 0x616   : > { %v6485_v43 = vpop.eup %6484  ;;  %6492 = vrcp.f32 %v1575_v16 }
 0x617   : > { %v6487_v26 = vpop.eup %6486  ;;  %v1597_v49 = vmul.f32 %v6485_v43, %v7035_v19 }
 0x618   : > { %v1584_v33 = vpop.xlane.xlu1 %1583  ;;  %v1596_v27 = vmul.f32 %v6487_v26, %v7037_v47 }
 0x619   : > { %6494 = vrcp.f32 %v1584_v33  ;;  %v1581_v53 = vpop.xlane.xlu0 %1580  ;;  %v1611_v58 = vmul.f32 %v7076_v48, %v1597_v49 }
 0x61a   : > { %6496 = vrcp.f32 %v1581_v53  ;;  %v1610_v44 = vmul.f32 %v7076_v48, %v1596_v27 }
 0x61b   : > { %v6489_v61 = vpop.eup %6488 }
 0x61c   : > { %5698 = vmatprep.mubr.msk.f32.mxu0 %vm840_vm3, %v1610_v44  ;;  %v1598_v59 = vmul.f32 %v6489_v61, %v6473_v35 }
 0x61d   : > { %v1587_v9 = vpop.xlane.xlu0 %1586  ;;  %5699 = vmatmul.mubr.msk.f32.vlgmr.msra.gmra.mrb[16].mxu0 %vm840_vm3, %v1611_v58 }
 0x61e   : > { %6498 = vrcp.f32 %v1587_v9  ;;  %v1612_v19 = vmul.f32 %v7076_v48, %v1598_v59  ;;  %6189 = vmatpush3.bf16.msra.mxu0 %v6186_v31  ;;  %v1947_v31 = vld [vmem:[%s8088_s10 + $0x8] sm:$0xff] }
 0x61f   : > { %v6491_v2 = vpop.eup %6490  ;;  %v6190_v39 = vpack.c.bf16 %v1947_v31, %v1946_v30 }
 0x620   : > { %v6493_v47 = vpop.eup %6492  ;;  %5701 = vmatprep.mubr.msk.f32.mxu0 %vm840_vm3, %v1612_v19  ;;  %v1600_v4 = vmul.f32 %v6491_v2, %v7044_v1 }
 0x621   : > { %v1599_v5 = vmul.f32 %v6493_v47, %v7046_v55  ;;  %6191 = vmatprep.subr.bf16.mxu1 %v6190_v39 }
 0x622   : > { %v1614_v8 = vmul.f32 %v7076_v48, %v1600_v4  ;;  %6193 = vmatpush3.bf16.msra.mxu1 %v6190_v39 }
 0x623   : > { %v6495_v10 = vpop.eup %6494  ;;  %v1613_v35 = vmul.f32 %v7076_v48, %v1599_v5  ;;  %v1948_v5 = vld [vmem:[%s8088_s10 + $0x10] sm:$0xff] }
 0x624   : > { %v6497_v11 = vpop.eup %6496  ;;  %v1602_v12 = vmul.f32 %v6495_v10, %v7052_v45  ;;  %v6595_v45 = vmov 0  }
 0x625   : > { %5702 = vmatmul.mubr.msk.f32.gmra.mrb[18].mxu0 %vm840_vm3, %v1613_v35  ;;  %v1601_v15 = vmul.f32 %v6497_v11, %v7054_v60  ;;  %6422 = vset.pattern.permute.xlu1 %v6595_v45  ;;  %v563_v60 = vld [vmem:[%s551_s24] sm:$0xff] }
 0x626   : > { %5704 = vmatprep.mubr.msk.f32.mxu0 %vm840_vm3, %v1614_v8  ;;  %v1616_v18 = vmul.f32 %v7076_v48, %v1602_v12  ;;  %6423 = vset.pattern.permute.xlu0 %v6595_v45  ;;  %v1949_v8 = vld [vmem:[%s8088_s10 + $0x18] sm:$0xff] }
 0x627   : > { %v1615_v1 = vmul.f32 %v7076_v48, %v1601_v15  ;;  %1892 = vperm.xlu1 %6422, %v563_v60   ;;  %1897 = vperm.xlu0 %6423, %v564_v23   ;;  %v6194_v10 = vpack.c.bf16 %v1949_v8, %v1948_v5  ;;  %v7132_v15 = vsub.s32 3, %v6857_v62  ;;  %v5048_v8 = vld [vmem:[%s8084_s6 + $0x70] sm:$0xff] }
 0x628   : > { %v6499_v55 = vpop.eup %6498 }
 0x629   : > { %5705 = vmatmul.mubr.msk.f32.gmra.mrb[20].mxu0 %vm840_vm3, %v1615_v1  ;;  %v1603_v20 = vmul.f32 %v6499_v55, %v7060_v3  ;;  %v566_v3 = vld [vmem:[%s551_s24 + $0x18] sm:$0xff]  ;;  %6195 = vmatprep.subr.bf16.mxu1 %v6194_v10 }
 0x62a   : > { %5707 = vmatprep.mubr.msk.f32.mxu0 %vm840_vm3, %v1616_v18  ;;  %6197 = vmatpush3.bf16.msra.mxu1 %v6194_v10  ;;  %v1760_v18 = vrot.slane %v6865_v0, %v7132_v15 }
 0x62b   : > { %v1617_v21 = vmul.f32 %v7076_v48, %v1603_v20  ;;  %1902 = vperm.xlu1 %6422, %v565_v22  }
 0x62d   : > { %5708 = vmatmul.mubr.msk.f32.gmra.mrb[22].mxu0 %vm840_vm3, %v1617_v21 }
 0x62f   : > { %1907 = vperm.xlu1 %6422, %v566_v3  }
 0x633   : > { %1912 = vperm.xlu1 %6422, %v567_v28  }
 0x637   : > { %1917 = vperm.xlu1 %6422, %v568_v41  }
 0x63b   : > { %1922 = vperm.xlu1 %6422, %v569_v52  }
 0x63f   : > { %1927 = vperm.xlu1 %6422, %v570_v42  }
 0x6a6   : > { %v7125_v35 = vpop.permute.xlu1 %1892  ;;  %v7138_v20 = vpop.permute.xlu0 %1897 }
 0x6aa   : > { %v7127_v11 = vpop.permute.xlu1 %1902 }
 0x6ae   : > { %v7129_v12 = vpop.permute.xlu1 %1907 }
 0x6b2   : > { %v7136_v1 = vpop.permute.xlu1 %1912 }
 0x6b6   : > { %v7142_v3 = vpop.permute.xlu1 %1917 }
 0x6f0   : > { %v5700_v16 = vpop.f32.mrb[16].mxu0 }
 0x6f1   : > { %v1708_v43 = vpop.f32.mrb[17].mxu0  ;;  %v1748_v49 = vmax.f32 %v5700_v16, 0.0  ;;  %v7149_v16 = vpop.permute.xlu1 %1922 }
 0x6f2   : > { %v1747_v26 = vmax.f32 %v1708_v43, 0.0 }
 0x6f4   : > { %5714 = vmatprep.mubr.msk.f32.mxu0 %vm1378_vm6, %v1747_v26 }
 0x6f5   : > { %5715 = vmatmul.mubr.msk.f32.vlgmr.msra.gmra.mrb[24].mxu0 %vm1378_vm6, %v1748_v49 }
 0x6f8   : > { %v5703_v33 = vpop.f32.mrb[18].mxu0 }
 0x6f9   : > { %v1718_v27 = vpop.f32.mrb[19].mxu0  ;;  %v1750_v44 = vmax.f32 %v5703_v33, 0.0 }
 0x6fa   : > { %v1749_v53 = vmax.f32 %v1718_v27, 0.0 }
 0x6fc   : > { %v5706_v61 = vpop.f32.mrb[20].mxu0  ;;  %5717 = vmatprep.mubr.msk.f32.mxu0 %vm1378_vm6, %v1749_v53 }
 0x6fd   : > { %v1728_v58 = vpop.f32.mrb[21].mxu0  ;;  %5718 = vmatmul.mubr.msk.f32.gmra.mrb[26].mxu0 %vm1378_vm6, %v1750_v44  ;;  %v1752_v9 = vmax.f32 %v5706_v61, 0.0 }
 0x6fe   : > { %v1751_v59 = vmax.f32 %v1728_v58, 0.0 }
 0x700   : > { %v5709_v19 = vpop.f32.mrb[22].mxu0  ;;  %5720 = vmatprep.mubr.msk.f32.mxu0 %vm1378_vm6, %v1751_v59 }
 0x701   : > { %v1738_v2 = vpop.f32.mrb[23].mxu0  ;;  %5721 = vmatmul.mubr.msk.f32.gmra.mrb[28].mxu0 %vm1378_vm6, %v1752_v9  ;;  %v1754_v4 = vmax.f32 %v5709_v19, 0.0  ;;  %v7158_v9 = vpop.permute.xlu1 %1927 }
 0x702   : > { %v1753_v47 = vmax.f32 %v1738_v2, 0.0 }
 0x704   : > { %5723 = vmatprep.mubr.msk.f32.mxu0 %vm1378_vm6, %v1753_v47 }
 0x705   : > { %5724 = vmatmul.mubr.msk.f32.gmra.mrb[30].mxu0 %vm1378_vm6, %v1754_v4 }
 0x7c8   : > { %v5716_v55 = vpop.f32.mrb[24].mxu0 }
 0x7c9   : > { %v1857_v21 = vadd.f32 %v5716_v55, %v1760_v18  ;;  %v1851_v45 = vpop.f32.mrb[25].mxu0  ;;  %v5051_v55 = vld [vmem:[%s8084_s6 + $0x88] sm:$0xff] }
 0x7ca   : > { %v1852_v60 = vadd.f32 %v1851_v45, %v1760_v18  ;;  %v7189_v45 = vsub.s32 4, %v6857_v62  ;;  %v5055_v62 = vld [vmem:[%s8084_s6 + $0xa8] sm:$0xff] }
 0x7cb   : > { %v1931_v22 = vmul.f32 %v7138_v20, %v1857_v21 }
 0x7cc   : > { %v1930_v23 = vmul.f32 %v7125_v35, %v1852_v60  ;;  %v5052_v60 = vld [vmem:[%s8084_s6 + $0x90] sm:$0xff] }
 0x7cd   : > { %v1939_v30 = vadd.f32 %v1931_v22, %v6869_v6  ;;  %v5053_v22 = vld [vmem:[%s8084_s6 + $0x98] sm:$0xff] }
 0x7ce   : > { %v1938_v28 = vadd.f32 %v1930_v23, %v6871_v7  ;;  %v6210_v23 = vpack.c.bf16 %v5053_v22, %v5052_v60 }
 0x7d0   : > { %v5719_v31 = vpop.f32.mrb[26].mxu0  ;;  %5734 = vmatprep.mubr.msk.f32.mxu1 %vm831_vm4, %v1938_v28  ;;  %v1953_v28 = vrot.slane %v6865_v0, %v7189_v45  ;;  %v5056_v0 = vld [vmem:[%s8084_s6 + $0xb0] sm:$0xff] }
 0x7d1   : > { %v1867_v39 = vadd.f32 %v5719_v31, %v1760_v18  ;;  %v1861_v41 = vpop.f32.mrb[27].mxu0  ;;  %5735 = vmatmul.mubr.msk.f32.vlgmr.msra.gmra.mrb[24].mxu1 %vm831_vm4, %v1939_v30  ;;  %v5054_v30 = vld [vmem:[%s8084_s6 + $0xa0] sm:$0xff] }
 0x7d2   : > { %v1862_v52 = vadd.f32 %v1861_v41, %v1760_v18  ;;  %v6214_v31 = vpack.c.bf16 %v5055_v62, %v5054_v30 }
 0x7d3   : > { %v1933_v42 = vmul.f32 %v7129_v12, %v1867_v39 }
 0x7d4   : > { %v1932_v43 = vmul.f32 %v7127_v11, %v1862_v52  ;;  %v5722_v26 = vpop.f32.mrb[28].mxu0 }
 0x7d5   : > { %v1877_v49 = vadd.f32 %v5722_v26, %v1760_v18  ;;  %v1871_v33 = vpop.f32.mrb[29].mxu0  ;;  %v1941_v27 = vadd.f32 %v1933_v42, %v6881_v17 }
 0x7d6   : > { %v1940_v7 = vadd.f32 %v1932_v43, %v6877_v14  ;;  %v1872_v6 = vadd.f32 %v1871_v33, %v1760_v18  ;;  %v5057_v43 = vld [vmem:[%s8084_s6 + $0xb8] sm:$0xff] }
 0x7d7   : > { %v1935_v53 = vmul.f32 %v7142_v3, %v1877_v49  ;;  %v6218_v49 = vpack.c.bf16 %v5057_v43, %v5056_v0 }
 0x7d8   : > { %v1934_v44 = vmul.f32 %v7136_v1, %v1872_v6  ;;  %v5725_v61 = vpop.f32.mrb[30].mxu0  ;;  %5737 = vmatprep.mubr.msk.f32.mxu1 %vm831_vm4, %v1940_v7 }
 0x7d9   : > { %v1887_v58 = vadd.f32 %v5725_v61, %v1760_v18  ;;  %v1881_v59 = vpop.f32.mrb[31].mxu0  ;;  %5738 = vmatmul.mubr.msk.f32.gmra.mrb[26].mxu1 %vm831_vm4, %v1941_v27  ;;  %v1943_v14 = vadd.f32 %v1935_v53, %v6885_v24  ;;  %v5046_v24 = vld [vmem:[%s8084_s6 + $0x60] sm:$0xff] }
 0x7da   : > { %v1942_v19 = vadd.f32 %v1934_v44, %v6887_v25  ;;  %v1882_v2 = vadd.f32 %v1881_v59, %v1760_v18  ;;  %v5047_v25 = vld [vmem:[%s8084_s6 + $0x68] sm:$0xff]  ;;  %v5050_v18 = vld [vmem:[%s8084_s6 + $0x80] sm:$0xff] }
 0x7db   : > { %v1937_v17 = vmul.f32 %v7158_v9, %v1887_v58  ;;  %v6198_v10 = vpack.c.bf16 %v5047_v25, %v5046_v24  ;;  %v6206_v21 = vpack.c.bf16 %v5051_v55, %v5050_v18 }
 0x7dc   : > { %v1936_v47 = vmul.f32 %v7149_v16, %v1882_v2  ;;  %5740 = vmatprep.mubr.msk.f32.mxu1 %vm831_vm4, %v1942_v19 }
 0x7dd   : > { %5741 = vmatmul.mubr.msk.f32.gmra.mrb[28].mxu1 %vm831_vm4, %v1943_v14  ;;  %v1945_v5 = vadd.f32 %v1937_v17, %v6893_v36  ;;  %v5049_v36 = vld [vmem:[%s8084_s6 + $0x78] sm:$0xff]  ;;  %6199 = vmatprep.subr.bf16.mxu0 %v6198_v10 }
 0x7de   : > { %v1944_v4 = vadd.f32 %v1936_v47, %v6895_v37  ;;  %v6202_v37 = vpack.c.bf16 %v5049_v36, %v5048_v8  ;;  %6201 = vmatpush3.bf16.msra.mxu0 %v6198_v10 }
 0x7e0   : > { %5743 = vmatprep.mubr.msk.f32.mxu1 %vm831_vm4, %v1944_v4  ;;  %6203 = vmatprep.subr.bf16.mxu0 %v6202_v37 }
 0x7e1   : > { %5744 = vmatmul.mubr.msk.f32.gmra.mrb[30].mxu1 %vm831_vm4, %v1945_v5 }
 0x7e2   : > { %6205 = vmatpush3.bf16.msra.mxu0 %v6202_v37 }
 0x7e3   : > { %6207 = vmatprep.subr.bf16.mxu0 %v6206_v21 }
 0x7e6   : > { %6209 = vmatpush3.bf16.msra.mxu0 %v6206_v21 }
 0x7e7   : > { %6211 = vmatprep.subr.bf16.mxu0 %v6210_v23 }
 0x7ea   : > { %6213 = vmatpush3.bf16.msra.mxu0 %v6210_v23 }
 0x7eb   : > { %6215 = vmatprep.subr.bf16.mxu0 %v6214_v31 }
 0x7ee   : > { %6217 = vmatpush3.bf16.msra.mxu0 %v6214_v31 }
 0x7ef   : > { %6219 = vmatprep.subr.bf16.mxu0 %v6218_v49 }
 0x7f2   : > { %6221 = vmatpush3.bf16.msra.mxu0 %v6218_v49 }
 0x8a4   : > { %v5736_v39 = vpop.f32.mrb[24].mxu1 }
 0x8a5   : > { %v2050_v41 = vadd.f32 %v5736_v39, %v1953_v28  ;;  %v2044_v52 = vpop.f32.mrb[25].mxu1 }
 0x8a6   : > { %v2045_v42 = vadd.f32 %v2044_v52, %v1953_v28 }
 0x8a7   : > { %v2084_v26 = vadd.f32 %v2050_v41, %v6749_v32 }
 0x8a8   : > { %v2083_v33 = vadd.f32 %v2045_v42, %v6751_v34 }
 0x8a9   : > { %v7214_v7 = vmul.f32 %v2084_v26, %v7138_v20 }
 0x8aa   : > { %v7217_v6 = vmul.f32 %v2083_v33, %v7125_v35 }
 0x8ab   : > { %2154 = vrot.lane.b32.xlu1 %v7214_v7, %s6592_s17  ;;  %v2136_v27 = vrot.slane %v7214_v7, 2 }
 0x8ac   : > { %v5739_v53 = vpop.f32.mrb[26].mxu1  ;;  %v2135_v32 = vrot.slane %v7217_v6, 2  ;;  %v2110_v0 = vrot.slane %v7217_v6, 6 }
 0x8ad   : > { %v2060_v44 = vadd.f32 %v5739_v53, %v1953_v28  ;;  %v2054_v61 = vpop.f32.mrb[27].mxu1  ;;  %v2111_v53 = vrot.slane %v7214_v7, 6 }
 0x8ae   : > { %v2055_v34 = vadd.f32 %v2054_v61, %v1953_v28  ;;  %v2137_v58 = vsel %vm2134_vm8, %v2135_v32, %v2136_v27  ;;  %v2133_v26 = vsel %vm2109_vm9, 0.0, %v2110_v0 }
 0x8af   : > { %v2086_v59 = vadd.f32 %v2060_v44, %v6757_v38  ;;  %2152 = vrot.lane.b32.xlu1 %v7217_v6, %s6592_s17  ;;  %2177 = vrot.lane.b32.xlu0 %v2137_v58, %s8096_s20 }
 0x8b0   : > { %v2085_v19 = vadd.f32 %v2055_v34, %v6759_v40  ;;  %v5742_v2 = vpop.f32.mrb[28].mxu1  ;;  %v2112_v34 = vsel %vm2109_vm9, %v2110_v0, %v2111_v53 }
 0x8b1   : > { %v7230_v14 = vmul.f32 %v2086_v59, %v7129_v12  ;;  %v2070_v17 = vadd.f32 %v5742_v2, %v1953_v28  ;;  %v2064_v47 = vpop.f32.mrb[29].mxu1 }
 0x8b2   : > { %v7233_v4 = vmul.f32 %v2085_v19, %v7127_v11  ;;  %v2065_v5 = vadd.f32 %v2064_v47, %v1953_v28 }
 0x8b3   : > { %v2088_v24 = vadd.f32 %v2070_v17, %v6771_v46  ;;  %2158 = vrot.lane.b32.xlu1 %v7230_v14, %s6592_s17  ;;  %v2140_v38 = vrot.slane %v7230_v14, 2 }
 0x8b4   : > { %v2087_v25 = vadd.f32 %v2065_v5, %v6774_v50  ;;  %v5745_v40 = vpop.f32.mrb[30].mxu1  ;;  %2156 = vrot.lane.b32.xlu0 %v7233_v4, %s6592_s17  ;;  %v2138_v8 = vrot.slane %v7233_v4, 2  ;;  %v2113_v32 = vrot.slane %v7233_v4, 6 }
 0x8b5   : > { %v2074_v10 = vpop.f32.mrb[31].mxu1  ;;  %v7249_v55 = vmul.f32 %v2088_v24, %v7142_v3  ;;  %v2080_v21 = vadd.f32 %v5745_v40, %v1953_v28  ;;  %v2115_v24 = vrot.slane %v7230_v14, 6 }
 0x8b6   : > { %v7244_v36 = vmul.f32 %v2087_v25, %v7136_v1  ;;  %v2075_v37 = vadd.f32 %v2074_v10, %v1953_v28  ;;  %v2139_v46 = vsel %vm2134_vm8, %v2136_v27, %v2138_v8  ;;  %v2141_v18 = vsel %vm2134_vm8, %v2138_v8, %v2140_v38 }
 0x8b7   : > { %2179 = vrot.lane.b32.xlu1 %v2139_v46, %s8096_s20  ;;  %v2090_v22 = vadd.f32 %v2080_v21, %v6785_v54  ;;  %v2144_v23 = vrot.slane %v7249_v55, 2  ;;  %v2114_v59 = vsel %vm2109_vm9, %v2111_v53, %v2113_v32  ;;  %v2116_v8 = vsel %vm2109_vm9, %v2113_v32, %v2115_v24  ;;  %v5066_v32 = vld [vmem:[%s8085_s7 + $0x20] sm:$0xff] }
 0x8b8   : > { %2181 = vrot.lane.b32.xlu0 %v2141_v18, %s8096_s20  ;;  %v2089_v50 = vadd.f32 %v2075_v37, %v6788_v56  ;;  %v2142_v60 = vrot.slane %v7244_v36, 2 }
 0x8b9   : > { %v7266_v62 = vmul.f32 %v2090_v22, %v7158_v9  ;;  %v2119_v22 = vrot.slane %v7249_v55, 6 }
 0x8ba   : > { %v7262_v28 = vmul.f32 %v2089_v50, %v7149_v16  ;;  %v2143_v30 = vsel %vm2134_vm8, %v2140_v38, %v2142_v60  ;;  %v2145_v54 = vsel %vm2134_vm8, %v2142_v60, %v2144_v23  ;;  %v2117_v38 = vrot.slane %v7244_v36, 6 }
 0x8bb   : > { %2162 = vrot.lane.b32.xlu1 %v7249_v55, %s6592_s17  ;;  %v2148_v31 = vrot.slane %v7266_v62, 2 }
 0x8bc   : > { %2160 = vrot.lane.b32.xlu0 %v7244_v36, %s6592_s17  ;;  %v2146_v56 = vrot.slane %v7262_v28, 2  ;;  %v2118_v37 = vsel %vm2109_vm9, %v2115_v24, %v2117_v38 }
 0x8bd   : > { %v2151_v52 = vsel %vm2134_vm8, %v2148_v31, 0.0 }
 0x8be   : > { %v2147_v39 = vsel %vm2134_vm8, %v2144_v23, %v2146_v56  ;;  %v2149_v41 = vsel %vm2134_vm8, %v2146_v56, %v2148_v31  ;;  %v2121_v23 = vrot.slane %v7262_v28, 6  ;;  %v2120_v56 = vsel %vm2109_vm9, %v2117_v38, %v2119_v22 }
 0x8bf   : > { %2183 = vrot.lane.b32.xlu1 %v2143_v30, %s8096_s20  ;;  %v2123_v31 = vrot.slane %v7266_v62, 6 }
 0x8c0   : > { %2185 = vrot.lane.b32.xlu0 %v2145_v54, %s8096_s20 }
 0x8c3   : > { %2166 = vrot.lane.b32.xlu1 %v7266_v62, %s6592_s17 }
 0x8c4   : > { %2164 = vrot.lane.b32.xlu0 %v7262_v28, %s6592_s17 }
 0x8c7   : > { %2187 = vrot.lane.b32.xlu1 %v2147_v39, %s8096_s20 }
 0x8c8   : > { %2189 = vrot.lane.b32.xlu0 %v2149_v41, %s8096_s20  ;;  %v2122_v41 = vsel %vm2109_vm9, %v2119_v22, %v2121_v23 }
 0x8cb   : > { %2191 = vrot.lane.b32.xlu1 %v2151_v52, %s8096_s20  ;;  %s8011_s20 = scalar_lea.vmem %s8093_s15, %s6696_s26 }
 0x91d   : > { %v2155_v42 = vpop.permute.xlu1 %2154 }
 0x91e   : > { %v2202_v58 = vsel %vm831_vm4, %v2112_v34, %v2155_v42 }
 0x921   : > { %v2153_v43 = vpop.permute.xlu1 %2152  ;;  %v2178_v49 = vpop.permute.xlu0 %2177 }
 0x922   : > { %v2201_v33 = vsel %vm831_vm4, %v2133_v26, %v2153_v43 }
 0x923   : > { %v2209_v27 = vsel %vm840_vm3, %v2201_v33, %v2178_v49  ;;  %v2124_v49 = vsel %vm2109_vm9, %v2121_v23, %v2123_v31 }
 0x924   : > { %5770 = vmatprep.mubr.msk.f32.mxu0 %vm865_vm5, %v2209_v27 }
 0x925   : > { %v2159_v44 = vpop.permute.xlu1 %2158 }
 0x926   : > { %v2157_v61 = vpop.permute.xlu0 %2156  ;;  %v2204_v10 = vsel %vm831_vm4, %v2116_v8, %v2159_v44  ;;  %v5067_v44 = vld [vmem:[%s8085_s7 + $0x28] sm:$0xff] }
 0x927   : > { %v2203_v2 = vsel %vm831_vm4, %v2114_v59, %v2157_v61  ;;  %v5068_v61 = vld [vmem:[%s8085_s7 + $0x30] sm:$0xff]  ;;  %v6222_v34 = vpack.c.bf16 %v5067_v44, %v5066_v32 }
 0x929   : > { %v2180_v19 = vpop.permute.xlu1 %2179  ;;  %6223 = vmatprep.subr.bf16.mxu1 %v6222_v34 }
 0x92a   : > { %v2210_v17 = vsel %vm840_vm3, %v2202_v58, %v2180_v19  ;;  %v2182_v47 = vpop.permute.xlu0 %2181  ;;  %v5069_v58 = vld [vmem:[%s8085_s7 + $0x38] sm:$0xff]  ;;  %6225 = vmatpush3.bf16.msra.mxu1 %v6222_v34  ;;  %v7338_v19 = vld [vmem:[%s8089_s11 + $0x8] sm:$0xff] }
 0x92b   : > { %v2211_v5 = vsel %vm840_vm3, %v2203_v2, %v2182_v47  ;;  %5771 = vmatmul.mubr.msk.f32.vlgmr.msra.gmra.mrb[32].mxu0 %vm865_vm5, %v2210_v17  ;;  %v6226_v59 = vpack.c.bf16 %v5069_v58, %v5068_v61  ;;  %v2233_v2 = vrot.slane %v7338_v19, %v6860_v63 }
 0x92c   : > { %5773 = vmatprep.mubr.msk.f32.mxu0 %vm865_vm5, %v2211_v5 }
 0x92d   : > { %v2163_v25 = vpop.permute.xlu1 %2162  ;;  %6227 = vmatprep.subr.bf16.mxu1 %v6226_v59 }
 0x92e   : > { %v2161_v40 = vpop.permute.xlu0 %2160  ;;  %v2206_v39 = vsel %vm831_vm4, %v2120_v56, %v2163_v25  ;;  %6229 = vmatpush3.bf16.msra.mxu1 %v6226_v59 }
 0x92f   : > { %v2205_v18 = vsel %vm831_vm4, %v2118_v37, %v2161_v40 }
 0x931   : > { %v2184_v46 = vpop.permute.xlu1 %2183 }
 0x932   : > { %v2212_v21 = vsel %vm840_vm3, %v2204_v10, %v2184_v46  ;;  %v2186_v50 = vpop.permute.xlu0 %2185 }
 0x933   : > { %v2213_v60 = vsel %vm840_vm3, %v2205_v18, %v2186_v50  ;;  %5774 = vmatmul.mubr.msk.f32.gmra.mrb[34].mxu0 %vm865_vm5, %v2212_v21 }
 0x934   : > { %5776 = vmatprep.mubr.msk.f32.mxu0 %vm865_vm5, %v2213_v60 }
 0x935   : > { %v2167_v30 = vpop.permute.xlu1 %2166 }
 0x936   : > { %v2165_v54 = vpop.permute.xlu0 %2164  ;;  %v2208_v33 = vsel %vm831_vm4, %v2124_v49, %v2167_v30 }
 0x937   : > { %v2207_v42 = vsel %vm831_vm4, %v2122_v41, %v2165_v54 }
 0x939   : > { %v2188_v52 = vpop.permute.xlu1 %2187 }
 0x93a   : > { %v2214_v0 = vsel %vm840_vm3, %v2206_v39, %v2188_v52  ;;  %v2190_v43 = vpop.permute.xlu0 %2189 }
 0x93b   : > { %v2215_v26 = vsel %vm840_vm3, %v2207_v42, %v2190_v43  ;;  %5777 = vmatmul.mubr.msk.f32.gmra.mrb[36].mxu0 %vm865_vm5, %v2214_v0 }
 0x93c   : > { %5779 = vmatprep.mubr.msk.f32.mxu0 %vm865_vm5, %v2215_v26 }
 0x93d   : > { %v2192_v27 = vpop.permute.xlu1 %2191 }
 0x93e   : > { %v2216_v53 = vsel %vm840_vm3, %v2208_v33, %v2192_v27 }
 0x93f   : > { %5780 = vmatmul.mubr.msk.f32.gmra.mrb[38].mxu0 %vm865_vm5, %v2216_v53 }
 0x9fe   : > { %v5772_v17 = vpop.f32.mrb[32].mxu0 }
 0x9ff   : > { %v2324_v47 = vpop.f32.mrb[33].mxu0  ;;  %v2330_v5 = vadd.f32 %v5772_v17, %v2233_v2 }
 0xa00   : > { %v2325_v24 = vadd.f32 %v2324_v47, %v2233_v2 }
 0xa01   : > { %v7342_v38 = vmax.f32 %v2330_v5, 0.0 }
 0xa02   : > { %v7344_v25 = vmax.f32 %v2325_v24, 0.0 }
 0xa03   : > { %v2372_v37 = vsel %vm831_vm4, %v7342_v38, 0.0 }
 0xa04   : > { %v2371_v46 = vsel %vm831_vm4, %v7344_v25, 0.0 }
 0xa05   : > { %v2373_v60 = vadd.f32 %v2372_v37, %v2371_v46 }
 0xa06   : > { %v5775_v40 = vpop.f32.mrb[34].mxu0 }
 0xa07   : > { %v2334_v8 = vpop.f32.mrb[35].mxu0  ;;  %v2340_v18 = vadd.f32 %v5775_v40, %v2233_v2 }
 0xa08   : > { %v2335_v10 = vadd.f32 %v2334_v8, %v2233_v2 }
 0xa09   : > { %v7354_v22 = vmax.f32 %v2340_v18, 0.0 }
 0xa0a   : > { %v7350_v21 = vmax.f32 %v2335_v10, 0.0 }
 0xa0b   : > { %v2376_v39 = vsel %vm831_vm4, %v7354_v22, 0.0 }
 0xa0c   : > { %v2374_v50 = vsel %vm831_vm4, %v7350_v21, 0.0 }
 0xa0d   : > { %v2375_v30 = vadd.f32 %v2374_v50, %v2373_v60 }
 0xa0e   : > { %v5778_v23 = vpop.f32.mrb[36].mxu0 }
 0xa0f   : > { %v2350_v54 = vadd.f32 %v5778_v23, %v2233_v2  ;;  %v2344_v56 = vpop.f32.mrb[37].mxu0  ;;  %v2377_v0 = vadd.f32 %v2376_v39, %v2375_v30 }
 0xa10   : > { %v2345_v31 = vadd.f32 %v2344_v56, %v2233_v2 }
 0xa11   : > { %v7358_v41 = vmax.f32 %v2350_v54, 0.0 }
 0xa12   : > { %v7360_v52 = vmax.f32 %v2345_v31, 0.0  ;;  %v5781_v42 = vpop.f32.mrb[38].mxu0 }
 0xa13   : > { %v2360_v43 = vadd.f32 %v5781_v42, %v2233_v2  ;;  %v2354_v26 = vpop.f32.mrb[39].mxu0  ;;  %v2380_v53 = vsel %vm831_vm4, %v7358_v41, 0.0 }
 0xa14   : > { %v2378_v49 = vsel %vm831_vm4, %v7360_v52, 0.0  ;;  %v2355_v33 = vadd.f32 %v2354_v26, %v2233_v2 }
 0xa15   : > { %v2379_v27 = vadd.f32 %v2378_v49, %v2377_v0  ;;  %v7366_v32 = vmax.f32 %v2360_v43, 0.0 }
 0xa16   : > { %v7368_v44 = vmax.f32 %v2355_v33, 0.0 }
 0xa17   : > { %v2381_v61 = vadd.f32 %v2380_v53, %v2379_v27  ;;  %v2384_v59 = vsel %vm831_vm4, %v7366_v32, 0.0 }
 0xa18   : > { %v2382_v34 = vsel %vm831_vm4, %v7368_v44, 0.0 }
 0xa19   : > { %v2383_v58 = vadd.f32 %v2382_v34, %v2381_v61 }
 0xa1b   : > { %v2385_v17 = vadd.f32 %v2384_v59, %v2383_v58 }
 0xa1d   : > { %v2386_v47 = vrot.slane %v2385_v17, 4 }
 0xa1f   : > { %v2387_v5 = vadd.f32 %v2386_v47, %v2385_v17 }
 0xa21   : > { %v2388_v2 = vrot.slane %v2387_v5, 2 }
 0xa23   : > { %v2389_v24 = vadd.f32 %v2388_v2, %v2387_v5 }
 0xa25   : > { %v2390_v40 = vrot.slane %v2389_v24, 1 }
 0xa27   : > { %v2391_v8 = vadd.f32 %v2390_v40, %v2389_v24 }
 0xa29   : > { %v2392_v10 = vmul.f32 0.015625, %v2391_v8 }
 0xa2b   : > { %v2393_v37 = vsub.f32 %v7344_v25, %v2392_v10  ;;  %v2394_v46 = vsub.f32 %v7342_v38, %v2392_v10  ;;  %v2395_v18 = vsub.f32 %v7350_v21, %v2392_v10  ;;  %v2396_v50 = vsub.f32 %v7354_v22, %v2392_v10 }
 0xa2c   : > { %v2397_v60 = vsub.f32 %v7360_v52, %v2392_v10  ;;  %v2398_v56 = vsub.f32 %v7358_v41, %v2392_v10  ;;  %v2399_v43 = vsub.f32 %v7368_v44, %v2392_v10  ;;  %v2400_v27 = vsub.f32 %v7366_v32, %v2392_v10 }
 0xa2d   : > { %v2401_v23 = vmul.f32 %v2393_v37, %v2393_v37  ;;  %v2402_v30 = vmul.f32 %v2394_v46, %v2394_v46  ;;  %v2403_v54 = vmul.f32 %v2395_v18, %v2395_v18  ;;  %v2404_v31 = vmul.f32 %v2396_v50, %v2396_v50 }
 0xa2e   : > { %v2405_v26 = vmul.f32 %v2397_v60, %v2397_v60  ;;  %v2406_v53 = vmul.f32 %v2398_v56, %v2398_v56  ;;  %v2407_v58 = vmul.f32 %v2399_v43, %v2399_v43  ;;  %v2408_v47 = vmul.f32 %v2400_v27, %v2400_v27 }
 0xa2f   : > { %v2409_v39 = vsel %vm831_vm4, %v2401_v23, 0.0  ;;  %v2410_v42 = vsel %vm831_vm4, %v2402_v30, 0.0  ;;  %v2412_v49 = vsel %vm831_vm4, %v2403_v54, 0.0  ;;  %v2414_v61 = vsel %vm831_vm4, %v2404_v31, 0.0 }
 0xa30   : > { %v2411_v0 = vadd.f32 %v2410_v42, %v2409_v39  ;;  %v2416_v59 = vsel %vm831_vm4, %v2405_v26, 0.0  ;;  %v2418_v5 = vsel %vm831_vm4, %v2406_v53, 0.0  ;;  %v2420_v24 = vsel %vm831_vm4, %v2407_v58, 0.0 }
 0xa31   : > { %v2422_v8 = vsel %vm831_vm4, %v2408_v47, 0.0 }
 0xa32   : > { %v2413_v33 = vadd.f32 %v2412_v49, %v2411_v0 }
 0xa34   : > { %v2415_v34 = vadd.f32 %v2414_v61, %v2413_v33 }
 0xa36   : > { %v2417_v17 = vadd.f32 %v2416_v59, %v2415_v34 }
 0xa38   : > { %v2419_v2 = vadd.f32 %v2418_v5, %v2417_v17 }
 0xa3a   : > { %v2421_v40 = vadd.f32 %v2420_v24, %v2419_v2 }
 0xa3c   : > { %v2423_v23 = vadd.f32 %v2422_v8, %v2421_v40 }
 0xa3e   : > { %v2424_v30 = vrot.slane %v2423_v23, 4 }
 0xa40   : > { %v2425_v10 = vadd.f32 %v2424_v30, %v2423_v23 }
 0xa42   : > { %v2426_v54 = vrot.slane %v2425_v10, 2 }
 0xa44   : > { %v2427_v39 = vadd.f32 %v2426_v54, %v2425_v10 }
 0xa46   : > { %v2428_v31 = vrot.slane %v2427_v39, 1 }
 0xa48   : > { %v2429_v42 = vadd.f32 %v2428_v31, %v2427_v39 }
 0xa4a   : > { %v2430_v0 = vmul.f32 0.015625, %v2429_v42 }
 0xa4c   : > { %v2431_v49 = vadd.f32 1e-05, %v2430_v0 }
 0xa4e   : > { %6500 = vrsqrt.f32 %v2431_v49 }
 0xa58   : > { %v6501_v26 = vpop.eup %6500 }
 0xa59   : > { %v2433_v33 = vmul.f32 %v6501_v26, %v2393_v37  ;;  %v2434_v53 = vmul.f32 %v6501_v26, %v2394_v46  ;;  %v2435_v61 = vmul.f32 %v6501_v26, %v2395_v18  ;;  %v2436_v34 = vmul.f32 %v6501_v26, %v2396_v50  ;;  %v6568_v46 = vld [vmem:[%s6977_s16] sm:$0xff] }
 0xa5a   : > { %v2437_v58 = vmul.f32 %v6501_v26, %v2397_v60  ;;  %v2438_v59 = vmul.f32 %v6501_v26, %v2398_v56  ;;  %v2439_v17 = vmul.f32 %v6501_v26, %v2399_v43  ;;  %v2440_v37 = vmul.f32 %v6501_v26, %v2400_v27 }
 0xa5b   : > { %5790 = vmatprep.mubr.msk.f32.mxu1 %vm831_vm4, %v2433_v33  ;;  %v2449_v18 = vrot.slane %v7338_v19, %v6926_v57 }
 0xa5c   : > { %5791 = vmatmul.mubr.msk.f32.vlgmr.msra.gmra.mrb[32].mxu1 %vm831_vm4, %v2434_v53 }
 0xa5d   : > { %5793 = vmatprep.mubr.msk.f32.mxu1 %vm831_vm4, %v2435_v61 }
 0xa60   : > { %5794 = vmatmul.mubr.msk.f32.gmra.mrb[34].mxu1 %vm831_vm4, %v2436_v34 }
 0xa61   : > { %5796 = vmatprep.mubr.msk.f32.mxu1 %vm831_vm4, %v2437_v58 }
 0xa64   : > { %5797 = vmatmul.mubr.msk.f32.gmra.mrb[36].mxu1 %vm831_vm4, %v2438_v59 }
 0xa65   : > { %5799 = vmatprep.mubr.msk.f32.mxu1 %vm831_vm4, %v2439_v17 }
 0xa68   : > { %5800 = vmatmul.mubr.msk.f32.gmra.mrb[38].mxu1 %vm831_vm4, %v2440_v37 }
 0xa69   : > { %5810 = vmatprep.mubr.msk.f32.mxu1 %vm831_vm4, %v6568_v46 }
 0xb2f   : > { %v5792_v50 = vpop.f32.mrb[32].mxu1 }
 0xb30   : > { %v2546_v60 = vadd.f32 %v5792_v50, %v2449_v18  ;;  %v2540_v47 = vpop.f32.mrb[33].mxu1 }
 0xb31   : > { %v2541_v5 = vadd.f32 %v2540_v47, %v2449_v18 }
 0xb33   : > { %v6424_v2 = vpack.i.bf16 %v2546_v60, %v2541_v5  ;;  %v5795_v56 = vpop.f32.mrb[34].mxu1  ;;  %5838 = vmatprep.mubr.msk.f32.mxu0 %vm1378_vm6, %v2541_v5 }
 0xb34   : > { %v2556_v43 = vadd.f32 %v5795_v56, %v2449_v18  ;;  %v2550_v24 = vpop.f32.mrb[35].mxu1 }
 0xb35   : > { %v2551_v40 = vadd.f32 %v2550_v24, %v2449_v18  ;;  %6425 = vrot.lane.b32.xlu0 %v6424_v2, %s8100_s21  ;;  %v5078_v24 = vld [vmem:[%s8086_s8 + $0x20] sm:$0xff] }
 0xb37   : > { %v6429_v27 = vpack.i.bf16 %v2556_v43, %v2551_v40  ;;  %v5798_v8 = vpop.f32.mrb[36].mxu1 }
 0xb38   : > { %v2566_v23 = vadd.f32 %v5798_v8, %v2449_v18  ;;  %v2560_v30 = vpop.f32.mrb[37].mxu1 }
 0xb39   : > { %v2561_v10 = vadd.f32 %v2560_v30, %v2449_v18  ;;  %6430 = vrot.lane.b32.xlu1 %v6429_v27, %s8100_s21  ;;  %v5081_v27 = vld [vmem:[%s8086_s8 + $0x38] sm:$0xff]  ;;  %v6570_v30 = vld [vmem:[%s6977_s16 + $0x10] sm:$0xff] }
 0xb3b   : > { %v6434_v54 = vpack.i.bf16 %v2566_v23, %v2561_v10  ;;  %v5801_v39 = vpop.f32.mrb[38].mxu1 }
 0xb3c   : > { %v2576_v31 = vadd.f32 %v5801_v39, %v2449_v18  ;;  %v2570_v42 = vpop.f32.mrb[39].mxu1  ;;  %v6573_v39 = vld [vmem:[%s6977_s16 + $0x28] sm:$0xff] }
 0xb3d   : > { %v2571_v0 = vadd.f32 %v2570_v42, %v2449_v18  ;;  %6435 = vrot.lane.b32.xlu0 %v6434_v54, %s8100_s21  ;;  %v6572_v54 = vld [vmem:[%s6977_s16 + $0x20] sm:$0xff]  ;;  %v6575_v42 = vld [vmem:[%s6977_s16 + $0x38] sm:$0xff] }
 0xb3f   : > { %v6439_v49 = vpack.i.bf16 %v2576_v31, %v2571_v0 }
 0xb41   : > { %6440 = vrot.lane.b32.xlu1 %v6439_v49, %s8100_s21 }
 0xba7   : > { %v6426_v26 = vpop.permute.xlu0 %6425 }
 0xba8   : > { %v6428_v33 = vunpack.i.h.bf16 %v6426_v26  ;;  %v6427_v53 = vunpack.i.l.bf16 %v6426_v26 }
 0xbaa   : > { %v6238_v61 = vpack.c.bf16 %v6428_v33, %v6427_v53 }
 0xbab   : > { %v6431_v34 = vpop.permute.xlu1 %6430 }
 0xbac   : > { %v6433_v58 = vunpack.i.h.bf16 %v6431_v34  ;;  %v6432_v59 = vunpack.i.l.bf16 %v6431_v34  ;;  %6240 = vmatprep.subr.msk.bf16.mxu0 %vm6937_vm7, %v6238_v61 }
 0xbad   : > { %6243 = vmatpush3.bf16.xpose.msk.msra.mxu0 %vm6937_vm7, %v6238_v61 }
 0xbae   : > { %v6244_v17 = vpack.c.bf16 %v6433_v58, %v6432_v59 }
 0xbaf   : > { %v6436_v37 = vpop.permute.xlu0 %6435 }
 0xbb0   : > { %v6438_v46 = vunpack.i.h.bf16 %v6436_v37  ;;  %v6437_v18 = vunpack.i.l.bf16 %v6436_v37  ;;  %6246 = vmatprep.subr.msk.bf16.mxu0 %vm6937_vm7, %v6244_v17 }
 0xbb2   : > { %v6250_v50 = vpack.c.bf16 %v6438_v46, %v6437_v18 }
 0xbb3   : > { %v6441_v47 = vpop.permute.xlu1 %6440 }
 0xbb4   : > { %v6443_v5 = vunpack.i.h.bf16 %v6441_v47  ;;  %v6442_v2 = vunpack.i.l.bf16 %v6441_v47 }
 0xbb5   : > { %6249 = vmatpush3.bf16.xpose.msk.msra.mxu0 %vm6937_vm7, %v6244_v17 }
 0xbb6   : > { %6252 = vmatprep.subr.msk.bf16.mxu0 %vm6937_vm7, %v6250_v50  ;;  %v6256_v56 = vpack.c.bf16 %v6443_v5, %v6442_v2 }
 0xbbd   : > { %6255 = vmatpush3.bf16.xpose.msk.msra.mxu0 %vm6937_vm7, %v6250_v50 }
 0xbbe   : > { %6258 = vmatprep.subr.msk.bf16.mxu0 %vm6937_vm7, %v6256_v56 }
 0xbc5   : > { %6261 = vmatpush3.bf16.xpose.msk.msra.mxu0 %vm6937_vm7, %v6256_v56 }
 0xbcc   : > { %5839 = vmatmul.mubr.msk.f32.vlgmr.msra.gmra.mrb[40].mxu0 %vm1378_vm6, %v2546_v60  ;;  %v5079_v60 = vld [vmem:[%s8086_s8 + $0x28] sm:$0xff] }
 0xbcd   : > { %5841 = vmatprep.mubr.msk.f32.mxu0 %vm1378_vm6, %v2551_v40  ;;  %v6230_v40 = vpack.c.bf16 %v5079_v60, %v5078_v24 }
 0xbcf   : > { %6231 = vmatprep.subr.bf16.mxu1 %v6230_v40 }
 0xbd0   : > { %5842 = vmatmul.mubr.msk.f32.gmra.mrb[42].mxu0 %vm1378_vm6, %v2556_v43  ;;  %v5080_v43 = vld [vmem:[%s8086_s8 + $0x30] sm:$0xff]  ;;  %6233 = vmatpush3.bf16.msra.mxu1 %v6230_v40 }
 0xbd1   : > { %5844 = vmatprep.mubr.msk.f32.mxu0 %vm1378_vm6, %v2561_v10  ;;  %v6234_v8 = vpack.c.bf16 %v5081_v27, %v5080_v43  ;;  %v6571_v10 = vld [vmem:[%s6977_s16 + $0x18] sm:$0xff] }
 0xbd3   : > { %6235 = vmatprep.subr.bf16.mxu1 %v6234_v8 }
 0xbd4   : > { %5845 = vmatmul.mubr.msk.f32.gmra.mrb[44].mxu0 %vm1378_vm6, %v2566_v23  ;;  %6237 = vmatpush3.bf16.msra.mxu1 %v6234_v8  ;;  %v6569_v23 = vld [vmem:[%s6977_s16 + $0x8] sm:$0xff] }
 0xbd5   : > { %5847 = vmatprep.mubr.msk.f32.mxu0 %vm1378_vm6, %v2571_v0 }
 0xbd7   : > { %5811 = vmatmul.mubr.msk.f32.vlgmr.msra.gmra.mrb[40].mxu1 %vm831_vm4, %v6569_v23  ;;  %v7474_v23 = vrot.slane %v7338_v19, %v7025_v51 }
 0xbd8   : > { %5848 = vmatmul.mubr.msk.f32.gmra.mrb[46].mxu0 %vm1378_vm6, %v2576_v31  ;;  %5813 = vmatprep.mubr.msk.f32.mxu1 %vm831_vm4, %v6570_v30  ;;  %v6574_v31 = vld [vmem:[%s6977_s16 + $0x30] sm:$0xff] }
 0xbdb   : > { %5814 = vmatmul.mubr.msk.f32.gmra.mrb[42].mxu1 %vm831_vm4, %v6571_v10 }
 0xbdc   : > { %5816 = vmatprep.mubr.msk.f32.mxu1 %vm831_vm4, %v6572_v54 }
 0xbdf   : > { %5817 = vmatmul.mubr.msk.f32.gmra.mrb[44].mxu1 %vm831_vm4, %v6573_v39 }
 0xbe0   : > { %5819 = vmatprep.mubr.msk.f32.mxu1 %vm831_vm4, %v6574_v31 }
 0xbe3   : > { %5820 = vmatmul.mubr.msk.f32.gmra.mrb[46].mxu1 %vm831_vm4, %v6575_v42 }
 0xc9f   : > { %v5840_v0 = vpop.f32.mrb[40].mxu0 }
 0xca0   : > { %v2821_v49 = vadd.f32 %v5840_v0, %v7006_v13  ;;  %v2815_v26 = vpop.f32.mrb[41].mxu0 }
 0xca1   : > { %v2816_v33 = vadd.f32 %v2815_v26, %v7006_v13 }
 0xca2   : > { %v2857_v53 = vsel %vm840_vm3, %v2821_v49, -inf }
 0xca3   : > { %2858 = vmax.xlane.f32.xlu1 %v2857_v53  ;;  %v5843_v61 = vpop.f32.mrb[42].mxu0  ;;  %v2854_v34 = vsel %vm840_vm3, %v2816_v33, -inf }
 0xca4   : > { %v2825_v58 = vpop.f32.mrb[43].mxu0  ;;  %2855 = vmax.xlane.f32.xlu0 %v2854_v34  ;;  %v2831_v17 = vadd.f32 %v5843_v61, %v7006_v13 }
 0xca5   : > { %v2826_v59 = vadd.f32 %v2825_v58, %v7006_v13 }
 0xca6   : > { %v2863_v56 = vsel %vm840_vm3, %v2831_v17, -inf }
 0xca7   : > { %v5846_v37 = vpop.f32.mrb[44].mxu0  ;;  %v2860_v46 = vsel %vm840_vm3, %v2826_v59, -inf }
 0xca8   : > { %v2835_v18 = vpop.f32.mrb[45].mxu0  ;;  %2861 = vmax.xlane.f32.xlu0 %v2860_v46  ;;  %v2841_v47 = vadd.f32 %v5846_v37, %v7006_v13 }
 0xca9   : > { %v2836_v50 = vadd.f32 %v2835_v18, %v7006_v13 }
 0xcaa   : > { %v2869_v27 = vsel %vm840_vm3, %v2841_v47, -inf  ;;  %v5812_v30 = vpop.f32.mrb[40].mxu1 }
 0xcab   : > { %v5849_v5 = vpop.f32.mrb[46].mxu0  ;;  %v2866_v2 = vsel %vm840_vm3, %v2836_v50, -inf  ;;  %v2660_v10 = vadd.f32 %v5812_v30, %v7474_v23  ;;  %v2654_v54 = vpop.f32.mrb[41].mxu1 }
 0xcac   : > { %v2845_v24 = vpop.f32.mrb[47].mxu0  ;;  %2867 = vmax.xlane.f32.xlu1 %v2866_v2  ;;  %2864 = vmax.xlane.f32.xlu0 %v2863_v56  ;;  %v2851_v43 = vadd.f32 %v5849_v5, %v7006_v13  ;;  %v2655_v39 = vadd.f32 %v2654_v54, %v7474_v23 }
 0xcad   : > { %v2846_v60 = vadd.f32 %v2845_v24, %v7006_v13 }
 0xcae   : > { %v2875_v8 = vsel %vm840_vm3, %v2851_v43, -inf  ;;  %v6262_v31 = vpack.c.bf16 %v2660_v10, %v2655_v39  ;;  %v5815_v42 = vpop.f32.mrb[42].mxu1 }
 0xcaf   : > { %v2872_v40 = vsel %vm840_vm3, %v2846_v60, -inf  ;;  %v2670_v0 = vadd.f32 %v5815_v42, %v7474_v23  ;;  %v2664_v26 = vpop.f32.mrb[43].mxu1 }
 0xcb0   : > { %2873 = vmax.xlane.f32.xlu1 %v2872_v40  ;;  %2870 = vmax.xlane.f32.xlu0 %v2869_v27  ;;  %v2665_v53 = vadd.f32 %v2664_v26, %v7474_v23 }
 0xcb1   : > { %6263 = vmatprep.subr.bf16.mxu1 %v6262_v31 }
 0xcb2   : > { %6265 = vmatpush3.bf16.msra.mxu1 %v6262_v31  ;;  %v6266_v61 = vpack.c.bf16 %v2670_v0, %v2665_v53 }
 0xcb4   : > { %2876 = vmax.xlane.f32.xlu0 %v2875_v8  ;;  %6267 = vmatprep.subr.bf16.mxu1 %v6266_v61 }
 0xcb6   : > { %6269 = vmatpush3.bf16.msra.mxu1 %v6266_v61 }
 0xd30   : > { %v2859_v34 = vpop.xlane.xlu1 %2858 }
 0xd31   : > { %v2879_v58 = vsub.f32 %v2821_v49, %v2859_v34  ;;  %v2856_v37 = vpop.xlane.xlu0 %2855 }
 0xd32   : > { %v2878_v46 = vsub.f32 %v2816_v33, %v2856_v37 }
 0xd33   : > { %v2888_v18 = vmul.f32 1.442695, %v2879_v58 }
 0xd34   : > { %v2886_v5 = vmul.f32 1.442695, %v2878_v46 }
 0xd35   : > { %6502 = vpow2.f32 %v2888_v18  ;;  %v2862_v2 = vpop.xlane.xlu0 %2861 }
 0xd36   : > { %6504 = vpow2.f32 %v2886_v5  ;;  %v2880_v56 = vsub.f32 %v2826_v59, %v2862_v2 }
 0xd38   : > { %v2890_v24 = vmul.f32 1.442695, %v2880_v56 }
 0xd39   : > { %v2868_v40 = vpop.xlane.xlu1 %2867  ;;  %v2865_v27 = vpop.xlane.xlu0 %2864 }
 0xd3a   : > { %6506 = vpow2.f32 %v2890_v24  ;;  %v2882_v8 = vsub.f32 %v2836_v50, %v2868_v40  ;;  %v2881_v30 = vsub.f32 %v2831_v17, %v2865_v27  ;;  %v5818_v27 = vpop.f32.mrb[44].mxu1 }
 0xd3c   : > { %v2894_v10 = vmul.f32 1.442695, %v2882_v8  ;;  %v2892_v54 = vmul.f32 1.442695, %v2881_v30  ;;  %v2674_v8 = vpop.f32.mrb[45].mxu1  ;;  %v2680_v30 = vadd.f32 %v5818_v27, %v7474_v23 }
 0xd3d   : > { %v2874_v39 = vpop.xlane.xlu1 %2873  ;;  %v2871_v31 = vpop.xlane.xlu0 %2870 }
 0xd3e   : > { %6508 = vpow2.f32 %v2894_v10  ;;  %v2884_v49 = vsub.f32 %v2846_v60, %v2874_v39  ;;  %v2883_v42 = vsub.f32 %v2841_v47, %v2871_v31  ;;  %v2675_v10 = vadd.f32 %v2674_v8, %v7474_v23  ;;  %v5821_v39 = vpop.f32.mrb[46].mxu1 }
 0xd3f   : > { %v7480_v33 = vpop.eup %6502  ;;  %6510 = vpow2.f32 %v2892_v54  ;;  %v2684_v31 = vpop.f32.mrb[47].mxu1 }
 0xd40   : > { %v7482_v0 = vpop.eup %6504  ;;  %v2898_v26 = vmul.f32 1.442695, %v2884_v49  ;;  %v2896_v59 = vmul.f32 1.442695, %v2883_v42  ;;  %v2905_v53 = vsel %vm840_vm3, %v7480_v33, 0.0  ;;  %v6270_v54 = vpack.c.bf16 %v2680_v30, %v2675_v10 }
 0xd41   : > { %2906 = vadd.xlane.f32.xlu0 %v2905_v53  ;;  %v2877_v50 = vpop.xlane.xlu0 %2876  ;;  %v2902_v17 = vsel %vm840_vm3, %v7482_v0, 0.0  ;;  %v2690_v49 = vadd.f32 %v5821_v39, %v7474_v23  ;;  %v2685_v42 = vadd.f32 %v2684_v31, %v7474_v23  ;;  %v5115_v53 = vld [vmem:[%s8087_s9 + $0x18] sm:$0xff] }
 0xd42   : > { %6512 = vpow2.f32 %v2898_v26  ;;  %v2885_v61 = vsub.f32 %v2851_v43, %v2877_v50  ;;  %2903 = vadd.xlane.f32.xlu1 %v2902_v17  ;;  %6271 = vmatprep.subr.bf16.mxu1 %v6270_v54 }
 0xd43   : > { %6514 = vpow2.f32 %v2896_v59  ;;  %6273 = vmatpush3.bf16.msra.mxu1 %v6270_v54  ;;  %v6274_v26 = vpack.c.bf16 %v2690_v49, %v2685_v42  ;;  %v5114_v59 = vld [vmem:[%s8087_s9 + $0x10] sm:$0xff] }
 0xd44   : > { %v6507_v47 = vpop.eup %6506  ;;  %v2900_v60 = vmul.f32 1.442695, %v2885_v61  ;;  %v6278_v50 = vpack.c.bf16 %v5115_v53, %v5114_v59 }
 0xd45   : > { %v2908_v34 = vsel %vm840_vm3, %v6507_v47, 0.0  ;;  %6275 = vmatprep.subr.bf16.mxu1 %v6274_v26 }
 0xd46   : > { %6516 = vpow2.f32 %v2900_v60  ;;  %2909 = vadd.xlane.f32.xlu1 %v2908_v34 }
 0xd47   : > { %6277 = vmatpush3.bf16.msra.mxu1 %v6274_v26 }
 0xd48   : > { %v7489_v58 = vpop.eup %6508  ;;  %6279 = vmatprep.subr.bf16.mxu1 %v6278_v50 }
 0xd49   : > { %v7491_v37 = vpop.eup %6510  ;;  %v2914_v46 = vsel %vm840_vm3, %v7489_v58, 0.0 }
 0xd4a   : > { %2915 = vadd.xlane.f32.xlu1 %v2914_v46  ;;  %v2911_v18 = vsel %vm840_vm3, %v7491_v37, 0.0 }
 0xd4b   : > { %2912 = vadd.xlane.f32.xlu0 %v2911_v18 }
 0xd4c   : > { %v7497_v43 = vpop.eup %6512 }
 0xd4d   : > { %v7499_v5 = vpop.eup %6514  ;;  %v2920_v2 = vsel %vm840_vm3, %v7497_v43, 0.0 }
 0xd4e   : > { %2921 = vadd.xlane.f32.xlu1 %v2920_v2  ;;  %v2917_v56 = vsel %vm840_vm3, %v7499_v5, 0.0 }
 0xd4f   : > { %2918 = vadd.xlane.f32.xlu0 %v2917_v56 }
 0xd50   : > { %v7505_v24 = vpop.eup %6516 }
 0xd51   : > { %v2923_v40 = vsel %vm840_vm3, %v7505_v24, 0.0 }
 0xd53   : > { %2924 = vadd.xlane.f32.xlu0 %v2923_v40 }
 0xdce   : > { %v2907_v17 = vpop.xlane.xlu0 %2906 }
 0xdcf   : > { %6518 = vrcp.f32 %v2907_v17  ;;  %v2904_v61 = vpop.xlane.xlu1 %2903 }
 0xdd0   : > { %6520 = vrcp.f32 %v2904_v61 }
 0xdd3   : > { %v2910_v23 = vpop.xlane.xlu1 %2909 }
 0xdd4   : > { %6522 = vrcp.f32 %v2910_v23 }
 0xdd7   : > { %v2916_v60 = vpop.xlane.xlu1 %2915 }
 0xdd8   : > { %6524 = vrcp.f32 %v2916_v60  ;;  %v2913_v34 = vpop.xlane.xlu0 %2912 }
 0xdd9   : > { %v6519_v46 = vpop.eup %6518  ;;  %6526 = vrcp.f32 %v2913_v34 }
 0xdda   : > { %v6521_v18 = vpop.eup %6520  ;;  %v2935_v2 = vmul.f32 %v6519_v46, %v7480_v33 }
 0xddb   : > { %v2922_v56 = vpop.xlane.xlu1 %2921  ;;  %v2934_v40 = vmul.f32 %v6521_v18, %v7482_v0 }
 0xddc   : > { %6528 = vrcp.f32 %v2922_v56  ;;  %v2919_v27 = vpop.xlane.xlu0 %2918  ;;  %v2943_v10 = vmul.f32 %v2935_v2, %v7076_v48 }
 0xddd   : > { %6530 = vrcp.f32 %v2919_v27  ;;  %v2942_v8 = vmul.f32 %v2934_v40, %v7076_v48 }
 0xdde   : > { %v6523_v30 = vpop.eup %6522 }
 0xddf   : > { %5866 = vmatprep.mubr.msk.f32.mxu1 %vm840_vm3, %v2942_v8  ;;  %v2936_v54 = vmul.f32 %v6523_v30, %v6507_v47 }
 0xde0   : > { %v2925_v39 = vpop.xlane.xlu0 %2924  ;;  %5867 = vmatmul.mubr.msk.f32.vlgmr.msra.gmra.mrb[48].mxu1 %vm840_vm3, %v2943_v10 }
 0xde1   : > { %6532 = vrcp.f32 %v2925_v39  ;;  %v2944_v33 = vmul.f32 %v2936_v54, %v7076_v48  ;;  %6281 = vmatpush3.bf16.msra.mxu1 %v6278_v50 }
 0xde2   : > { %v6525_v31 = vpop.eup %6524 }
 0xde3   : > { %v6527_v0 = vpop.eup %6526  ;;  %5869 = vmatprep.mubr.msk.f32.mxu1 %vm840_vm3, %v2944_v33  ;;  %v2938_v49 = vmul.f32 %v6525_v31, %v7489_v58 }
 0xde4   : > { %v2937_v42 = vmul.f32 %v6527_v0, %v7491_v37 }
 0xde5   : > { %v2946_v26 = vmul.f32 %v2938_v49, %v7076_v48 }
 0xde6   : > { %v6529_v59 = vpop.eup %6528  ;;  %v2945_v47 = vmul.f32 %v2937_v42, %v7076_v48  ;;  %v5126_v42 = vld [vmem:[%s8088_s10 + $0x30] sm:$0xff] }
 0xde7   : > { %v6531_v53 = vpop.eup %6530  ;;  %v2940_v17 = vmul.f32 %v6529_v59, %v7497_v43  ;;  %v5124_v43 = vld [vmem:[%s8088_s10 + $0x20] sm:$0xff] }
 0xde8   : > { %5870 = vmatmul.mubr.msk.f32.gmra.mrb[50].mxu1 %vm840_vm3, %v2945_v47  ;;  %v2939_v50 = vmul.f32 %v6531_v53, %v7499_v5  ;;  %v5125_v5 = vld [vmem:[%s8088_s10 + $0x28] sm:$0xff]  ;;  %v3093_v47 = vrot.slane %v7338_v19, %v7132_v15 }
 0xde9   : > { %5872 = vmatprep.mubr.msk.f32.mxu1 %vm840_vm3, %v2946_v26  ;;  %v2948_v61 = vmul.f32 %v2940_v17, %v7076_v48  ;;  %v6282_v34 = vpack.c.bf16 %v5125_v5, %v5124_v43  ;;  %v5127_v26 = vld [vmem:[%s8088_s10 + $0x38] sm:$0xff] }
 0xdea   : > { %v2947_v58 = vmul.f32 %v2939_v50, %v7076_v48  ;;  %v6286_v59 = vpack.c.bf16 %v5127_v26, %v5126_v42  ;;  %v5139_v26 = vld [vmem:[%s8084_s6 + $0xd0] sm:$0xff] }
 0xdeb   : > { %v6533_v23 = vpop.eup %6532  ;;  %6283 = vmatprep.subr.bf16.mxu0 %v6282_v34 }
 0xdec   : > { %5873 = vmatmul.mubr.msk.f32.gmra.mrb[52].mxu1 %vm840_vm3, %v2947_v58  ;;  %v2941_v37 = vmul.f32 %v6533_v23, %v7505_v24  ;;  %6285 = vmatpush3.bf16.msra.mxu0 %v6282_v34 }
 0xded   : > { %5875 = vmatprep.mubr.msk.f32.mxu1 %vm840_vm3, %v2948_v61  ;;  %6287 = vmatprep.subr.bf16.mxu0 %v6286_v59 }
 0xdee   : > { %v2949_v60 = vmul.f32 %v2941_v37, %v7076_v48 }
 0xdf0   : > { %5876 = vmatmul.mubr.msk.f32.gmra.mrb[54].mxu1 %vm840_vm3, %v2949_v60  ;;  %6289 = vmatpush3.bf16.msra.mxu0 %v6286_v59 }
 0xeb3   : > { %v5868_v46 = vpop.f32.mrb[48].mxu1 }
 0xeb4   : > { %v3040_v18 = vpop.f32.mrb[49].mxu1  ;;  %v3080_v2 = vmax.f32 %v5868_v46, 0.0 }
 0xeb5   : > { %v3079_v24 = vmax.f32 %v3040_v18, 0.0 }
 0xeb7   : > { %5882 = vmatprep.mubr.msk.f32.mxu1 %vm1378_vm6, %v3079_v24 }
 0xeb8   : > { %5883 = vmatmul.mubr.msk.f32.vlgmr.msra.gmra.mrb[56].mxu1 %vm1378_vm6, %v3080_v2 }
 0xebb   : > { %v5871_v56 = vpop.f32.mrb[50].mxu1 }
 0xebc   : > { %v3050_v40 = vpop.f32.mrb[51].mxu1  ;;  %v3082_v8 = vmax.f32 %v5871_v56, 0.0 }
 0xebd   : > { %v3081_v27 = vmax.f32 %v3050_v40, 0.0 }
 0xebf   : > { %v5874_v30 = vpop.f32.mrb[52].mxu1  ;;  %5885 = vmatprep.mubr.msk.f32.mxu1 %vm1378_vm6, %v3081_v27 }
 0xec0   : > { %v3060_v10 = vpop.f32.mrb[53].mxu1  ;;  %5886 = vmatmul.mubr.msk.f32.gmra.mrb[58].mxu1 %vm1378_vm6, %v3082_v8  ;;  %v3084_v39 = vmax.f32 %v5874_v30, 0.0 }
 0xec1   : > { %v3083_v54 = vmax.f32 %v3060_v10, 0.0 }
 0xec3   : > { %v5877_v33 = vpop.f32.mrb[54].mxu1  ;;  %5888 = vmatprep.mubr.msk.f32.mxu1 %vm1378_vm6, %v3083_v54 }
 0xec4   : > { %v3070_v31 = vpop.f32.mrb[55].mxu1  ;;  %5889 = vmatmul.mubr.msk.f32.gmra.mrb[60].mxu1 %vm1378_vm6, %v3084_v39  ;;  %v3086_v49 = vmax.f32 %v5877_v33, 0.0 }
 0xec5   : > { %v3085_v0 = vmax.f32 %v3070_v31, 0.0 }
 0xec7   : > { %5891 = vmatprep.mubr.msk.f32.mxu1 %vm1378_vm6, %v3085_v0 }
 0xec8   : > { %5892 = vmatmul.mubr.msk.f32.gmra.mrb[62].mxu1 %vm1378_vm6, %v3086_v49 }
 0xf8b   : > { %v5884_v53 = vpop.f32.mrb[56].mxu1 }
 0xf8c   : > { %v3190_v17 = vadd.f32 %v5884_v53, %v3093_v47  ;;  %v3184_v50 = vpop.f32.mrb[57].mxu1  ;;  %v5142_v53 = vld [vmem:[%s8084_s6 + $0xe8] sm:$0xff] }
 0xf8d   : > { %v3185_v61 = vadd.f32 %v3184_v50, %v3093_v47  ;;  %v5143_v50 = vld [vmem:[%s8084_s6 + $0xf0] sm:$0xff] }
 0xf8e   : > { %v3224_v58 = vmul.f32 %v3190_v17, %v7138_v20 }
 0xf8f   : > { %v3223_v23 = vmul.f32 %v3185_v61, %v7125_v35  ;;  %v5144_v61 = vld [vmem:[%s8084_s6 + $0xf8] sm:$0xff] }
 0xf90   : > { %v3232_v60 = vadd.f32 %v3224_v58, %v7342_v38  ;;  %v6302_v58 = vpack.c.bf16 %v5144_v61, %v5143_v50 }
 0xf91   : > { %v3231_v37 = vadd.f32 %v3223_v23, %v7344_v25  ;;  %v3247_v23 = vrot.slane %v7338_v19, %v7189_v45  ;;  %v5147_v19 = vld [vmem:[%s8084_s6 + $0x110] sm:$0xff] }
 0xf93   : > { %v5887_v43 = vpop.f32.mrb[58].mxu1  ;;  %5902 = vmatprep.mubr.msk.f32.mxu0 %vm831_vm4, %v3231_v37  ;;  %v5145_v37 = vld [vmem:[%s8084_s6 + $0x100] sm:$0xff] }
 0xf94   : > { %v3200_v5 = vadd.f32 %v5887_v43, %v3093_v47  ;;  %v3194_v34 = vpop.f32.mrb[59].mxu1  ;;  %5903 = vmatmul.mubr.msk.f32.vlgmr.msra.gmra.mrb[48].mxu0 %vm831_vm4, %v3232_v60  ;;  %v5146_v60 = vld [vmem:[%s8084_s6 + $0x108] sm:$0xff] }
 0xf95   : > { %v3195_v46 = vadd.f32 %v3194_v34, %v3093_v47 }
 0xf96   : > { %v3226_v18 = vmul.f32 %v3200_v5, %v7129_v12  ;;  %v6306_v5 = vpack.c.bf16 %v5146_v60, %v5145_v37 }
 0xf97   : > { %v3225_v24 = vmul.f32 %v3195_v46, %v7127_v11  ;;  %v5890_v2 = vpop.f32.mrb[60].mxu1 }
 0xf98   : > { %v3210_v56 = vadd.f32 %v5890_v2, %v3093_v47  ;;  %v3204_v40 = vpop.f32.mrb[61].mxu1  ;;  %v3234_v38 = vadd.f32 %v3226_v18, %v7354_v22  ;;  %v5148_v2 = vld [vmem:[%s8084_s6 + $0x118] sm:$0xff] }
 0xf99   : > { %v3233_v27 = vadd.f32 %v3225_v24, %v7350_v21  ;;  %v3205_v25 = vadd.f32 %v3204_v40, %v3093_v47  ;;  %v6310_v40 = vpack.c.bf16 %v5148_v2, %v5147_v19 }
 0xf9a   : > { %v3228_v8 = vmul.f32 %v3210_v56, %v7142_v3 }
 0xf9b   : > { %v3227_v30 = vmul.f32 %v3205_v25, %v7136_v1  ;;  %v5893_v10 = vpop.f32.mrb[62].mxu1  ;;  %5905 = vmatprep.mubr.msk.f32.mxu0 %vm831_vm4, %v3233_v27 }
 0xf9c   : > { %v3220_v54 = vadd.f32 %v5893_v10, %v3093_v47  ;;  %v3214_v39 = vpop.f32.mrb[63].mxu1  ;;  %5906 = vmatmul.mubr.msk.f32.gmra.mrb[50].mxu0 %vm831_vm4, %v3234_v38  ;;  %v3236_v0 = vadd.f32 %v3228_v8, %v7358_v41  ;;  %v5137_v41 = vld [vmem:[%s8084_s6 + $0xc0] sm:$0xff] }
 0xf9d   : > { %v3235_v33 = vadd.f32 %v3227_v30, %v7360_v52  ;;  %v3215_v31 = vadd.f32 %v3214_v39, %v3093_v47  ;;  %v5138_v52 = vld [vmem:[%s8084_s6 + $0xc8] sm:$0xff]  ;;  %v5141_v47 = vld [vmem:[%s8084_s6 + $0xe0] sm:$0xff] }
 0xf9e   : > { %v3230_v21 = vmul.f32 %v3220_v54, %v7158_v9  ;;  %v6290_v59 = vpack.c.bf16 %v5138_v52, %v5137_v41  ;;  %v6298_v17 = vpack.c.bf16 %v5142_v53, %v5141_v47 }
 0xf9f   : > { %v3229_v22 = vmul.f32 %v3215_v31, %v7149_v16  ;;  %5908 = vmatprep.mubr.msk.f32.mxu0 %vm831_vm4, %v3235_v33 }
 0xfa0   : > { %5909 = vmatmul.mubr.msk.f32.gmra.mrb[52].mxu0 %vm831_vm4, %v3236_v0  ;;  %v3238_v42 = vadd.f32 %v3230_v21, %v7366_v32  ;;  %v5140_v32 = vld [vmem:[%s8084_s6 + $0xd8] sm:$0xff]  ;;  %6291 = vmatprep.subr.bf16.mxu1 %v6290_v59 }
 0xfa1   : > { %v3237_v49 = vadd.f32 %v3229_v22, %v7368_v44  ;;  %v6294_v44 = vpack.c.bf16 %v5140_v32, %v5139_v26  ;;  %6293 = vmatpush3.bf16.msra.mxu1 %v6290_v59 }
 0xfa3   : > { %5911 = vmatprep.mubr.msk.f32.mxu0 %vm831_vm4, %v3237_v49  ;;  %6295 = vmatprep.subr.bf16.mxu1 %v6294_v44 }
 0xfa4   : > { %5912 = vmatmul.mubr.msk.f32.gmra.mrb[54].mxu0 %vm831_vm4, %v3238_v42 }
 0xfa5   : > { %6297 = vmatpush3.bf16.msra.mxu1 %v6294_v44 }
 0xfa6   : > { %6299 = vmatprep.subr.bf16.mxu1 %v6298_v17 }
 0xfa9   : > { %6301 = vmatpush3.bf16.msra.mxu1 %v6298_v17 }
 0xfaa   : > { %6303 = vmatprep.subr.bf16.mxu1 %v6302_v58 }
 0xfad   : > { %6305 = vmatpush3.bf16.msra.mxu1 %v6302_v58 }
 0xfae   : > { %6307 = vmatprep.subr.bf16.mxu1 %v6306_v5 }
 0xfb1   : > { %6309 = vmatpush3.bf16.msra.mxu1 %v6306_v5 }
 0xfb2   : > { %6311 = vmatprep.subr.bf16.mxu1 %v6310_v40 }
 0xfb5   : > { %6313 = vmatpush3.bf16.msra.mxu1 %v6310_v40 }
0x1067   : > { %v5904_v43 = vpop.f32.mrb[48].mxu0 }
0x1068   : > { %v3344_v34 = vadd.f32 %v5904_v43, %v3247_v23  ;;  %v3338_v46 = vpop.f32.mrb[49].mxu0 }
0x1069   : > { %v3339_v18 = vadd.f32 %v3338_v46, %v3247_v23 }
0x106a   : > { %v3378_v24 = vadd.f32 %v3344_v34, %v7214_v7 }
0x106b   : > { %v3377_v56 = vadd.f32 %v3339_v18, %v7217_v6 }
0x106c   : > { %v7629_v27 = vmul.f32 %v3378_v24, %v7138_v20 }
0x106d   : > { %v7632_v25 = vmul.f32 %v3377_v56, %v7125_v35 }
0x106e   : > { %3432 = vrot.lane.b32.xlu0 %v7629_v27, %s6592_s17  ;;  %v3405_v7 = vrot.slane %v7629_v27, 4 }
0x106f   : > { %v5907_v38 = vpop.f32.mrb[50].mxu0  ;;  %3430 = vrot.lane.b32.xlu1 %v7632_v25, %s6592_s17  ;;  %v3404_v6 = vrot.slane %v7632_v25, 4 }
0x1070   : > { %v3354_v8 = vadd.f32 %v5907_v38, %v3247_v23  ;;  %v3348_v30 = vpop.f32.mrb[51].mxu0 }
0x1071   : > { %v3349_v10 = vadd.f32 %v3348_v30, %v3247_v23  ;;  %v3406_v54 = vsel %vm3403_vm10, %v3404_v6, %v3405_v7  ;;  %v3427_v39 = vsel %vm3403_vm10, 0.0, %v3404_v6 }
0x1072   : > { %v3380_v33 = vadd.f32 %v3354_v8, %v7230_v14 }
0x1073   : > { %v3379_v31 = vadd.f32 %v3349_v10, %v7233_v4  ;;  %v5910_v0 = vpop.f32.mrb[52].mxu0  ;;  %3455 = vrot.lane.b32.xlu1 %v3406_v54, %s8101_s25 }
0x1074   : > { %v3364_v21 = vadd.f32 %v5910_v0, %v3247_v23  ;;  %v3358_v22 = vpop.f32.mrb[53].mxu0  ;;  %v7646_v49 = vmul.f32 %v3380_v33, %v7129_v12 }
0x1075   : > { %v3359_v42 = vadd.f32 %v3358_v22, %v3247_v23  ;;  %v7649_v41 = vmul.f32 %v3379_v31, %v7127_v11 }
0x1076   : > { %v3382_v52 = vadd.f32 %v3364_v21, %v7249_v55  ;;  %v3409_v26 = vrot.slane %v7646_v49, 4 }
0x1077   : > { %v3381_v14 = vadd.f32 %v3359_v42, %v7244_v36  ;;  %3434 = vrot.lane.b32.xlu0 %v7649_v41, %s6592_s17  ;;  %v5913_v4 = vpop.f32.mrb[54].mxu0  ;;  %3436 = vrot.lane.b32.xlu1 %v7646_v49, %s6592_s17  ;;  %v3407_v59 = vrot.slane %v7649_v41, 4 }
0x1078   : > { %v3368_v32 = vpop.f32.mrb[55].mxu0  ;;  %v3374_v44 = vadd.f32 %v5913_v4, %v3247_v23  ;;  %v7665_v36 = vmul.f32 %v3382_v52, %v7142_v3 }
0x1079   : > { %v3410_v47 = vsel %vm3403_vm10, %v3407_v59, %v3409_v26  ;;  %v3369_v53 = vadd.f32 %v3368_v32, %v3247_v23  ;;  %v3408_v55 = vsel %vm3403_vm10, %v3405_v7, %v3407_v59  ;;  %v7662_v17 = vmul.f32 %v3381_v14, %v7136_v1 }
0x107a   : > { %v3384_v50 = vadd.f32 %v3374_v44, %v7266_v62  ;;  %v3413_v23 = vrot.slane %v7665_v36, 4 }
0x107b   : > { %3459 = vrot.lane.b32.xlu0 %v3410_v47, %s8101_s25  ;;  %3457 = vrot.lane.b32.xlu1 %v3408_v55, %s8101_s25  ;;  %v3383_v61 = vadd.f32 %v3369_v53, %v7262_v28  ;;  %v3411_v58 = vrot.slane %v7662_v17, 4 }
0x107c   : > { %v7683_v62 = vmul.f32 %v3384_v50, %v7158_v9 }
0x107d   : > { %v3414_v37 = vsel %vm3403_vm10, %v3411_v58, %v3413_v23  ;;  %v3412_v60 = vsel %vm3403_vm10, %v3409_v26, %v3411_v58  ;;  %v7680_v43 = vmul.f32 %v3383_v61, %v7149_v16 }
0x107e   : > { %v3417_v5 = vrot.slane %v7683_v62, 4 }
0x107f   : > { %3438 = vrot.lane.b32.xlu0 %v7662_v17, %s6592_s17  ;;  %3440 = vrot.lane.b32.xlu1 %v7665_v36, %s6592_s17  ;;  %v3415_v28 = vrot.slane %v7680_v43, 4 }
0x1080   : > { %v3429_v18 = vsel %vm3403_vm10, %v3417_v5, 0.0 }
0x1081   : > { %v3418_v34 = vsel %vm3403_vm10, %v3415_v28, %v3417_v5  ;;  %v3416_v46 = vsel %vm3403_vm10, %v3413_v23, %v3415_v28  ;;  %v5157_v23 = vld [vmem:[%s8085_s7 + $0x40] sm:$0xff]  ;;  %v5160_v5 = vld [vmem:[%s8085_s7 + $0x58] sm:$0xff] }
0x1083   : > { %3463 = vrot.lane.b32.xlu0 %v3414_v37, %s8101_s25  ;;  %3461 = vrot.lane.b32.xlu1 %v3412_v60, %s8101_s25 }
0x1087   : > { %3442 = vrot.lane.b32.xlu0 %v7680_v43, %s6592_s17  ;;  %3444 = vrot.lane.b32.xlu1 %v7683_v62, %s6592_s17 }
0x108b   : > { %3467 = vrot.lane.b32.xlu0 %v3418_v34, %s8101_s25  ;;  %3465 = vrot.lane.b32.xlu1 %v3416_v46, %s8101_s25 }
0x108f   : > { %3469 = vrot.lane.b32.xlu1 %v3429_v18, %s8101_s25 }
0x10e0   : > { %v3433_v19 = vpop.permute.xlu0 %3432 }
0x10e1   : > { %v3431_v24 = vpop.permute.xlu1 %3430  ;;  %v3480_v6 = vsel %vm831_vm4, %v3406_v54, %v3433_v19 }
0x10e2   : > { %v3479_v2 = vsel %vm831_vm4, %v3427_v39, %v3431_v24 }
0x10e5   : > { %v3456_v56 = vpop.permute.xlu1 %3455 }
0x10e6   : > { %v3487_v40 = vsel %vm840_vm3, %v3479_v2, %v3456_v56 }
0x10e7   : > { %5938 = vmatprep.mubr.msk.f32.mxu1 %vm865_vm5, %v3487_v40 }
0x10e9   : > { %v3435_v7 = vpop.permute.xlu0 %3434  ;;  %v3437_v38 = vpop.permute.xlu1 %3436 }
0x10ea   : > { %v3481_v10 = vsel %vm831_vm4, %v3408_v55, %v3435_v7  ;;  %v3482_v21 = vsel %vm831_vm4, %v3410_v47, %v3437_v38 }
0x10ed   : > { %v3460_v8 = vpop.permute.xlu0 %3459  ;;  %v3458_v30 = vpop.permute.xlu1 %3457 }
0x10ee   : > { %v3488_v33 = vsel %vm840_vm3, %v3480_v6, %v3458_v30  ;;  %v3489_v31 = vsel %vm840_vm3, %v3481_v10, %v3460_v8 }
0x10ef   : > { %5939 = vmatmul.mubr.msk.f32.vlgmr.msra.gmra.mrb[64].mxu1 %vm865_vm5, %v3488_v33 }
0x10f0   : > { %5941 = vmatprep.mubr.msk.f32.mxu1 %vm865_vm5, %v3489_v31 }
0x10f1   : > { %v3439_v39 = vpop.permute.xlu0 %3438  ;;  %v3441_v0 = vpop.permute.xlu1 %3440 }
0x10f2   : > { %v3483_v54 = vsel %vm831_vm4, %v3412_v60, %v3439_v39  ;;  %v3484_v59 = vsel %vm831_vm4, %v3414_v37, %v3441_v0  ;;  %v5158_v37 = vld [vmem:[%s8085_s7 + $0x48] sm:$0xff]  ;;  %v5159_v60 = vld [vmem:[%s8085_s7 + $0x50] sm:$0xff] }
0x10f3   : > { %v6314_v28 = vpack.c.bf16 %v5158_v37, %v5157_v23 }
0x10f5   : > { %v3464_v22 = vpop.permute.xlu0 %3463  ;;  %v3462_v42 = vpop.permute.xlu1 %3461  ;;  %6315 = vmatprep.subr.bf16.mxu0 %v6314_v28 }
0x10f6   : > { %v3490_v52 = vsel %vm840_vm3, %v3482_v21, %v3462_v42  ;;  %v3491_v26 = vsel %vm840_vm3, %v3483_v54, %v3464_v22  ;;  %6317 = vmatpush3.bf16.msra.mxu0 %v6314_v28 }
0x10f7   : > { %5942 = vmatmul.mubr.msk.f32.gmra.mrb[66].mxu1 %vm865_vm5, %v3490_v52 }
0x10f8   : > { %5944 = vmatprep.mubr.msk.f32.mxu1 %vm865_vm5, %v3491_v26 }
0x10f9   : > { %v3443_v14 = vpop.permute.xlu0 %3442  ;;  %v3445_v4 = vpop.permute.xlu1 %3444 }
0x10fa   : > { %v3485_v47 = vsel %vm831_vm4, %v3416_v46, %v3443_v14  ;;  %v3486_v50 = vsel %vm831_vm4, %v3418_v34, %v3445_v4  ;;  %v6318_v34 = vpack.c.bf16 %v5160_v5, %v5159_v60  ;;  %v7738_v46 = vld [vmem:[%s8089_s11 + $0x10] sm:$0xff] }
0x10fb   : > { %v3511_v18 = vrot.slane %v7738_v46, %v6860_v63 }
0x10fc   : > { %6319 = vmatprep.subr.bf16.mxu0 %v6318_v34 }
0x10fd   : > { %v3468_v32 = vpop.permute.xlu0 %3467  ;;  %v3466_v44 = vpop.permute.xlu1 %3465  ;;  %6321 = vmatpush3.bf16.msra.mxu0 %v6318_v34 }
0x10fe   : > { %v3492_v53 = vsel %vm840_vm3, %v3484_v59, %v3466_v44  ;;  %v3493_v55 = vsel %vm840_vm3, %v3485_v47, %v3468_v32 }
0x10ff   : > { %5945 = vmatmul.mubr.msk.f32.gmra.mrb[68].mxu1 %vm865_vm5, %v3492_v53 }
0x1100   : > { %5947 = vmatprep.mubr.msk.f32.mxu1 %vm865_vm5, %v3493_v55 }
0x1101   : > { %v3470_v61 = vpop.permute.xlu1 %3469 }
0x1102   : > { %v3494_v58 = vsel %vm840_vm3, %v3486_v50, %v3470_v61 }
0x1103   : > { %5948 = vmatmul.mubr.msk.f32.gmra.mrb[70].mxu1 %vm865_vm5, %v3494_v58 }
0x11c2   : > { %v5940_v24 = vpop.f32.mrb[64].mxu1 }
0x11c3   : > { %v3602_v19 = vpop.f32.mrb[65].mxu1  ;;  %v3608_v2 = vadd.f32 %v5940_v24, %v3511_v18 }
0x11c4   : > { %v3603_v56 = vadd.f32 %v3602_v19, %v3511_v18 }
0x11c5   : > { %v7742_v40 = vmax.f32 %v3608_v2, 0.0 }
0x11c6   : > { %v7744_v7 = vmax.f32 %v3603_v56, 0.0 }
0x11c7   : > { %v3650_v30 = vsel %vm831_vm4, %v7742_v40, 0.0 }
0x11c8   : > { %v3649_v10 = vsel %vm831_vm4, %v7744_v7, 0.0 }
0x11c9   : > { %v3651_v39 = vadd.f32 %v3650_v30, %v3649_v10 }
0x11ca   : > { %v5943_v38 = vpop.f32.mrb[66].mxu1 }
0x11cb   : > { %v3612_v6 = vpop.f32.mrb[67].mxu1  ;;  %v3618_v33 = vadd.f32 %v5943_v38, %v3511_v18 }
0x11cc   : > { %v3613_v8 = vadd.f32 %v3612_v6, %v3511_v18 }
0x11cd   : > { %v7754_v0 = vmax.f32 %v3618_v33, 0.0 }
0x11ce   : > { %v7750_v31 = vmax.f32 %v3613_v8, 0.0 }
0x11cf   : > { %v3654_v26 = vsel %vm831_vm4, %v7754_v0, 0.0 }
0x11d0   : > { %v3652_v63 = vsel %vm831_vm4, %v7750_v31, 0.0 }
0x11d1   : > { %v3653_v22 = vadd.f32 %v3652_v63, %v3651_v39 }
0x11d2   : > { %v5946_v21 = vpop.f32.mrb[68].mxu1 }
0x11d3   : > { %v3628_v42 = vadd.f32 %v5946_v21, %v3511_v18  ;;  %v3622_v54 = vpop.f32.mrb[69].mxu1  ;;  %v3655_v32 = vadd.f32 %v3654_v26, %v3653_v22 }
0x11d4   : > { %v3623_v52 = vadd.f32 %v3622_v54, %v3511_v18 }
0x11d5   : > { %v7758_v14 = vmax.f32 %v3628_v42, 0.0 }
0x11d6   : > { %v7760_v4 = vmax.f32 %v3623_v52, 0.0  ;;  %v5949_v59 = vpop.f32.mrb[70].mxu1 }
0x11d7   : > { %v3638_v44 = vadd.f32 %v5949_v59, %v3511_v18  ;;  %v3632_v47 = vpop.f32.mrb[71].mxu1  ;;  %v3658_v61 = vsel %vm831_vm4, %v7758_v14, 0.0 }
0x11d8   : > { %v3656_v53 = vsel %vm831_vm4, %v7760_v4, 0.0  ;;  %v3633_v55 = vadd.f32 %v3632_v47, %v3511_v18 }
0x11d9   : > { %v3657_v50 = vadd.f32 %v3656_v53, %v3655_v32  ;;  %v7766_v58 = vmax.f32 %v3638_v44, 0.0 }
0x11da   : > { %v7768_v23 = vmax.f32 %v3633_v55, 0.0 }
0x11db   : > { %v3659_v37 = vadd.f32 %v3658_v61, %v3657_v50  ;;  %v3662_v5 = vsel %vm831_vm4, %v7766_v58, 0.0 }
0x11dc   : > { %v3660_v60 = vsel %vm831_vm4, %v7768_v23, 0.0 }
0x11dd   : > { %v3661_v28 = vadd.f32 %v3660_v60, %v3659_v37 }
0x11df   : > { %v3663_v34 = vadd.f32 %v3662_v5, %v3661_v28 }
0x11e1   : > { %v3664_v24 = vrot.slane %v3663_v34, 4 }
0x11e3   : > { %v3665_v19 = vadd.f32 %v3664_v24, %v3663_v34 }
0x11e5   : > { %v3666_v18 = vrot.slane %v3665_v19, 2 }
0x11e7   : > { %v3667_v2 = vadd.f32 %v3666_v18, %v3665_v19 }
0x11e9   : > { %v3668_v56 = vrot.slane %v3667_v2, 1 }
0x11eb   : > { %v3669_v38 = vadd.f32 %v3668_v56, %v3667_v2 }
0x11ed   : > { %v3670_v6 = vmul.f32 0.015625, %v3669_v38 }
0x11ef   : > { %v3671_v8 = vsub.f32 %v7744_v7, %v3670_v6  ;;  %v3672_v30 = vsub.f32 %v7742_v40, %v3670_v6  ;;  %v3673_v10 = vsub.f32 %v7750_v31, %v3670_v6  ;;  %v3674_v33 = vsub.f32 %v7754_v0, %v3670_v6 }
0x11f0   : > { %v3675_v63 = vsub.f32 %v7760_v4, %v3670_v6  ;;  %v3676_v42 = vsub.f32 %v7758_v14, %v3670_v6  ;;  %v3677_v32 = vsub.f32 %v7768_v23, %v3670_v6  ;;  %v3678_v55 = vsub.f32 %v7766_v58, %v3670_v6 }
0x11f1   : > { %v3679_v39 = vmul.f32 %v3671_v8, %v3671_v8  ;;  %v3680_v21 = vmul.f32 %v3672_v30, %v3672_v30  ;;  %v3681_v22 = vmul.f32 %v3673_v10, %v3673_v10  ;;  %v3682_v54 = vmul.f32 %v3674_v33, %v3674_v33 }
0x11f2   : > { %v3683_v44 = vmul.f32 %v3675_v63, %v3675_v63  ;;  %v3684_v50 = vmul.f32 %v3676_v42, %v3676_v42  ;;  %v3685_v60 = vmul.f32 %v3677_v32, %v3677_v32  ;;  %v3686_v34 = vmul.f32 %v3678_v55, %v3678_v55 }
0x11f3   : > { %v3687_v52 = vsel %vm831_vm4, %v3679_v39, 0.0  ;;  %v3688_v26 = vsel %vm831_vm4, %v3680_v21, 0.0  ;;  %v3690_v47 = vsel %vm831_vm4, %v3681_v22, 0.0  ;;  %v3692_v61 = vsel %vm831_vm4, %v3682_v54, 0.0 }
0x11f4   : > { %v3689_v59 = vadd.f32 %v3688_v26, %v3687_v52  ;;  %v3694_v28 = vsel %vm831_vm4, %v3683_v44, 0.0  ;;  %v3696_v24 = vsel %vm831_vm4, %v3684_v50, 0.0  ;;  %v3698_v18 = vsel %vm831_vm4, %v3685_v60, 0.0 }
0x11f5   : > { %v3700_v56 = vsel %vm831_vm4, %v3686_v34, 0.0 }
0x11f6   : > { %v3691_v53 = vadd.f32 %v3690_v47, %v3689_v59 }
0x11f8   : > { %v3693_v37 = vadd.f32 %v3692_v61, %v3691_v53 }
0x11fa   : > { %v3695_v5 = vadd.f32 %v3694_v28, %v3693_v37 }
0x11fc   : > { %v3697_v19 = vadd.f32 %v3696_v24, %v3695_v5 }
0x11fe   : > { %v3699_v2 = vadd.f32 %v3698_v18, %v3697_v19 }
0x1200   : > { %v3701_v38 = vadd.f32 %v3700_v56, %v3699_v2 }
0x1202   : > { %v3702_v39 = vrot.slane %v3701_v38, 4 }
0x1204   : > { %v3703_v6 = vadd.f32 %v3702_v39, %v3701_v38 }
0x1206   : > { %v3704_v21 = vrot.slane %v3703_v6, 2 }
0x1208   : > { %v3705_v22 = vadd.f32 %v3704_v21, %v3703_v6 }
0x120a   : > { %v3706_v54 = vrot.slane %v3705_v22, 1 }
0x120c   : > { %v3707_v52 = vadd.f32 %v3706_v54, %v3705_v22 }
0x120e   : > { %v3708_v26 = vmul.f32 0.015625, %v3707_v52 }
0x1210   : > { %v3709_v59 = vadd.f32 1e-05, %v3708_v26 }
0x1212   : > { %6534 = vrsqrt.f32 %v3709_v59 }
0x121c   : > { %v6535_v44 = vpop.eup %6534 }
0x121d   : > { %v3711_v47 = vmul.f32 %v6535_v44, %v3671_v8  ;;  %v3712_v53 = vmul.f32 %v6535_v44, %v3672_v30  ;;  %v3713_v50 = vmul.f32 %v6535_v44, %v3673_v10  ;;  %v3714_v61 = vmul.f32 %v6535_v44, %v3674_v33  ;;  %v6576_v30 = vld [vmem:[%s6977_s16] sm:$0xff] }
0x121e   : > { %v3715_v37 = vmul.f32 %v6535_v44, %v3675_v63  ;;  %v3716_v60 = vmul.f32 %v6535_v44, %v3676_v42  ;;  %v3717_v28 = vmul.f32 %v6535_v44, %v3677_v32  ;;  %v3718_v8 = vmul.f32 %v6535_v44, %v3678_v55 }
0x121f   : > { %5958 = vmatprep.mubr.msk.f32.mxu0 %vm831_vm4, %v3711_v47  ;;  %v3727_v10 = vrot.slane %v7738_v46, %v6926_v57 }
0x1220   : > { %5959 = vmatmul.mubr.msk.f32.vlgmr.msra.gmra.mrb[56].mxu0 %vm831_vm4, %v3712_v53 }
0x1221   : > { %5961 = vmatprep.mubr.msk.f32.mxu0 %vm831_vm4, %v3713_v50 }
0x1224   : > { %5962 = vmatmul.mubr.msk.f32.gmra.mrb[58].mxu0 %vm831_vm4, %v3714_v61 }
0x1225   : > { %5964 = vmatprep.mubr.msk.f32.mxu0 %vm831_vm4, %v3715_v37 }
0x1228   : > { %5965 = vmatmul.mubr.msk.f32.gmra.mrb[60].mxu0 %vm831_vm4, %v3716_v60 }
0x1229   : > { %5967 = vmatprep.mubr.msk.f32.mxu0 %vm831_vm4, %v3717_v28 }
0x122c   : > { %5968 = vmatmul.mubr.msk.f32.gmra.mrb[62].mxu0 %vm831_vm4, %v3718_v8 }
0x122d   : > { %5978 = vmatprep.mubr.msk.f32.mxu0 %vm831_vm4, %v6576_v30 }
0x12f3   : > { %v5960_v33 = vpop.f32.mrb[56].mxu0 }
0x12f4   : > { %v3824_v63 = vadd.f32 %v5960_v33, %v3727_v10  ;;  %v3818_v5 = vpop.f32.mrb[57].mxu0 }
0x12f5   : > { %v3819_v34 = vadd.f32 %v3818_v5, %v3727_v10 }
0x12f7   : > { %v6444_v24 = vpack.i.bf16 %v3824_v63, %v3819_v34  ;;  %v5963_v42 = vpop.f32.mrb[58].mxu0  ;;  %6006 = vmatprep.mubr.msk.f32.mxu1 %vm1378_vm6, %v3819_v34 }
0x12f8   : > { %v3834_v32 = vadd.f32 %v5963_v42, %v3727_v10  ;;  %v3828_v19 = vpop.f32.mrb[59].mxu0 }
0x12f9   : > { %v3829_v18 = vadd.f32 %v3828_v19, %v3727_v10  ;;  %6445 = vrot.lane.b32.xlu0 %v6444_v24, %s8100_s21  ;;  %v5171_v24 = vld [vmem:[%s8086_s8 + $0x50] sm:$0xff] }
0x12fb   : > { %v6449_v55 = vpack.i.bf16 %v3834_v32, %v3829_v18  ;;  %v5966_v2 = vpop.f32.mrb[60].mxu0 }
0x12fc   : > { %v3844_v56 = vadd.f32 %v5966_v2, %v3727_v10  ;;  %v3838_v38 = vpop.f32.mrb[61].mxu0  ;;  %v6579_v2 = vld [vmem:[%s6977_s16 + $0x18] sm:$0xff] }
0x12fd   : > { %v3839_v39 = vadd.f32 %v3838_v38, %v3727_v10  ;;  %6450 = vrot.lane.b32.xlu1 %v6449_v55, %s8100_s21  ;;  %v6578_v55 = vld [vmem:[%s6977_s16 + $0x10] sm:$0xff]  ;;  %v6581_v38 = vld [vmem:[%s6977_s16 + $0x28] sm:$0xff] }
0x12ff   : > { %v6454_v57 = vpack.i.bf16 %v3844_v56, %v3839_v39  ;;  %v5969_v6 = vpop.f32.mrb[62].mxu0 }
0x1300   : > { %v3854_v21 = vadd.f32 %v5969_v6, %v3727_v10  ;;  %v3848_v22 = vpop.f32.mrb[63].mxu0 }
0x1301   : > { %v3849_v54 = vadd.f32 %v3848_v22, %v3727_v10  ;;  %6455 = vrot.lane.b32.xlu0 %v6454_v57, %s8100_s21  ;;  %v6583_v57 = vld [vmem:[%s6977_s16 + $0x38] sm:$0xff] }
0x1303   : > { %v6459_v52 = vpack.i.bf16 %v3854_v21, %v3849_v54 }
0x1305   : > { %6460 = vrot.lane.b32.xlu1 %v6459_v52, %s8100_s21 }
0x136b   : > { %v6446_v26 = vpop.permute.xlu0 %6445 }
0x136c   : > { %v6448_v59 = vunpack.i.h.bf16 %v6446_v26  ;;  %v6447_v44 = vunpack.i.l.bf16 %v6446_v26 }
0x136e   : > { %v6330_v47 = vpack.c.bf16 %v6448_v59, %v6447_v44 }
0x136f   : > { %v6451_v53 = vpop.permute.xlu1 %6450 }
0x1370   : > { %v6453_v50 = vunpack.i.h.bf16 %v6451_v53  ;;  %v6452_v61 = vunpack.i.l.bf16 %v6451_v53  ;;  %6332 = vmatprep.subr.msk.bf16.mxu1 %vm6937_vm7, %v6330_v47 }
0x1371   : > { %6335 = vmatpush3.bf16.xpose.msk.msra.mxu1 %vm6937_vm7, %v6330_v47 }
0x1372   : > { %v6336_v37 = vpack.c.bf16 %v6453_v50, %v6452_v61 }
0x1373   : > { %v6456_v60 = vpop.permute.xlu0 %6455 }
0x1374   : > { %v6458_v28 = vunpack.i.h.bf16 %v6456_v60  ;;  %v6457_v8 = vunpack.i.l.bf16 %v6456_v60  ;;  %6338 = vmatprep.subr.msk.bf16.mxu1 %vm6937_vm7, %v6336_v37 }
0x1376   : > { %v6342_v30 = vpack.c.bf16 %v6458_v28, %v6457_v8 }
0x1377   : > { %v6461_v10 = vpop.permute.xlu1 %6460 }
0x1378   : > { %v6463_v33 = vunpack.i.h.bf16 %v6461_v10  ;;  %v6462_v5 = vunpack.i.l.bf16 %v6461_v10 }
0x1379   : > { %6341 = vmatpush3.bf16.xpose.msk.msra.mxu1 %vm6937_vm7, %v6336_v37 }
0x137a   : > { %6344 = vmatprep.subr.msk.bf16.mxu1 %vm6937_vm7, %v6342_v30  ;;  %v6348_v34 = vpack.c.bf16 %v6463_v33, %v6462_v5 }
0x1381   : > { %6347 = vmatpush3.bf16.xpose.msk.msra.mxu1 %vm6937_vm7, %v6342_v30 }
0x1382   : > { %6350 = vmatprep.subr.msk.bf16.mxu1 %vm6937_vm7, %v6348_v34 }
0x1389   : > { %6353 = vmatpush3.bf16.xpose.msk.msra.mxu1 %vm6937_vm7, %v6348_v34 }
0x1390   : > { %6007 = vmatmul.mubr.msk.f32.vlgmr.msra.gmra.mrb[72].mxu1 %vm1378_vm6, %v3824_v63  ;;  %v5170_v63 = vld [vmem:[%s8086_s8 + $0x48] sm:$0xff] }
0x1391   : > { %6009 = vmatprep.mubr.msk.f32.mxu1 %vm1378_vm6, %v3829_v18  ;;  %v6322_v42 = vpack.c.bf16 %v5170_v63, %v5169_v29  ;;  %v6577_v18 = vld [vmem:[%s6977_s16 + $0x8] sm:$0xff] }
0x1393   : > { %6323 = vmatprep.subr.bf16.mxu0 %v6322_v42 }
0x1394   : > { %6010 = vmatmul.mubr.msk.f32.gmra.mrb[74].mxu1 %vm1378_vm6, %v3834_v32  ;;  %v5172_v32 = vld [vmem:[%s8086_s8 + $0x58] sm:$0xff]  ;;  %6325 = vmatpush3.bf16.msra.mxu0 %v6322_v42  ;;  %v7874_v42 = vrot.slane %v7738_v46, %v7025_v51 }
0x1395   : > { %6012 = vmatprep.mubr.msk.f32.mxu1 %vm1378_vm6, %v3839_v39  ;;  %v6326_v19 = vpack.c.bf16 %v5172_v32, %v5171_v24  ;;  %v6582_v39 = vld [vmem:[%s6977_s16 + $0x30] sm:$0xff] }
0x1397   : > { %6327 = vmatprep.subr.bf16.mxu0 %v6326_v19 }
0x1398   : > { %6013 = vmatmul.mubr.msk.f32.gmra.mrb[76].mxu1 %vm1378_vm6, %v3844_v56  ;;  %6329 = vmatpush3.bf16.msra.mxu0 %v6326_v19  ;;  %v6580_v56 = vld [vmem:[%s6977_s16 + $0x20] sm:$0xff] }
0x1399   : > { %6015 = vmatprep.mubr.msk.f32.mxu1 %vm1378_vm6, %v3849_v54 }
0x139b   : > { %5979 = vmatmul.mubr.msk.f32.vlgmr.msra.gmra.mrb[64].mxu0 %vm831_vm4, %v6577_v18 }
0x139c   : > { %6016 = vmatmul.mubr.msk.f32.gmra.mrb[78].mxu1 %vm1378_vm6, %v3854_v21  ;;  %5981 = vmatprep.mubr.msk.f32.mxu0 %vm831_vm4, %v6578_v55 }
0x139f   : > { %5982 = vmatmul.mubr.msk.f32.gmra.mrb[66].mxu0 %vm831_vm4, %v6579_v2 }
0x13a0   : > { %5984 = vmatprep.mubr.msk.f32.mxu0 %vm831_vm4, %v6580_v56 }
0x13a3   : > { %5985 = vmatmul.mubr.msk.f32.gmra.mrb[68].mxu0 %vm831_vm4, %v6581_v38 }
0x13a4   : > { %5987 = vmatprep.mubr.msk.f32.mxu0 %vm831_vm4, %v6582_v39 }
0x13a7   : > { %5988 = vmatmul.mubr.msk.f32.gmra.mrb[70].mxu0 %vm831_vm4, %v6583_v57 }
0x1463   : > { %v6008_v6 = vpop.f32.mrb[72].mxu1 }
0x1464   : > { %v4099_v21 = vadd.f32 %v6008_v6, %v7006_v13  ;;  %v4093_v22 = vpop.f32.mrb[73].mxu1 }
0x1465   : > { %v4094_v54 = vadd.f32 %v4093_v22, %v7006_v13 }
0x1466   : > { %v4135_v52 = vsel %vm840_vm3, %v4099_v21, -inf }
0x1467   : > { %4136 = vmax.xlane.f32.xlu1 %v4135_v52  ;;  %v6011_v26 = vpop.f32.mrb[74].mxu1  ;;  %v4132_v59 = vsel %vm840_vm3, %v4094_v54, -inf }
0x1468   : > { %v4103_v44 = vpop.f32.mrb[75].mxu1  ;;  %4133 = vmax.xlane.f32.xlu0 %v4132_v59  ;;  %v4109_v53 = vadd.f32 %v6011_v26, %v7006_v13 }
0x1469   : > { %v4104_v47 = vadd.f32 %v4103_v44, %v7006_v13 }
0x146a   : > { %v4141_v10 = vsel %vm840_vm3, %v4109_v53, -inf }
0x146b   : > { %v6014_v50 = vpop.f32.mrb[76].mxu1  ;;  %v4138_v61 = vsel %vm840_vm3, %v4104_v47, -inf }
0x146c   : > { %v4113_v37 = vpop.f32.mrb[77].mxu1  ;;  %4139 = vmax.xlane.f32.xlu0 %v4138_v61  ;;  %v4119_v28 = vadd.f32 %v6014_v50, %v7006_v13 }
0x146d   : > { %v4114_v60 = vadd.f32 %v4113_v37, %v7006_v13 }
0x146e   : > { %v4147_v63 = vsel %vm840_vm3, %v4119_v28, -inf  ;;  %v5980_v32 = vpop.f32.mrb[64].mxu0 }
0x146f   : > { %v6017_v8 = vpop.f32.mrb[78].mxu1  ;;  %v4144_v30 = vsel %vm840_vm3, %v4114_v60, -inf  ;;  %v3938_v19 = vadd.f32 %v5980_v32, %v7874_v42  ;;  %v3932_v18 = vpop.f32.mrb[65].mxu0 }
0x1470   : > { %v4123_v33 = vpop.f32.mrb[79].mxu1  ;;  %4145 = vmax.xlane.f32.xlu1 %v4144_v30  ;;  %4142 = vmax.xlane.f32.xlu0 %v4141_v10  ;;  %v4129_v34 = vadd.f32 %v6017_v8, %v7006_v13  ;;  %v3933_v55 = vadd.f32 %v3932_v18, %v7874_v42 }
0x1471   : > { %v4124_v5 = vadd.f32 %v4123_v33, %v7006_v13 }
0x1472   : > { %v4153_v24 = vsel %vm840_vm3, %v4129_v34, -inf  ;;  %v6354_v13 = vpack.c.bf16 %v3938_v19, %v3933_v55  ;;  %v5983_v2 = vpop.f32.mrb[66].mxu0 }
0x1473   : > { %v4150_v29 = vsel %vm840_vm3, %v4124_v5, -inf }
0x1474   : > { %4151 = vmax.xlane.f32.xlu1 %v4150_v29  ;;  %4148 = vmax.xlane.f32.xlu0 %v4147_v63 }
0x1475   : > { %6355 = vmatprep.subr.bf16.mxu0 %v6354_v13 }
0x1476   : > { %6357 = vmatpush3.bf16.msra.mxu0 %v6354_v13 }
0x1478   : > { %4154 = vmax.xlane.f32.xlu0 %v4153_v24 }
0x14f4   : > { %v4137_v56 = vpop.xlane.xlu1 %4136 }
0x14f5   : > { %v4157_v38 = vsub.f32 %v4099_v21, %v4137_v56  ;;  %v4134_v39 = vpop.xlane.xlu0 %4133 }
0x14f6   : > { %v4156_v57 = vsub.f32 %v4094_v54, %v4134_v39 }
0x14f7   : > { %v4166_v6 = vmul.f32 1.442695, %v4157_v38 }
0x14f8   : > { %v4164_v22 = vmul.f32 1.442695, %v4156_v57 }
0x14f9   : > { %6536 = vpow2.f32 %v4166_v6  ;;  %v4140_v52 = vpop.xlane.xlu0 %4139 }
0x14fa   : > { %6538 = vpow2.f32 %v4164_v22  ;;  %v4158_v51 = vsub.f32 %v4104_v47, %v4140_v52  ;;  %v3948_v22 = vadd.f32 %v5983_v2, %v7874_v42 }
0x14fc   : > { %v4168_v26 = vmul.f32 1.442695, %v4158_v51  ;;  %v3942_v51 = vpop.f32.mrb[67].mxu0 }
0x14fd   : > { %v4146_v59 = vpop.xlane.xlu1 %4145  ;;  %v4143_v44 = vpop.xlane.xlu0 %4142 }
0x14fe   : > { %6540 = vpow2.f32 %v4168_v26  ;;  %v4160_v50 = vsub.f32 %v4114_v60, %v4146_v59  ;;  %v4159_v61 = vsub.f32 %v4109_v53, %v4143_v44  ;;  %v3943_v26 = vadd.f32 %v3942_v51, %v7874_v42  ;;  %v5986_v44 = vpop.f32.mrb[68].mxu0 }
0x1500   : > { %v4172_v37 = vmul.f32 1.442695, %v4160_v50  ;;  %v4170_v8 = vmul.f32 1.442695, %v4159_v61  ;;  %v6358_v59 = vpack.c.bf16 %v3948_v22, %v3943_v26  ;;  %v3952_v50 = vpop.f32.mrb[69].mxu0  ;;  %v3958_v61 = vadd.f32 %v5986_v44, %v7874_v42 }
0x1501   : > { %v4152_v30 = vpop.xlane.xlu1 %4151  ;;  %v4149_v10 = vpop.xlane.xlu0 %4148 }
0x1502   : > { %6542 = vpow2.f32 %v4172_v37  ;;  %v4162_v21 = vsub.f32 %v4124_v5, %v4152_v30  ;;  %v4161_v33 = vsub.f32 %v4119_v28, %v4149_v10  ;;  %v3953_v37 = vadd.f32 %v3952_v50, %v7874_v42  ;;  %6359 = vmatprep.subr.bf16.mxu0 %v6358_v59  ;;  %v5989_v30 = vpop.f32.mrb[70].mxu0 }
0x1503   : > { %v7878_v54 = vpop.eup %6536  ;;  %6544 = vpow2.f32 %v4170_v8  ;;  %6361 = vmatpush3.bf16.msra.mxu0 %v6358_v59  ;;  %v3962_v10 = vpop.f32.mrb[71].mxu0  ;;  %v3968_v2 = vadd.f32 %v5989_v30, %v7874_v42 }
0x1504   : > { %v7880_v29 = vpop.eup %6538  ;;  %v4176_v63 = vmul.f32 1.442695, %v4162_v21  ;;  %v4174_v47 = vmul.f32 1.442695, %v4161_v33  ;;  %v4183_v24 = vsel %vm840_vm3, %v7878_v54, 0.0  ;;  %v6362_v8 = vpack.c.bf16 %v3958_v61, %v3953_v37 }
0x1505   : > { %4184 = vadd.xlane.f32.xlu0 %v4183_v24  ;;  %v4155_v60 = vpop.xlane.xlu0 %4154  ;;  %v4180_v53 = vsel %vm840_vm3, %v7880_v29, 0.0  ;;  %v3963_v21 = vadd.f32 %v3962_v10, %v7874_v42 }
0x1506   : > { %6546 = vpow2.f32 %v4176_v63  ;;  %v4163_v32 = vsub.f32 %v4129_v34, %v4155_v60  ;;  %4181 = vadd.xlane.f32.xlu1 %v4180_v53  ;;  %6363 = vmatprep.subr.bf16.mxu0 %v6362_v8  ;;  %v5205_v63 = vld [vmem:[%s8087_s9 + $0x20] sm:$0xff] }
0x1507   : > { %6548 = vpow2.f32 %v4174_v47  ;;  %6365 = vmatpush3.bf16.msra.mxu0 %v6362_v8  ;;  %v6366_v33 = vpack.c.bf16 %v3968_v2, %v3963_v21  ;;  %v5206_v47 = vld [vmem:[%s8087_s9 + $0x28] sm:$0xff] }
0x1508   : > { %v7886_v28 = vpop.eup %6540  ;;  %v4178_v5 = vmul.f32 1.442695, %v4163_v32  ;;  %v6370_v24 = vpack.c.bf16 %v5206_v47, %v5205_v63 }
0x1509   : > { %v4186_v19 = vsel %vm840_vm3, %v7886_v28, 0.0  ;;  %6367 = vmatprep.subr.bf16.mxu0 %v6366_v33 }
0x150a   : > { %6550 = vpow2.f32 %v4178_v5  ;;  %4187 = vadd.xlane.f32.xlu1 %v4186_v19 }
0x150b   : > { %6369 = vmatpush3.bf16.msra.mxu0 %v6366_v33 }
0x150c   : > { %v7890_v18 = vpop.eup %6542  ;;  %6371 = vmatprep.subr.bf16.mxu0 %v6370_v24 }
0x150d   : > { %v7892_v55 = vpop.eup %6544  ;;  %v4192_v13 = vsel %vm840_vm3, %v7890_v18, 0.0 }
0x150e   : > { %4193 = vadd.xlane.f32.xlu1 %v4192_v13  ;;  %v4189_v34 = vsel %vm840_vm3, %v7892_v55, 0.0 }
0x150f   : > { %4190 = vadd.xlane.f32.xlu0 %v4189_v34 }
0x1510   : > { %v7898_v56 = vpop.eup %6546 }
0x1511   : > { %v7900_v38 = vpop.eup %6548  ;;  %v4198_v39 = vsel %vm840_vm3, %v7898_v56, 0.0 }
0x1512   : > { %4199 = vadd.xlane.f32.xlu1 %v4198_v39  ;;  %v4195_v57 = vsel %vm840_vm3, %v7900_v38, 0.0 }
0x1513   : > { %4196 = vadd.xlane.f32.xlu0 %v4195_v57 }
0x1514   : > { %v7906_v6 = vpop.eup %6550 }
0x1515   : > { %v4201_v52 = vsel %vm840_vm3, %v7906_v6, 0.0 }
0x1517   : > { %4202 = vadd.xlane.f32.xlu0 %v4201_v52 }
0x1592   : > { %v4185_v60 = vpop.xlane.xlu0 %4184 }
0x1593   : > { %6552 = vrcp.f32 %v4185_v60  ;;  %v4182_v53 = vpop.xlane.xlu1 %4181 }
0x1594   : > { %6554 = vrcp.f32 %v4182_v53 }
0x1597   : > { %v4188_v42 = vpop.xlane.xlu1 %4187 }
0x1598   : > { %6556 = vrcp.f32 %v4188_v42 }
0x159b   : > { %v4194_v32 = vpop.xlane.xlu1 %4193 }
0x159c   : > { %6558 = vrcp.f32 %v4194_v32  ;;  %v4191_v5 = vpop.xlane.xlu0 %4190 }
0x159d   : > { %v6553_v19 = vpop.eup %6552  ;;  %6560 = vrcp.f32 %v4191_v5 }
0x159e   : > { %v6555_v13 = vpop.eup %6554  ;;  %v4213_v34 = vmul.f32 %v6553_v19, %v7878_v54 }
0x159f   : > { %v4200_v39 = vpop.xlane.xlu1 %4199  ;;  %v4212_v57 = vmul.f32 %v6555_v13, %v7880_v29 }
0x15a0   : > { %6562 = vrcp.f32 %v4200_v39  ;;  %v4197_v22 = vpop.xlane.xlu0 %4196  ;;  %v4221_v26 = vmul.f32 %v4213_v34, %v7076_v48 }
0x15a1   : > { %6564 = vrcp.f32 %v4197_v22  ;;  %v4220_v52 = vmul.f32 %v4212_v57, %v7076_v48 }
0x15a2   : > { %v6557_v51 = vpop.eup %6556 }
0x15a3   : > { %6034 = vmatprep.mubr.msk.f32.mxu0 %vm840_vm3, %v4220_v52  ;;  %v4214_v59 = vmul.f32 %v6557_v51, %v7886_v28 }
0x15a4   : > { %v4203_v44 = vpop.xlane.xlu0 %4202  ;;  %6035 = vmatmul.mubr.msk.f32.vlgmr.msra.gmra.mrb[72].mxu0 %vm840_vm3, %v4221_v26 }
0x15a5   : > { %6566 = vrcp.f32 %v4203_v44  ;;  %v4222_v54 = vmul.f32 %v4214_v59, %v7076_v48  ;;  %6373 = vmatpush3.bf16.msra.mxu0 %v6370_v24  ;;  %v5217_v59 = vld [vmem:[%s8088_s10 + $0x50] sm:$0xff]  ;;  %v5218_v44 = vld [vmem:[%s8088_s10 + $0x58] sm:$0xff] }
0x15a6   : > { %v6559_v29 = vpop.eup %6558 }
0x15a7   : > { %v6561_v50 = vpop.eup %6560  ;;  %6037 = vmatprep.mubr.msk.f32.mxu0 %vm840_vm3, %v4222_v54  ;;  %v4216_v61 = vmul.f32 %v6559_v29, %v7890_v18  ;;  %v6378_v54 = vpack.c.bf16 %v5218_v44, %v5217_v59  ;;  %v4679_v29 = vld [vmem:[%s8090_s12] sm:$0xff] }
0x15a8   : > { %v4215_v37 = vmul.f32 %v6561_v50, %v7892_v55  ;;  %v4680_v50 = vld [vmem:[%s8090_s12 + $0x8] sm:$0xff] }
0x15a9   : > { %v4224_v8 = vmul.f32 %v4216_v61, %v7076_v48  ;;  %v6382_v61 = vpack.c.bf16 %v4680_v50, %v4679_v29 }
0x15aa   : > { %v6563_v30 = vpop.eup %6562  ;;  %v4223_v28 = vmul.f32 %v4215_v37, %v7076_v48  ;;  %v4371_v37 = vrot.slane %v7738_v46, %v7132_v15 }
0x15ab   : > { %v6565_v10 = vpop.eup %6564  ;;  %v4218_v2 = vmul.f32 %v6563_v30, %v7898_v56  ;;  %v5215_v56 = vld [vmem:[%s8088_s10 + $0x40] sm:$0xff]  ;;  %6383 = vmatprep.subr.bf16.mxu0 %v6382_v61 }
0x15ac   : > { %6038 = vmatmul.mubr.msk.f32.gmra.mrb[74].mxu0 %vm840_vm3, %v4223_v28  ;;  %v4217_v21 = vmul.f32 %v6565_v10, %v7900_v38  ;;  %v5216_v38 = vld [vmem:[%s8088_s10 + $0x48] sm:$0xff] }
0x15ad   : > { %6040 = vmatprep.mubr.msk.f32.mxu0 %vm840_vm3, %v4224_v8  ;;  %v4226_v33 = vmul.f32 %v4218_v2, %v7076_v48  ;;  %v6374_v24 = vpack.c.bf16 %v5216_v38, %v5215_v56 }
0x15ae   : > { %v4225_v18 = vmul.f32 %v4217_v21, %v7076_v48 }
0x15af   : > { %v6567_v63 = vpop.eup %6566  ;;  %6375 = vmatprep.subr.bf16.mxu1 %v6374_v24 }
0x15b0   : > { %6041 = vmatmul.mubr.msk.f32.gmra.mrb[76].mxu0 %vm840_vm3, %v4225_v18  ;;  %v4219_v55 = vmul.f32 %v6567_v63, %v7906_v6  ;;  %6377 = vmatpush3.bf16.msra.mxu1 %v6374_v24 }
0x15b1   : > { %6043 = vmatprep.mubr.msk.f32.mxu0 %vm840_vm3, %v4226_v33  ;;  %6379 = vmatprep.subr.bf16.mxu1 %v6378_v54 }
0x15b2   : > { %v4227_v47 = vmul.f32 %v4219_v55, %v7076_v48 }
0x15b4   : > { %6044 = vmatmul.mubr.msk.f32.gmra.mrb[78].mxu0 %vm840_vm3, %v4227_v47  ;;  %6381 = vmatpush3.bf16.msra.mxu1 %v6378_v54 }
0x1677   : > { %v6036_v60 = vpop.f32.mrb[72].mxu0 }
0x1678   : > { %v4318_v53 = vpop.f32.mrb[73].mxu0  ;;  %v4358_v42 = vmax.f32 %v6036_v60, 0.0 }
0x1679   : > { %v4357_v6 = vmax.f32 %v4318_v53, 0.0 }
0x167b   : > { %6050 = vmatprep.mubr.msk.f32.mxu0 %vm1378_vm6, %v4357_v6 }
0x167c   : > { %6051 = vmatmul.mubr.msk.f32.vlgmr.msra.gmra.mrb[80].mxu0 %vm1378_vm6, %v4358_v42 }
0x167d   : > { %6385 = vmatpush3.bf16.msra.mxu0 %v6382_v61 }
0x167f   : > { %v6039_v48 = vpop.f32.mrb[74].mxu0 }
0x1680   : > { %v4328_v32 = vpop.f32.mrb[75].mxu0  ;;  %v4360_v19 = vmax.f32 %v6039_v48, 0.0 }
0x1681   : > { %v4359_v5 = vmax.f32 %v4328_v32, 0.0 }
0x1683   : > { %v6042_v13 = vpop.f32.mrb[76].mxu0  ;;  %6053 = vmatprep.mubr.msk.f32.mxu0 %vm1378_vm6, %v4359_v5 }
0x1684   : > { %v4338_v34 = vpop.f32.mrb[77].mxu0  ;;  %6054 = vmatmul.mubr.msk.f32.gmra.mrb[82].mxu0 %vm1378_vm6, %v4360_v19  ;;  %v4362_v57 = vmax.f32 %v6042_v13, 0.0 }
0x1685   : > { %v4361_v39 = vmax.f32 %v4338_v34, 0.0 }
0x1687   : > { %v6045_v22 = vpop.f32.mrb[78].mxu0  ;;  %6056 = vmatprep.mubr.msk.f32.mxu0 %vm1378_vm6, %v4361_v39 }
0x1688   : > { %v4348_v52 = vpop.f32.mrb[79].mxu0  ;;  %6057 = vmatmul.mubr.msk.f32.gmra.mrb[84].mxu0 %vm1378_vm6, %v4362_v57  ;;  %v4364_v26 = vmax.f32 %v6045_v22, 0.0 }
0x1689   : > { %v4363_v51 = vmax.f32 %v4348_v52, 0.0 }
0x168b   : > { %6059 = vmatprep.mubr.msk.f32.mxu0 %vm1378_vm6, %v4363_v51 }
0x168c   : > { %6060 = vmatmul.mubr.msk.f32.gmra.mrb[86].mxu0 %vm1378_vm6, %v4364_v26 }
0x174f   : > { %v6052_v8 = vpop.f32.mrb[80].mxu0 }
0x1750   : > { %v4468_v30 = vadd.f32 %v6052_v8, %v4371_v37  ;;  %v4462_v28 = vpop.f32.mrb[81].mxu0 }
0x1751   : > { %v4463_v10 = vadd.f32 %v4462_v28, %v4371_v37 }
0x1752   : > { %v4502_v2 = vmul.f32 %v4468_v30, %v7138_v20 }
0x1753   : > { %v4501_v21 = vmul.f32 %v4463_v10, %v7125_v35 }
0x1754   : > { %v4510_v18 = vadd.f32 %v4502_v2, %v7742_v40 }
0x1755   : > { %v4509_v33 = vadd.f32 %v4501_v21, %v7744_v7 }
0x1757   : > { %v6055_v63 = vpop.f32.mrb[82].mxu0  ;;  %6070 = vmatprep.mubr.msk.f32.mxu1 %vm831_vm4, %v4509_v33 }
0x1758   : > { %v4478_v55 = vadd.f32 %v6055_v63, %v4371_v37  ;;  %v4472_v47 = vpop.f32.mrb[83].mxu0  ;;  %6071 = vmatmul.mubr.msk.f32.vlgmr.msra.gmra.mrb[80].mxu1 %vm831_vm4, %v4510_v18 }
0x1759   : > { %v4473_v15 = vadd.f32 %v4472_v47, %v4371_v37 }
0x175a   : > { %v4504_v56 = vmul.f32 %v4478_v55, %v7129_v12 }
0x175b   : > { %v4503_v38 = vmul.f32 %v4473_v15, %v7127_v11  ;;  %v6058_v24 = vpop.f32.mrb[84].mxu0 }
0x175c   : > { %v4488_v60 = vadd.f32 %v6058_v24, %v4371_v37  ;;  %v4482_v53 = vpop.f32.mrb[85].mxu0  ;;  %v4512_v40 = vadd.f32 %v4504_v56, %v7754_v0 }
0x175d   : > { %v4511_v6 = vadd.f32 %v4503_v38, %v7750_v31  ;;  %v4483_v7 = vadd.f32 %v4482_v53, %v4371_v37 }
0x175e   : > { %v4506_v42 = vmul.f32 %v4488_v60, %v7142_v3 }
0x175f   : > { %v4505_v48 = vmul.f32 %v4483_v7, %v7136_v1  ;;  %v6061_v32 = vpop.f32.mrb[86].mxu0  ;;  %6073 = vmatprep.mubr.msk.f32.mxu1 %vm831_vm4, %v4511_v6 }
0x1760   : > { %v4498_v5 = vadd.f32 %v6061_v32, %v4371_v37  ;;  %v4492_v19 = vpop.f32.mrb[87].mxu0  ;;  %6074 = vmatmul.mubr.msk.f32.gmra.mrb[82].mxu1 %vm831_vm4, %v4512_v40  ;;  %v4514_v39 = vadd.f32 %v4506_v42, %v7758_v14  ;;  %v4681_v14 = vld [vmem:[%s8090_s12 + $0x10] sm:$0xff] }
0x1761   : > { %v4513_v13 = vadd.f32 %v4505_v48, %v7760_v4  ;;  %v4493_v34 = vadd.f32 %v4492_v19, %v4371_v37  ;;  %v4682_v4 = vld [vmem:[%s8090_s12 + $0x18] sm:$0xff] }
0x1762   : > { %v4508_v31 = vmul.f32 %v4498_v5, %v7158_v9  ;;  %v6386_v52 = vpack.c.bf16 %v4682_v4, %v4681_v14 }
0x1763   : > { %v4507_v0 = vmul.f32 %v4493_v34, %v7149_v16  ;;  %6076 = vmatprep.mubr.msk.f32.mxu1 %vm831_vm4, %v4513_v13 }
0x1764   : > { %6077 = vmatmul.mubr.msk.f32.gmra.mrb[84].mxu1 %vm831_vm4, %v4514_v39  ;;  %v4516_v22 = vadd.f32 %v4508_v31, %v7766_v58  ;;  %6387 = vmatprep.subr.bf16.mxu0 %v6386_v52 }
0x1765   : > { %v4515_v57 = vadd.f32 %v4507_v0, %v7768_v23  ;;  %6389 = vmatpush3.bf16.msra.mxu0 %v6386_v52  ;;  %v4525_v23 = vrot.slane %v7738_v46, %v7189_v45 }
0x1767   : > { %6079 = vmatprep.mubr.msk.f32.mxu1 %vm831_vm4, %v4515_v57 }
0x1768   : > { %6080 = vmatmul.mubr.msk.f32.gmra.mrb[86].mxu1 %vm831_vm4, %v4516_v22 }
0x182b   : > { %v6072_v51 = vpop.f32.mrb[80].mxu1 }
0x182c   : > { %v4622_v58 = vadd.f32 %v6072_v51, %v4525_v23  ;;  %v4616_v26 = vpop.f32.mrb[81].mxu1 }
0x182d   : > { %v4617_v59 = vadd.f32 %v4616_v26, %v4525_v23 }
0x182e   : > { %v4656_v44 = vadd.f32 %v4622_v58, %v7629_v27 }
0x182f   : > { %v4655_v54 = vadd.f32 %v4617_v59, %v7632_v25 }
0x1830   : > { %v4664_v29 = vmul.f32 %v4656_v44, %v7138_v20 }
0x1831   : > { %v4663_v50 = vmul.f32 %v4655_v54, %v7125_v35 }
0x1832   : > { %4672 = vst.msk [vmem:[%s8011_s20 + $0x8] sm:$0xff] %vm831_vm4, %v4664_v29 }
0x1833   : > { %4671 = vst.msk [vmem:[%s8011_s20] sm:$0xff] %vm831_vm4, %v4663_v50  ;;  %v6075_v45 = vpop.f32.mrb[82].mxu1  ;;  %6090 = vmatprep.mubr.msk.f32.mxu0 %vm831_vm4, %v4663_v50 }
0x1834   : > { %v4632_v27 = vadd.f32 %v6075_v45, %v4525_v23  ;;  %v4626_v46 = vpop.f32.mrb[83].mxu1  ;;  %6091 = vmatmul.mubr.msk.f32.vlgmr.msra.gmra.mrb[88].mxu0 %vm831_vm4, %v4664_v29 }
0x1835   : > { %v4627_v61 = vadd.f32 %v4626_v46, %v4525_v23 }
0x1836   : > { %v4658_v25 = vadd.f32 %v4632_v27, %v7646_v49 }
0x1837   : > { %v4657_v37 = vadd.f32 %v4627_v61, %v7649_v41  ;;  %v6078_v8 = vpop.f32.mrb[84].mxu1 }
0x1838   : > { %v4666_v30 = vmul.f32 %v4658_v25, %v7129_v12  ;;  %v4642_v28 = vadd.f32 %v6078_v8, %v4525_v23  ;;  %v4636_v10 = vpop.f32.mrb[85].mxu1 }
0x1839   : > { %v4665_v2 = vmul.f32 %v4657_v37, %v7127_v11  ;;  %v4637_v21 = vadd.f32 %v4636_v10, %v4525_v23 }
0x183a   : > { %4674 = vst.msk [vmem:[%s8011_s20 + $0x18] sm:$0xff] %vm831_vm4, %v4666_v30  ;;  %v4660_v33 = vadd.f32 %v4642_v28, %v7665_v36 }
0x183b   : > { %4673 = vst.msk [vmem:[%s8011_s20 + $0x10] sm:$0xff] %vm831_vm4, %v4665_v2  ;;  %v4659_v49 = vadd.f32 %v4637_v21, %v7662_v17  ;;  %v6081_v18 = vpop.f32.mrb[86].mxu1  ;;  %6093 = vmatprep.mubr.msk.f32.mxu0 %vm831_vm4, %v4665_v2 }
0x183c   : > { %v4668_v41 = vmul.f32 %v4660_v33, %v7142_v3  ;;  %v4652_v63 = vadd.f32 %v6081_v18, %v4525_v23  ;;  %v4646_v55 = vpop.f32.mrb[87].mxu1  ;;  %6094 = vmatmul.mubr.msk.f32.gmra.mrb[90].mxu0 %vm831_vm4, %v4666_v30 }
0x183d   : > { %v4667_v47 = vmul.f32 %v4659_v49, %v7136_v1  ;;  %v4647_v15 = vadd.f32 %v4646_v55, %v4525_v23 }
0x183e   : > { %4676 = vst.msk [vmem:[%s8011_s20 + $0x28] sm:$0xff] %vm831_vm4, %v4668_v41  ;;  %v4662_v36 = vadd.f32 %v4652_v63, %v7683_v62 }
0x183f   : > { %4675 = vst.msk [vmem:[%s8011_s20 + $0x20] sm:$0xff] %vm831_vm4, %v4667_v47  ;;  %v4661_v17 = vadd.f32 %v4647_v15, %v7680_v43  ;;  %6096 = vmatprep.mubr.msk.f32.mxu0 %vm831_vm4, %v4667_v47  ;;  %v5227_v43 = vld [vmem:[%s8091_s13] ss:$0 sm:$0xff] }
0x1840   : > { %v4670_v56 = vmul.f32 %v4662_v36, %v7158_v9  ;;  %6097 = vmatmul.mubr.msk.f32.gmra.mrb[92].mxu0 %vm831_vm4, %v4668_v41 }
0x1841   : > { %v4669_v38 = vmul.f32 %v4661_v17, %v7149_v16 }
0x1842   : > { %4678 = vst.msk [vmem:[%s8011_s20 + $0x38] sm:$0xff] %vm831_vm4, %v4670_v56 }
0x1843   : > { %4677 = vst.msk [vmem:[%s8011_s20 + $0x30] sm:$0xff] %vm831_vm4, %v4669_v38  ;;  %6099 = vmatprep.mubr.msk.f32.mxu0 %vm831_vm4, %v4669_v38 }
0x1844   : > { %6100 = vmatmul.mubr.msk.f32.gmra.mrb[94].mxu0 %vm831_vm4, %v4670_v56 }
0x1907   : > { %v6092_v62 = vpop.f32.mrb[88].mxu0 }
0x1908   : > { %v4786_v24 = vadd.f32 %v6092_v62, %v5227_v43  ;;  %v4780_v60 = vpop.f32.mrb[89].mxu0 }
0x1909   : > { %v4781_v53 = vadd.f32 %v5227_v43, %v4780_v60 }
0x190a   : > { %v4820_v6 = vmul.f32 %v4786_v24, %v7138_v20 }
0x190b   : > { %v4819_v7 = vmul.f32 %v4781_v53, %v7125_v35 }
0x190c   : > { %4829 = vst.msk [vmem:[%s556_s30 + $0x8] sm:$0xff] %vm4827_vm11, %v4820_v6 }
0x190d   : > { %4828 = vst.msk [vmem:[%s556_s30] sm:$0xff] %vm4827_vm11, %v4819_v7 }
0x190f   : > { %v6095_v40 = vpop.f32.mrb[90].mxu0 }
0x1910   : > { %v4796_v42 = vadd.f32 %v6095_v40, %v5227_v43  ;;  %v4790_v48 = vpop.f32.mrb[91].mxu0 }
0x1911   : > { %v4791_v32 = vadd.f32 %v5227_v43, %v4790_v48 }
0x1912   : > { %v4822_v5 = vmul.f32 %v4796_v42, %v7129_v12 }
0x1913   : > { %v4821_v19 = vmul.f32 %v4791_v32, %v7127_v11  ;;  %v6098_v13 = vpop.f32.mrb[92].mxu0 }
0x1914   : > { %4831 = vst.msk [vmem:[%s556_s30 + $0x18] sm:$0xff] %vm4827_vm11, %v4822_v5  ;;  %v4806_v34 = vadd.f32 %v6098_v13, %v5227_v43  ;;  %v4800_v39 = vpop.f32.mrb[93].mxu0 }
0x1915   : > { %4830 = vst.msk [vmem:[%s556_s30 + $0x10] sm:$0xff] %vm4827_vm11, %v4821_v19  ;;  %v4801_v35 = vadd.f32 %v5227_v43, %v4800_v39 }
0x1916   : > { %v4824_v20 = vmul.f32 %v4806_v34, %v7142_v3 }
0x1917   : > { %v4823_v31 = vmul.f32 %v4801_v35, %v7136_v1  ;;  %v6101_v0 = vpop.f32.mrb[94].mxu0 }
0x1918   : > { %4833 = vst.msk [vmem:[%s556_s30 + $0x28] sm:$0xff] %vm4827_vm11, %v4824_v20  ;;  %v4816_v57 = vadd.f32 %v6101_v0, %v5227_v43  ;;  %v4810_v22 = vpop.f32.mrb[95].mxu0 }
0x1919   : > { %4832 = vst.msk [vmem:[%s556_s30 + $0x20] sm:$0xff] %vm4827_vm11, %v4823_v31  ;;  %v4811_v11 = vadd.f32 %v5227_v43, %v4810_v22 }
0x191a   : > { %v4826_v12 = vmul.f32 %v4816_v57, %v7158_v9 }
0x191b   : > { %v4825_v14 = vmul.f32 %v4811_v11, %v7149_v16 }
0x191c   : > { %4835 = vst.msk [vmem:[%s556_s30 + $0x38] sm:$0xff] %vm4827_vm11, %v4826_v12 }
0x191d   : > { %4834 = vst.msk [vmem:[%s556_s30 + $0x30] sm:$0xff] %vm4827_vm11, %v4825_v14 }
0x191e PF: > { %s26_s18 = sadd.s32 1, %s6590_s18  }
0x191f   : > { %p23_p4 = scmp.ge.s32.totalorder %s26_s18, 4  }
0x1921   :  { %25 = sbr.rel (!%p23_p4) target bundleno = 1 (0x1), region = 139 }

</bundles_post_ra>
